<compile_context>
chip_gen: v5e
topology: v5e:2x2
jax: 0.10.0
libtpu: 0.0.40
codegen_flags: <defaults>
</compile_context>

<pallas_src>
import numpy as np

import jax
import jax.numpy as jnp
from jax import lax
from jax.experimental import pallas as pl
from jax.experimental.pallas import tpu as pltpu

EPS = 1e-5  # PyTorch InstanceNorm2d default eps


# -----------------------------------------------------------------------------
# Trace-time constants
# -----------------------------------------------------------------------------
def _reflect(i, n):
    """PyTorch ReflectionPad2d index map (padded offset i -> source in [0, n))."""
    if i < 0:
        return -i
    if i >= n:
        return 2 * (n - 1) - i
    return i


def _tap_gather_matrix(H, W, k, stride, pad, H2, W2, Hp, Wp):
    """(k*k*H*W, Hp*Wp) 0/1 matrix fusing depthwise taps + valid-grid extraction
    + reflection padding into a single matmul over the flat pixel (lane) axis.

    Column o = i*Wp + j (padded output pixel) holds one 1 per tap d = ky*k+kx
    at row d*H*W + src, with src = (stride*rh + ky)*W + (stride*rw + kx) and
    (rh, rw) the reflected valid-grid coordinates of (i, j).
    """
    S = np.zeros((k * k * H * W, Hp * Wp), np.float32)
    for i in range(Hp):
        rh = _reflect(i - pad, H2)
        for j in range(Wp):
            rw = _reflect(j - pad, W2)
            o = i * Wp + j
            for ky in range(k):
                for kx in range(k):
                    d = ky * k + kx
                    src = (stride * rh + ky) * W + (stride * rw + kx)
                    S[d * H * W + src, o] = 1.0
    return S


def _interior_mask(H2, W2, Hp, Wp, pad):
    """(1, Hp*Wp) mask of the unpadded region (IN2 statistics domain)."""
    m = np.zeros((1, Hp * Wp), np.float32)
    for i in range(pad, pad + H2):
        m[0, i * Wp + pad:i * Wp + pad + W2] = 1.0
    return m


# -----------------------------------------------------------------------------
# Fused kernel
# -----------------------------------------------------------------------------
def _make_fused_bottleneck_kernel(*, k, H, W, Hp, Wp, n_valid, residual):
    f32, bf16 = jnp.float32, jnp.bfloat16
    k2 = k * k
    inv_n1 = 1.0 / float(H * W)
    inv_n2 = 1.0 / float(n_valid)
    inv_n3 = 1.0 / float(Hp * Wp)

    def _in_scale_shift(z, g, b, inv_n, mask=None):
        """One-pass InstanceNorm over the lane (pixel) axis, fused scale/shift."""
        zm = z if mask is None else z * mask
        s1 = jnp.sum(zm, axis=-1, keepdims=True)
        s2 = jnp.sum(zm * z, axis=-1, keepdims=True)
        mean = s1 * inv_n
        var = jnp.maximum(s2 * inv_n - mean * mean, 0.0)
        scale = g * lax.rsqrt(var + EPS)                   # (C, 1)
        return z * scale + (b - mean * scale)              # single FMA pass

    def kernel(x_ref, w1_ref, g1_ref, b1_ref, w2_ref, g2_ref, b2_ref,
               w3_ref, g3_ref, b3_ref, s_ref, m2_ref, o_ref):
        x = x_ref[...]                                             # (Cin, H*W) f32

        # ---- stage 1: 1x1 conv (bf16 MXU, f32 acc) + IN + ReLU6 ----
        y1 = jnp.dot(w1_ref[...], x.astype(bf16),
                     preferred_element_type=f32)                   # (C1, H*W)
        y1 = jnp.clip(_in_scale_shift(y1, g1_ref[...], b1_ref[...], inv_n1),
                      0.0, 6.0)

        # ---- stage 2: depthwise kxk conv + valid extraction + reflection pad,
        # fused into one lane-dense selection matmul.  LHS = per-tap scaled
        # copies of y1 (128-aligned lane concat), split hi/lo in bf16 so the
        # depthwise conv keeps ~f32 precision (the 0/1 RHS is exact in bf16).
        w2 = w2_ref[...]                                           # (k*k, C1, 1)
        y1w = jnp.concatenate([y1 * w2[d] for d in range(k2)],
                              axis=-1)                             # (C1, k*k*H*W)
        hi = y1w.astype(bf16)
        lo = (y1w - hi.astype(f32)).astype(bf16)
        s = s_ref[...]                                             # (k*k*H*W, Hp*Wp)
        z2 = (jnp.dot(hi, s, preferred_element_type=f32)
              + jnp.dot(lo, s, preferred_element_type=f32))        # (C1, Hp*Wp)
        z2 = jnp.clip(_in_scale_shift(z2, g2_ref[...], b2_ref[...], inv_n2,
                                      mask=m2_ref[...]), 0.0, 6.0)

        # ---- stage 3: 1x1 conv (bf16 MXU, f32 acc) + IN (+ residual) ----
        y3 = jnp.dot(w3_ref[...], z2.astype(bf16),
                     preferred_element_type=f32)                   # (Cout, Hp*Wp)
        y3 = _in_scale_shift(y3, g3_ref[...], b3_ref[...], inv_n3)
        if residual:
            y3 = y3 + x
        o_ref[...] = y3                                            # lane-dense store

    return kernel


# -----------------------------------------------------------------------------
# Wrapper (parameter layout, trace-time constants, pallas_call plumbing)
# -----------------------------------------------------------------------------
def bottleneck_forward(x_nchw, params, *, kernel_size, stride, t):
    assert stride in (1, 2)
    N, C_in, H, W = x_nchw.shape
    C1 = t * C_in
    C_out = params['w3'].shape[0]
    residual = (stride == 1 and C_in == C_out)
    k = kernel_size
    pad = k // 2
    H2 = (H - k) // stride + 1
    W2 = (W - k) // stride + 1
    Hp, Wp = H2 + 2 * pad, W2 + 2 * pad
    assert H2 >= 1 and W2 >= 1
    assert pad < H2 and pad < W2, "reflection pad wider than conv output"
    if residual:
        assert Hp == H and Wp == W
    f32, bf16 = jnp.float32, jnp.bfloat16

    # NCHW with flattened spatial already IS channels-on-sublanes /
    # pixels-on-lanes: no transposes on either side of the kernel.
    x_flat = x_nchw.reshape(N, C_in, H * W).astype(f32)

    # Parameters: cast / lay out once, outside the grid loop.
    w1 = params['w1'][:, :, 0, 0].astype(bf16)                       # (C1, Cin)
    w2 = params['w2'].reshape(C1, k * k).T.reshape(k * k, C1, 1).astype(f32)
    w3 = params['w3'][:, :, 0, 0].astype(bf16)                       # (Cout, C1)
    g1 = params['g1'].reshape(C1, 1).astype(f32)
    b1 = params['b1'].reshape(C1, 1).astype(f32)
    g2 = params['g2'].reshape(C1, 1).astype(f32)
    b2 = params['b2'].reshape(C1, 1).astype(f32)
    g3 = params['g3'].reshape(C_out, 1).astype(f32)
    b3 = params['b3'].reshape(C_out, 1).astype(f32)

    s_mat = jnp.asarray(
        _tap_gather_matrix(H, W, k, stride, pad, H2, W2, Hp, Wp), bf16)
    m2 = jnp.asarray(_interior_mask(H2, W2, Hp, Wp, pad), f32)

    kernel = _make_fused_bottleneck_kernel(
        k=k, H=H, W=W, Hp=Hp, Wp=Wp, n_valid=H2 * W2, residual=residual)

    # VMEM request derived from the chip (v7x only has 64 MiB physical VMEM).
    per_step = (2 * 4 * C_in * H * W                  # x block (double-buffered)
                + 2 * 4 * C_out * Hp * Wp             # out block (double-buffered)
                + 2 * (k * k * H * W) * Hp * Wp       # tap-gather matrix (bf16)
                + 4 * 4 * C1 * k * k * H * W          # y1w + hi/lo copies
                + 8 * 4 * C1 * max(H * W, Hp * Wp))   # other intermediates, slack
    try:
        vmem_cap = int(pltpu.get_tpu_info().vmem_capacity_bytes * 0.85)
    except Exception:  # conservative fallback: fits v7x's 64 MiB physical VMEM
        vmem_cap = 48 * 1024 * 1024
    vmem_limit = int(min(max(2 * per_step, 32 * 1024 * 1024), vmem_cap))

    flops = 2 * N * (H * W * C_in * C1
                     + 2 * C1 * (k * k * H * W) * (Hp * Wp)   # hi + lo passes
                     + C1 * (Hp * Wp) * C_out)
    bytes_accessed = (x_flat.size * 4 + N * C_out * Hp * Wp * 4
                      + int(s_mat.size) * 2 + (w1.size + w3.size) * 2
                      + (w2.size + m2.size) * 4 + 6 * (C1 + C_out) * 4)
    transcendentals = N * (2 * C1 + C_out)

    out = pl.pallas_call(
        kernel,
        grid=(N,),
        in_specs=[
            pl.BlockSpec((None, C_in, H * W), lambda n: (n, 0, 0)),    # x
            pl.BlockSpec((C1, C_in), lambda n: (0, 0)),                # w1
            pl.BlockSpec((C1, 1), lambda n: (0, 0)),                   # g1
            pl.BlockSpec((C1, 1), lambda n: (0, 0)),                   # b1
            pl.BlockSpec((k * k, C1, 1), lambda n: (0, 0, 0)),         # w2 taps
            pl.BlockSpec((C1, 1), lambda n: (0, 0)),                   # g2
            pl.BlockSpec((C1, 1), lambda n: (0, 0)),                   # b2
            pl.BlockSpec((C_out, C1), lambda n: (0, 0)),               # w3
            pl.BlockSpec((C_out, 1), lambda n: (0, 0)),                # g3
            pl.BlockSpec((C_out, 1), lambda n: (0, 0)),                # b3
            pl.BlockSpec((k * k * H * W, Hp * Wp), lambda n: (0, 0)),  # tap gather
            pl.BlockSpec((1, Hp * Wp), lambda n: (0, 0)),              # IN2 mask
        ],
        out_specs=pl.BlockSpec((None, C_out, Hp * Wp), lambda n: (n, 0, 0)),
        out_shape=jax.ShapeDtypeStruct((N, C_out, Hp * Wp), f32),
        compiler_params=pltpu.CompilerParams(
            dimension_semantics=("parallel",),
            vmem_limit_bytes=vmem_limit),
        cost_estimate=pl.CostEstimate(
            flops=int(flops),
            transcendentals=int(transcendentals),
            bytes_accessed=int(bytes_accessed)),
    )(x_flat, w1, g1, b1, w2, g2, b2, w3, g3, b3, s_mat, m2)

    return out.reshape(N, C_out, Hp, Wp)   # already NCHW


# -----------------------------------------------------------------------------
# Deterministic parameter init (PyTorch weight shapes)
# -----------------------------------------------------------------------------
def init_params(key, inp_c, out_c, kernel_size, t):
    C1 = t * inp_c
    k = kernel_size
    ks = jax.random.split(key, 9)
    return {
        'w1': 0.3 * jax.random.normal(ks[0], (C1, inp_c, 1, 1), jnp.float32),
        'g1': 1.0 + 0.1 * jax.random.normal(ks[1], (C1,), jnp.float32),
        'b1': 0.1 * jax.random.normal(ks[2], (C1,), jnp.float32),
        'w2': 0.3 * jax.random.normal(ks[3], (C1, 1, k, k), jnp.float32),
        'g2': 1.0 + 0.1 * jax.random.normal(ks[4], (C1,), jnp.float32),
        'b2': 0.1 * jax.random.normal(ks[5], (C1,), jnp.float32),
        'w3': 0.3 * jax.random.normal(ks[6], (out_c, C1, 1, 1), jnp.float32),
        'g3': 1.0 + 0.1 * jax.random.normal(ks[7], (out_c,), jnp.float32),
        'b3': 0.1 * jax.random.normal(ks[8], (out_c,), jnp.float32),
    }


# -----------------------------------------------------------------------------
# Pure-JAX reference (mirrors the PyTorch forward; the 1x1 convs use the same
# bf16-operand / f32-accumulate precision as the kernel's MXU matmuls, the
# depthwise conv stays f32)
# -----------------------------------------------------------------------------
def bottleneck_reference(x, p, *, kernel_size, stride, t):
    N, C_in, H, W = x.shape
    C1 = t * C_in
    C_out = p['w3'].shape[0]
    residual = (stride == 1 and C_in == C_out)
    pad = kernel_size // 2
    f32, bf16 = jnp.float32, jnp.bfloat16

    def inorm(y, g, b):
        m = jnp.mean(y, axis=(2, 3), keepdims=True)
        v = jnp.mean(jnp.square(y - m), axis=(2, 3), keepdims=True)
        return ((y - m) * lax.rsqrt(v + EPS)) * g[None, :, None, None] \
            + b[None, :, None, None]

    y = jnp.einsum('oi,nihw->nohw', p['w1'][:, :, 0, 0].astype(bf16),
                   x.astype(bf16), preferred_element_type=f32)
    y = jnp.clip(inorm(y, p['g1'], p['b1']), 0.0, 6.0)
    y = lax.conv_general_dilated(y, p['w2'], (stride, stride), 'VALID',
                                 dimension_numbers=('NCHW', 'OIHW', 'NCHW'),
                                 feature_group_count=C1,
                                 precision=jax.lax.Precision.HIGHEST)
    y = jnp.clip(inorm(y, p['g2'], p['b2']), 0.0, 6.0)
    y = jnp.pad(y, ((0, 0), (0, 0), (pad, pad), (pad, pad)), mode='reflect')
    y = jnp.einsum('oi,nihw->nohw', p['w3'][:, :, 0, 0].astype(bf16),
                   y.astype(bf16), preferred_element_type=f32)
    y = inorm(y, p['g3'], p['b3'])
    if residual:
        y = x + y
    return y


if __name__ == "__main__":
    key = jax.random.PRNGKey(0)
    configs = [
        # residual path (stride=1, inp_c == out_c)
        dict(inp_c=4, out_c=4, kernel_size=3, stride=1, t=1, N=2, H=16, W=16),
        # expansion (t=2), no residual (out_c != inp_c)
        dict(inp_c=4, out_c=8, kernel_size=3, stride=1, t=2, N=2, H=16, W=16),
    ]
    for i, cfg in enumerate(configs):
        kx, kp, key = jax.random.split(key, 3)
        x = jax.random.normal(
            kx, (cfg['N'], cfg['inp_c'], cfg['H'], cfg['W']), jnp.float32)
        params = init_params(kp, cfg['inp_c'], cfg['out_c'],
                             cfg['kernel_size'], cfg['t'])

        out = bottleneck_forward(x, params, kernel_size=cfg['kernel_size'],
                                 stride=cfg['stride'], t=cfg['t'])
        out = jax.block_until_ready(out)

        ref = bottleneck_reference(x, params, kernel_size=cfg['kernel_size'],
                                   stride=cfg['stride'], t=cfg['t'])
        assert out.shape == ref.shape, (out.shape, ref.shape)
        # Tolerance accounts for the bf16 MXU 1x1 convs (TPU-default conv
        # precision) amplified by the InstanceNorm rescaling.
        if not jnp.allclose(out, ref, rtol=5e-2, atol=5e-2):
            raise AssertionError(
                f"config {i}: max abs err = "
                f"{float(jnp.max(jnp.abs(out - ref)))}")
    print("KERNEL_OK")
</pallas_src>

<mosaic_0001>
module attributes {stable_mosaic.version = 11 : i64} {
  func.func @kernel(%arg0: i32, %arg1: memref<1x4x256xf32, #tpu.memory_space<vmem>>, %arg2: memref<4x4xbf16, #tpu.memory_space<vmem>>, %arg3: memref<4x1xf32, #tpu.memory_space<vmem>>, %arg4: memref<4x1xf32, #tpu.memory_space<vmem>>, %arg5: memref<9x4x1xf32, #tpu.memory_space<vmem>>, %arg6: memref<4x1xf32, #tpu.memory_space<vmem>>, %arg7: memref<4x1xf32, #tpu.memory_space<vmem>>, %arg8: memref<4x4xbf16, #tpu.memory_space<vmem>>, %arg9: memref<4x1xf32, #tpu.memory_space<vmem>>, %arg10: memref<4x1xf32, #tpu.memory_space<vmem>>, %arg11: memref<2304x256xbf16, #tpu.memory_space<vmem>>, %arg12: memref<1x256xf32, #tpu.memory_space<vmem>>, %arg13: memref<1x4x256xf32, #tpu.memory_space<vmem>>) attributes {dimension_semantics = [#tpu.dimension_semantics<parallel>], iteration_bounds = array<i64: 2>, scalar_prefetch = 0 : i64, scratch_operands = 0 : i64, tpu.core_type = #tpu.core_type<tc>, window_params = [{transform_indices = @transform_0, window_bounds = array<i64: 1, 4, 256>}, {pipeline_mode = #tpu.pipeline_mode<synchronous>, transform_indices = @transform_1, window_bounds = array<i64: 4, 4>}, {pipeline_mode = #tpu.pipeline_mode<synchronous>, transform_indices = @transform_2, window_bounds = array<i64: 4, 1>}, {pipeline_mode = #tpu.pipeline_mode<synchronous>, transform_indices = @transform_3, window_bounds = array<i64: 4, 1>}, {pipeline_mode = #tpu.pipeline_mode<synchronous>, transform_indices = @transform_4, window_bounds = array<i64: 9, 4, 1>}, {pipeline_mode = #tpu.pipeline_mode<synchronous>, transform_indices = @transform_5, window_bounds = array<i64: 4, 1>}, {pipeline_mode = #tpu.pipeline_mode<synchronous>, transform_indices = @transform_6, window_bounds = array<i64: 4, 1>}, {pipeline_mode = #tpu.pipeline_mode<synchronous>, transform_indices = @transform_7, window_bounds = array<i64: 4, 4>}, {pipeline_mode = #tpu.pipeline_mode<synchronous>, transform_indices = @transform_8, window_bounds = array<i64: 4, 1>}, {pipeline_mode = #tpu.pipeline_mode<synchronous>, transform_indices = @transform_9, window_bounds = array<i64: 4, 1>}, {pipeline_mode = #tpu.pipeline_mode<synchronous>, transform_indices = @transform_10, window_bounds = array<i64: 2304, 256>}, {pipeline_mode = #tpu.pipeline_mode<synchronous>, transform_indices = @transform_11, window_bounds = array<i64: 1, 256>}, {transform_indices = @transform_12, window_bounds = array<i64: 1, 4, 256>}]} {
    %c0 = arith.constant 0 : index
    %c0_0 = arith.constant 0 : index
    %c0_1 = arith.constant 0 : index
    %0 = vector.load %arg1[%c0, %c0_0, %c0_1] : memref<1x4x256xf32, #tpu.memory_space<vmem>>, vector<1x4x256xf32>
    %1 = vector.shape_cast %0 : vector<1x4x256xf32> to vector<4x256xf32>
    %c0_2 = arith.constant 0 : index
    %c0_3 = arith.constant 0 : index
    %2 = vector.load %arg2[%c0_2, %c0_3] : memref<4x4xbf16, #tpu.memory_space<vmem>>, vector<4x4xbf16>
    %3 = arith.truncf %1 : vector<4x256xf32> to vector<4x256xbf16>
    %cst = arith.constant dense<0.000000e+00> : vector<4x256xf32>
    %4 = tpu.matmul %2, %3, %cst {dimension_numbers = #tpu.dot_dimension_numbers<[1], [0], [0], [1], [0, 0, 1, 1], [], []>} : vector<4x4xbf16>, vector<4x256xbf16>, vector<4x256xf32> -> vector<4x256xf32>
    %c0_4 = arith.constant 0 : index
    %c0_5 = arith.constant 0 : index
    %5 = vector.load %arg3[%c0_4, %c0_5] : memref<4x1xf32, #tpu.memory_space<vmem>>, vector<4x1xf32>
    %c0_6 = arith.constant 0 : index
    %c0_7 = arith.constant 0 : index
    %6 = vector.load %arg4[%c0_6, %c0_7] : memref<4x1xf32, #tpu.memory_space<vmem>>, vector<4x1xf32>
    %cst_8 = arith.constant dense<0.000000e+00> : vector<4xf32>
    %7 = vector.multi_reduction <add>, %4, %cst_8 [1] : vector<4x256xf32> to vector<4xf32>
    %8 = vector.shape_cast %7 : vector<4xf32> to vector<4x1xf32>
    %9 = arith.mulf %4, %4 : vector<4x256xf32>
    %cst_9 = arith.constant dense<0.000000e+00> : vector<4xf32>
    %10 = vector.multi_reduction <add>, %9, %cst_9 [1] : vector<4x256xf32> to vector<4xf32>
    %11 = vector.shape_cast %10 : vector<4xf32> to vector<4x1xf32>
    %cst_10 = arith.constant 3.906250e-03 : f32
    %12 = vector.broadcast %cst_10 : f32 to vector<4x1xf32>
    %13 = arith.mulf %8, %12 : vector<4x1xf32>
    %cst_11 = arith.constant 3.906250e-03 : f32
    %14 = vector.broadcast %cst_11 : f32 to vector<4x1xf32>
    %15 = arith.mulf %11, %14 : vector<4x1xf32>
    %16 = arith.mulf %13, %13 : vector<4x1xf32>
    %17 = arith.subf %15, %16 : vector<4x1xf32>
    %cst_12 = arith.constant 0.000000e+00 : f32
    %18 = vector.broadcast %cst_12 : f32 to vector<4x1xf32>
    %19 = arith.maximumf %17, %18 : vector<4x1xf32>
    %cst_13 = arith.constant 9.99999974E-6 : f32
    %20 = vector.broadcast %cst_13 : f32 to vector<4x1xf32>
    %21 = arith.addf %19, %20 : vector<4x1xf32>
    %22 = math.rsqrt %21 : vector<4x1xf32>
    %23 = arith.mulf %5, %22 : vector<4x1xf32>
    %24 = vector.broadcast %23 : vector<4x1xf32> to vector<4x256xf32>
    %25 = arith.mulf %4, %24 : vector<4x256xf32>
    %26 = arith.mulf %13, %23 : vector<4x1xf32>
    %27 = arith.subf %6, %26 : vector<4x1xf32>
    %28 = vector.broadcast %27 : vector<4x1xf32> to vector<4x256xf32>
    %29 = arith.addf %25, %28 : vector<4x256xf32>
    %cst_14 = arith.constant 0.000000e+00 : f32
    %cst_15 = arith.constant 6.000000e+00 : f32
    %30 = vector.broadcast %cst_14 : f32 to vector<4x256xf32>
    %31 = arith.maximumf %30, %29 : vector<4x256xf32>
    %32 = vector.broadcast %cst_15 : f32 to vector<4x256xf32>
    %33 = arith.minimumf %32, %31 : vector<4x256xf32>
    %c0_16 = arith.constant 0 : index
    %c0_17 = arith.constant 0 : index
    %c0_18 = arith.constant 0 : index
    %34 = vector.load %arg5[%c0_16, %c0_17, %c0_18] : memref<9x4x1xf32, #tpu.memory_space<vmem>>, vector<9x4x1xf32>
    %35 = vector.extract_strided_slice %34 {offsets = [0, 0, 0], sizes = [1, 4, 1], strides = [1, 1, 1]} : vector<9x4x1xf32> to vector<1x4x1xf32>
    %36 = vector.shape_cast %35 : vector<1x4x1xf32> to vector<4x1xf32>
    %37 = vector.broadcast %36 : vector<4x1xf32> to vector<4x256xf32>
    %38 = arith.mulf %33, %37 : vector<4x256xf32>
    %39 = vector.extract_strided_slice %34 {offsets = [1, 0, 0], sizes = [1, 4, 1], strides = [1, 1, 1]} : vector<9x4x1xf32> to vector<1x4x1xf32>
    %40 = vector.shape_cast %39 : vector<1x4x1xf32> to vector<4x1xf32>
    %41 = vector.broadcast %40 : vector<4x1xf32> to vector<4x256xf32>
    %42 = arith.mulf %33, %41 : vector<4x256xf32>
    %43 = vector.extract_strided_slice %34 {offsets = [2, 0, 0], sizes = [1, 4, 1], strides = [1, 1, 1]} : vector<9x4x1xf32> to vector<1x4x1xf32>
    %44 = vector.shape_cast %43 : vector<1x4x1xf32> to vector<4x1xf32>
    %45 = vector.broadcast %44 : vector<4x1xf32> to vector<4x256xf32>
    %46 = arith.mulf %33, %45 : vector<4x256xf32>
    %47 = vector.extract_strided_slice %34 {offsets = [3, 0, 0], sizes = [1, 4, 1], strides = [1, 1, 1]} : vector<9x4x1xf32> to vector<1x4x1xf32>
    %48 = vector.shape_cast %47 : vector<1x4x1xf32> to vector<4x1xf32>
    %49 = vector.broadcast %48 : vector<4x1xf32> to vector<4x256xf32>
    %50 = arith.mulf %33, %49 : vector<4x256xf32>
    %51 = vector.extract_strided_slice %34 {offsets = [4, 0, 0], sizes = [1, 4, 1], strides = [1, 1, 1]} : vector<9x4x1xf32> to vector<1x4x1xf32>
    %52 = vector.shape_cast %51 : vector<1x4x1xf32> to vector<4x1xf32>
    %53 = vector.broadcast %52 : vector<4x1xf32> to vector<4x256xf32>
    %54 = arith.mulf %33, %53 : vector<4x256xf32>
    %55 = vector.extract_strided_slice %34 {offsets = [5, 0, 0], sizes = [1, 4, 1], strides = [1, 1, 1]} : vector<9x4x1xf32> to vector<1x4x1xf32>
    %56 = vector.shape_cast %55 : vector<1x4x1xf32> to vector<4x1xf32>
    %57 = vector.broadcast %56 : vector<4x1xf32> to vector<4x256xf32>
    %58 = arith.mulf %33, %57 : vector<4x256xf32>
    %59 = vector.extract_strided_slice %34 {offsets = [6, 0, 0], sizes = [1, 4, 1], strides = [1, 1, 1]} : vector<9x4x1xf32> to vector<1x4x1xf32>
    %60 = vector.shape_cast %59 : vector<1x4x1xf32> to vector<4x1xf32>
    %61 = vector.broadcast %60 : vector<4x1xf32> to vector<4x256xf32>
    %62 = arith.mulf %33, %61 : vector<4x256xf32>
    %63 = vector.extract_strided_slice %34 {offsets = [7, 0, 0], sizes = [1, 4, 1], strides = [1, 1, 1]} : vector<9x4x1xf32> to vector<1x4x1xf32>
    %64 = vector.shape_cast %63 : vector<1x4x1xf32> to vector<4x1xf32>
    %65 = vector.broadcast %64 : vector<4x1xf32> to vector<4x256xf32>
    %66 = arith.mulf %33, %65 : vector<4x256xf32>
    %67 = vector.extract_strided_slice %34 {offsets = [8, 0, 0], sizes = [1, 4, 1], strides = [1, 1, 1]} : vector<9x4x1xf32> to vector<1x4x1xf32>
    %68 = vector.shape_cast %67 : vector<1x4x1xf32> to vector<4x1xf32>
    %69 = vector.broadcast %68 : vector<4x1xf32> to vector<4x256xf32>
    %70 = arith.mulf %33, %69 : vector<4x256xf32>
    %71 = tpu.concatenate %38, %42, %46, %50, %54, %58, %62, %66, %70 in 1 : vector<4x256xf32>, vector<4x256xf32>, vector<4x256xf32>, vector<4x256xf32>, vector<4x256xf32>, vector<4x256xf32>, vector<4x256xf32>, vector<4x256xf32>, vector<4x256xf32> -> vector<4x2304xf32>
    %72 = arith.truncf %71 : vector<4x2304xf32> to vector<4x2304xbf16>
    %73 = arith.extf %72 : vector<4x2304xbf16> to vector<4x2304xf32>
    %74 = arith.subf %71, %73 : vector<4x2304xf32>
    %75 = arith.truncf %74 : vector<4x2304xf32> to vector<4x2304xbf16>
    %c0_19 = arith.constant 0 : index
    %c0_20 = arith.constant 0 : index
    %76 = vector.load %arg11[%c0_19, %c0_20] : memref<2304x256xbf16, #tpu.memory_space<vmem>>, vector<2304x256xbf16>
    %cst_21 = arith.constant dense<0.000000e+00> : vector<4x256xf32>
    %77 = tpu.matmul %72, %76, %cst_21 {dimension_numbers = #tpu.dot_dimension_numbers<[1], [0], [0], [1], [0, 0, 1, 1], [], []>} : vector<4x2304xbf16>, vector<2304x256xbf16>, vector<4x256xf32> -> vector<4x256xf32>
    %cst_22 = arith.constant dense<0.000000e+00> : vector<4x256xf32>
    %78 = tpu.matmul %75, %76, %cst_22 {dimension_numbers = #tpu.dot_dimension_numbers<[1], [0], [0], [1], [0, 0, 1, 1], [], []>} : vector<4x2304xbf16>, vector<2304x256xbf16>, vector<4x256xf32> -> vector<4x256xf32>
    %79 = arith.addf %77, %78 : vector<4x256xf32>
    %c0_23 = arith.constant 0 : index
    %c0_24 = arith.constant 0 : index
    %80 = vector.load %arg6[%c0_23, %c0_24] : memref<4x1xf32, #tpu.memory_space<vmem>>, vector<4x1xf32>
    %c0_25 = arith.constant 0 : index
    %c0_26 = arith.constant 0 : index
    %81 = vector.load %arg7[%c0_25, %c0_26] : memref<4x1xf32, #tpu.memory_space<vmem>>, vector<4x1xf32>
    %c0_27 = arith.constant 0 : index
    %c0_28 = arith.constant 0 : index
    %82 = vector.load %arg12[%c0_27, %c0_28] : memref<1x256xf32, #tpu.memory_space<vmem>>, vector<1x256xf32>
    %83 = vector.broadcast %82 : vector<1x256xf32> to vector<4x256xf32>
    %84 = arith.mulf %79, %83 : vector<4x256xf32>
    %cst_29 = arith.constant dense<0.000000e+00> : vector<4xf32>
    %85 = vector.multi_reduction <add>, %84, %cst_29 [1] : vector<4x256xf32> to vector<4xf32>
    %86 = vector.shape_cast %85 : vector<4xf32> to vector<4x1xf32>
    %87 = arith.mulf %84, %79 : vector<4x256xf32>
    %cst_30 = arith.constant dense<0.000000e+00> : vector<4xf32>
    %88 = vector.multi_reduction <add>, %87, %cst_30 [1] : vector<4x256xf32> to vector<4xf32>
    %89 = vector.shape_cast %88 : vector<4xf32> to vector<4x1xf32>
    %cst_31 = arith.constant 0.00510204071 : f32
    %90 = vector.broadcast %cst_31 : f32 to vector<4x1xf32>
    %91 = arith.mulf %86, %90 : vector<4x1xf32>
    %cst_32 = arith.constant 0.00510204071 : f32
    %92 = vector.broadcast %cst_32 : f32 to vector<4x1xf32>
    %93 = arith.mulf %89, %92 : vector<4x1xf32>
    %94 = arith.mulf %91, %91 : vector<4x1xf32>
    %95 = arith.subf %93, %94 : vector<4x1xf32>
    %cst_33 = arith.constant 0.000000e+00 : f32
    %96 = vector.broadcast %cst_33 : f32 to vector<4x1xf32>
    %97 = arith.maximumf %95, %96 : vector<4x1xf32>
    %cst_34 = arith.constant 9.99999974E-6 : f32
    %98 = vector.broadcast %cst_34 : f32 to vector<4x1xf32>
    %99 = arith.addf %97, %98 : vector<4x1xf32>
    %100 = math.rsqrt %99 : vector<4x1xf32>
    %101 = arith.mulf %80, %100 : vector<4x1xf32>
    %102 = vector.broadcast %101 : vector<4x1xf32> to vector<4x256xf32>
    %103 = arith.mulf %79, %102 : vector<4x256xf32>
    %104 = arith.mulf %91, %101 : vector<4x1xf32>
    %105 = arith.subf %81, %104 : vector<4x1xf32>
    %106 = vector.broadcast %105 : vector<4x1xf32> to vector<4x256xf32>
    %107 = arith.addf %103, %106 : vector<4x256xf32>
    %cst_35 = arith.constant 0.000000e+00 : f32
    %cst_36 = arith.constant 6.000000e+00 : f32
    %108 = vector.broadcast %cst_35 : f32 to vector<4x256xf32>
    %109 = arith.maximumf %108, %107 : vector<4x256xf32>
    %110 = vector.broadcast %cst_36 : f32 to vector<4x256xf32>
    %111 = arith.minimumf %110, %109 : vector<4x256xf32>
    %c0_37 = arith.constant 0 : index
    %c0_38 = arith.constant 0 : index
    %112 = vector.load %arg8[%c0_37, %c0_38] : memref<4x4xbf16, #tpu.memory_space<vmem>>, vector<4x4xbf16>
    %113 = arith.truncf %111 : vector<4x256xf32> to vector<4x256xbf16>
    %cst_39 = arith.constant dense<0.000000e+00> : vector<4x256xf32>
    %114 = tpu.matmul %112, %113, %cst_39 {dimension_numbers = #tpu.dot_dimension_numbers<[1], [0], [0], [1], [0, 0, 1, 1], [], []>} : vector<4x4xbf16>, vector<4x256xbf16>, vector<4x256xf32> -> vector<4x256xf32>
    %c0_40 = arith.constant 0 : index
    %c0_41 = arith.constant 0 : index
    %115 = vector.load %arg9[%c0_40, %c0_41] : memref<4x1xf32, #tpu.memory_space<vmem>>, vector<4x1xf32>
    %c0_42 = arith.constant 0 : index
    %c0_43 = arith.constant 0 : index
    %116 = vector.load %arg10[%c0_42, %c0_43] : memref<4x1xf32, #tpu.memory_space<vmem>>, vector<4x1xf32>
    %cst_44 = arith.constant dense<0.000000e+00> : vector<4xf32>
    %117 = vector.multi_reduction <add>, %114, %cst_44 [1] : vector<4x256xf32> to vector<4xf32>
    %118 = vector.shape_cast %117 : vector<4xf32> to vector<4x1xf32>
    %119 = arith.mulf %114, %114 : vector<4x256xf32>
    %cst_45 = arith.constant dense<0.000000e+00> : vector<4xf32>
    %120 = vector.multi_reduction <add>, %119, %cst_45 [1] : vector<4x256xf32> to vector<4xf32>
    %121 = vector.shape_cast %120 : vector<4xf32> to vector<4x1xf32>
    %cst_46 = arith.constant 3.906250e-03 : f32
    %122 = vector.broadcast %cst_46 : f32 to vector<4x1xf32>
    %123 = arith.mulf %118, %122 : vector<4x1xf32>
    %cst_47 = arith.constant 3.906250e-03 : f32
    %124 = vector.broadcast %cst_47 : f32 to vector<4x1xf32>
    %125 = arith.mulf %121, %124 : vector<4x1xf32>
    %126 = arith.mulf %123, %123 : vector<4x1xf32>
    %127 = arith.subf %125, %126 : vector<4x1xf32>
    %cst_48 = arith.constant 0.000000e+00 : f32
    %128 = vector.broadcast %cst_48 : f32 to vector<4x1xf32>
    %129 = arith.maximumf %127, %128 : vector<4x1xf32>
    %cst_49 = arith.constant 9.99999974E-6 : f32
    %130 = vector.broadcast %cst_49 : f32 to vector<4x1xf32>
    %131 = arith.addf %129, %130 : vector<4x1xf32>
    %132 = math.rsqrt %131 : vector<4x1xf32>
    %133 = arith.mulf %115, %132 : vector<4x1xf32>
    %134 = vector.broadcast %133 : vector<4x1xf32> to vector<4x256xf32>
    %135 = arith.mulf %114, %134 : vector<4x256xf32>
    %136 = arith.mulf %123, %133 : vector<4x1xf32>
    %137 = arith.subf %116, %136 : vector<4x1xf32>
    %138 = vector.broadcast %137 : vector<4x1xf32> to vector<4x256xf32>
    %139 = arith.addf %135, %138 : vector<4x256xf32>
    %140 = arith.addf %139, %1 : vector<4x256xf32>
    %c0_50 = arith.constant 0 : index
    %c0_51 = arith.constant 0 : index
    %c0_52 = arith.constant 0 : index
    %141 = vector.load %arg13[%c0_50, %c0_51, %c0_52] : memref<1x4x256xf32, #tpu.memory_space<vmem>>, vector<1x4x256xf32>
    %142 = vector.shape_cast %141 : vector<1x4x256xf32> to vector<4x256xf32>
    %143 = vector.shape_cast %140 : vector<4x256xf32> to vector<1x4x256xf32>
    tpu.vector_store %arg13[%c0_50, %c0_51, %c0_52], %143 {strides = array<i32>} : memref<1x4x256xf32, #tpu.memory_space<vmem>>, vector<1x4x256xf32>,
    return
  }
  func.func @transform_0(%arg0: i32) -> (i32, i32, i32) {
    %c0_i32 = arith.constant 0 : i32
    %c0_i32_0 = arith.constant 0 : i32
    %c0_i32_1 = arith.constant 0 : i32
    return %arg0, %c0_i32, %c0_i32_0 : i32, i32, i32
  }
  func.func @transform_1(%arg0: i32) -> (i32, i32) {
    %c0_i32 = arith.constant 0 : i32
    %c0_i32_0 = arith.constant 0 : i32
    %c0_i32_1 = arith.constant 0 : i32
    return %c0_i32, %c0_i32_0 : i32, i32
  }
  func.func @transform_2(%arg0: i32) -> (i32, i32) {
    %c0_i32 = arith.constant 0 : i32
    %c0_i32_0 = arith.constant 0 : i32
    %c0_i32_1 = arith.constant 0 : i32
    return %c0_i32, %c0_i32_0 : i32, i32
  }
  func.func @transform_3(%arg0: i32) -> (i32, i32) {
    %c0_i32 = arith.constant 0 : i32
    %c0_i32_0 = arith.constant 0 : i32
    %c0_i32_1 = arith.constant 0 : i32
    return %c0_i32, %c0_i32_0 : i32, i32
  }
  func.func @transform_4(%arg0: i32) -> (i32, i32, i32) {
    %c0_i32 = arith.constant 0 : i32
    %c0_i32_0 = arith.constant 0 : i32
    %c0_i32_1 = arith.constant 0 : i32
    %c0_i32_2 = arith.constant 0 : i32
    return %c0_i32, %c0_i32_0, %c0_i32_1 : i32, i32, i32
  }
  func.func @transform_5(%arg0: i32) -> (i32, i32) {
    %c0_i32 = arith.constant 0 : i32
    %c0_i32_0 = arith.constant 0 : i32
    %c0_i32_1 = arith.constant 0 : i32
    return %c0_i32, %c0_i32_0 : i32, i32
  }
  func.func @transform_6(%arg0: i32) -> (i32, i32) {
    %c0_i32 = arith.constant 0 : i32
    %c0_i32_0 = arith.constant 0 : i32
    %c0_i32_1 = arith.constant 0 : i32
    return %c0_i32, %c0_i32_0 : i32, i32
  }
  func.func @transform_7(%arg0: i32) -> (i32, i32) {
    %c0_i32 = arith.constant 0 : i32
    %c0_i32_0 = arith.constant 0 : i32
    %c0_i32_1 = arith.constant 0 : i32
    return %c0_i32, %c0_i32_0 : i32, i32
  }
  func.func @transform_8(%arg0: i32) -> (i32, i32) {
    %c0_i32 = arith.constant 0 : i32
    %c0_i32_0 = arith.constant 0 : i32
    %c0_i32_1 = arith.constant 0 : i32
    return %c0_i32, %c0_i32_0 : i32, i32
  }
  func.func @transform_9(%arg0: i32) -> (i32, i32) {
    %c0_i32 = arith.constant 0 : i32
    %c0_i32_0 = arith.constant 0 : i32
    %c0_i32_1 = arith.constant 0 : i32
    return %c0_i32, %c0_i32_0 : i32, i32
  }
  func.func @transform_10(%arg0: i32) -> (i32, i32) {
    %c0_i32 = arith.constant 0 : i32
    %c0_i32_0 = arith.constant 0 : i32
    %c0_i32_1 = arith.constant 0 : i32
    return %c0_i32, %c0_i32_0 : i32, i32
  }
  func.func @transform_11(%arg0: i32) -> (i32, i32) {
    %c0_i32 = arith.constant 0 : i32
    %c0_i32_0 = arith.constant 0 : i32
    %c0_i32_1 = arith.constant 0 : i32
    return %c0_i32, %c0_i32_0 : i32, i32
  }
  func.func @transform_12(%arg0: i32) -> (i32, i32, i32) {
    %c0_i32 = arith.constant 0 : i32
    %c0_i32_0 = arith.constant 0 : i32
    %c0_i32_1 = arith.constant 0 : i32
    return %arg0, %c0_i32, %c0_i32_0 : i32, i32, i32
  }
}

</mosaic_0001>

<bundles_post_ra>
// kernel: tpu_custom_call.1
= control target key start
LH: loop header
LB: loop body
LE: loop exit
PB: predicated region body
PF: predicated region fallthrough
CT: control target
= control target key end

     0   :  { %s7312_s0 = inlined_call_operand.hbm [shape: f32[2,4,256], index: 0, kind: input, shape index: {}]   ;;  %s7313_s1 = inlined_call_operand.hbm [shape: bf16[4,4], index: 1, kind: input, shape index: {}]   ;;  %s7314_s2 = inlined_call_operand.vmem [shape: f32[4,1], index: 2, kind: input, shape index: {}]   ;;  %s7315_s3 = inlined_call_operand.vmem [shape: f32[4,1], index: 3, kind: input, shape index: {}]   ;;  %s7316_s4 = inlined_call_operand.vmem [shape: f32[9,4,1], index: 4, kind: input, shape index: {}]   ;;  %s7317_s5 = inlined_call_operand.vmem [shape: f32[4,1], index: 5, kind: input, shape index: {}]   ;;  %s7318_s6 = inlined_call_operand.vmem [shape: f32[4,1], index: 6, kind: input, shape index: {}]   ;;  %s7319_s7 = inlined_call_operand.hbm [shape: bf16[4,4], index: 7, kind: input, shape index: {}]   ;;  %s7320_s8 = inlined_call_operand.vmem [shape: f32[4,1], index: 8, kind: input, shape index: {}]   ;;  %s7321_s9 = inlined_call_operand.vmem [shape: f32[4,1], index: 9, kind: input, shape index: {}]   ;;  %s7322_s10 = inlined_call_operand.hbm [shape: bf16[2304,256], index: 10, kind: input, shape index: {}]   ;;  %s7323_s11 = inlined_call_operand.hbm [shape: f32[1,256], index: 11, kind: input, shape index: {}]   ;;  %s7324_s12 = inlined_call_operand.hbm [shape: f32[2,4,256], index: 12, kind: output, shape index: {}]  }
   0x1   :  { %7588 = sst [smem:[#allocation270_spill]] %s7313_s1 }
   0x2   :  { %7589 = sst [smem:[#allocation271_spill]] %s7319_s7 }
   0x3   :  { %7590 = sst [smem:[#allocation272_spill]] %s7322_s10 }
   0x4   :  { %7591 = sst [smem:[#allocation273_spill]] %s7323_s11 }
   0x5   :  { %17 = vsyncpa [#allocation3], 0 }
   0x6   :  { %19 = vsyncpa [#allocation3 + $0x1], 0 }
   0x7   :  { %20 = vsyncpa [#allocation6], 0 }
   0x8   :  { %21 = vsyncpa [#allocation9], 0 }
   0x9   :  { %22 = vsyncpa [#allocation4], 0 }
   0xa   :  { %24 = vsyncpa [#allocation4 + $0x1], 0  ;;  %s5601_s21 = smov 0   ;;  %s5603_s22 = smov 0  }
   0xb   :  { %s5605_s23 = smov 0   ;;  %s5607_s24 = smov 0  }
   0xc LB: > { %7592 = sst [smem:[#allocation16_spill]] %s5523_s23  ;;  %s5625_s28 = sadd.s32 4294967295, %s5527_s24   ;;  %s5527_s24 = sphi %s5607_s24, %s8109_s24   ;;  %s5523_s23 = sphi %s5605_s23, %s8111_s23   ;;  %s5519_s22 = sphi %s5603_s22, %s8113_s22   ;;  %s5515_s21 = sphi %s5601_s21, %s8112_s21  }
   0xd   : > { %s7593_s1 = sld [smem:[#allocation270_spill]]  ;;  %p3737_p0 = scmp.ge.s32.totalorder %s5527_s24, 1 }
   0xe   : > { %p51_p1 = scmp.eq.s32.totalorder %s5625_s28, 0  ;;  %p318_p2 = scmp.lt.s32.totalorder %s5527_s24, 3 }
   0xf   : > { %s5529_s30 = smov [#allocation5]   ;;  %s7595_s10 = sld [smem:[#allocation272_spill]] }
  0x10   : > { %p5630_p3 = pnand %p3737_p0, %p318_p2  ;;  %s332_s13 = sshll.u32 %s5529_s30, 4  ;;  %s333_s13 = int_to_ptr.vmem [resolvable:$true] %s332_s13 }
  0x11   : > { %s5530_s18 = smov [#allocation8]   ;;  %s5531_s20 = smov 128  }
  0x12   : > { %p5224_p5 = pneg %p5630_p3  ;;  %s376_s19 = sshll.u32 %s5530_s18, 4  ;;  %s377_s19 = int_to_ptr.vmem [resolvable:$true] %s376_s19 }
  0x13   : > { %s330_s27 = sshll.u32 %s7593_s1, 4  ;;  %s5532_s25 = smov 8   ;;  %s331_s27 = int_to_ptr.hbm [resolvable:$true] %s330_s27 }
  0x14   : > { %p5642_p6 = pnand %p5224_p5, %p51_p1  ;;  %s7597_s7 = sld [smem:[#allocation271_spill]] }
  0x15   : > { %s374_s16 = sshll.u32 %s7595_s10, 4  ;;  %s5533_s15 = smov [#allocation7]   ;;  %s375_s16 = int_to_ptr.hbm [resolvable:$true] %s374_s16 }
  0x16   : > { %5227 = dma.hbm_to_vmem [thread:$0]  (!%p5642_p6), %s331_s27, 32, %s333_s13, [#allocation6]  }
  0x17   : > { %5233 = dma.hbm_to_vmem [thread:$0]  (!%p5642_p6), %s375_s16, 36864, %s377_s19, [#allocation9], %s5531_s20, %s5531_s20, %s5532_s25  }
  0x18   : > { %s359_s18 = sshll.u32 %s5533_s15, 4  ;;  %s7598_s11 = sld [smem:[#allocation273_spill]]  ;;  %s360_s18 = int_to_ptr.vmem [resolvable:$true] %s359_s18 }
  0x19   : > { %s5534_s16 = smov [#allocation10]   ;;  %s3736_s20 = sadd.s32 4294967294, %s5527_s24  }
  0x1a   : > { %s357_s14 = sshll.u32 %s7597_s7, 4  ;;  %s391_s19 = sshll.u32 %s5534_s16, 4  ;;  %s358_s14 = int_to_ptr.hbm [resolvable:$true] %s357_s14  ;;  %s392_s19 = int_to_ptr.vmem [resolvable:$true] %s391_s19 }
  0x1b   : > { %5230 = dma.hbm_to_vmem [thread:$0]  (!%p5642_p6), %s358_s14, 32, %s360_s18, [#allocation6]  }
  0x1c   : > { %s5662_s25 = sadd.s32 1, %s5527_s24   ;;  %s37_s30 = sadd.s32 1, %s5523_s23 }
  0x1d   : > { %7599 = sst [smem:[#allocation17_spill]] %s5662_s25  ;;  %s34_s26 = ssub.s32 %s5527_s24, %s5662_s25 }
  0x1e   : > { %s389_s1 = sshll.u32 %s7598_s11, 4  ;;  %p35_p7 = scmp.eq.s32.totalorder %s34_s26, 0  ;;  %s390_s1 = int_to_ptr.hbm [resolvable:$true] %s389_s1 }
  0x1f   : > { %5236 = dma.hbm_to_vmem [thread:$0]  (!%p5642_p6), %s390_s1, 32, %s392_s19, [#allocation9]  }
  0x20   : > { %p44_p8 = scmp.ne.s32.totalorder %s5523_s23, %s5519_s22  ;;  %p45_p9 = scmp.eq.s32.totalorder %s5527_s24, 0 }
  0x21   : > { %p50_p10 = scmp.ne.s32.totalorder %s5519_s22, %s5515_s21  ;;  %p305_p13 = scmp.eq.s32.totalorder %s5625_s28, 1 }
  0x22   : > { %s5673_s14 = scalar_select %p35_p7, %s5523_s23, %s37_s30  }
  0x23   : > { %p5675_p11 = por %p45_p9, %p44_p8  ;;  %p5681_p12 = por %p51_p1, %p50_p10 }
  0x24   : > { %7600 = sst [smem:[#allocation18_spill]] %s5673_s14  ;;  %p311_p0 = scmp.eq.s32.totalorder %s3736_s20, 1 }
  0x25   : > { %p5249_p2 = scmp.lt.s32.totalorder %s5527_s24, 2  ;;  %s402_s17 = sand.u32 1, %s5523_s23  }
  0x26   : > { %p5688_p5 = por %p305_p13, %p44_p8  ;;  %p5692_p6 = por %p311_p0, %p50_p10 }
  0x27   : > { %s3743_s13 = sshll.u32 %s402_s17, 3  ;;  %s4914_s16 = sshll.u32 %s5527_s24, 3 }
  0x28   : > { %s411_s30 = scalar_lea.hbm %s7312_s0, %s4914_s16  ;;  %s406_s7 = scalar_lea.vmem [#allocation2], %s3743_s13 }
  0x29   : > { %s415_s10 = sshll.u32 %s406_s7, 4  ;;  %s413_s11 = sshll.u32 %s411_s30, 4  ;;  %s416_s10 = int_to_ptr.vmem [resolvable:$true] %s415_s10  ;;  %s414_s11 = int_to_ptr.hbm [resolvable:$true] %s413_s11 }
  0x2a   : > { %p5702_p7 = pnand %p5249_p2, %p5675_p11  ;;  %s403_s14 = scalar_lea.sflag [#allocation3], %s402_s17 }
  0x2b   : > { %s5423_s23 = sshra.s32 %s414_s11, 4  ;;  %s5430_s16 = scalar_lea.hbm %s7312_s0, 16  ;;  %s5424_s23 = int_to_ptr.hbm [resolvable:$true] %s5423_s23 }
  0x2c   : > { %s5425_s25 = scalar_lea.hbm %s5424_s23, 8  ;;  %p5427_p9 = pneg %p5702_p7 }
  0x2d   : > { %p5426_p8 = scmp.ne.s32.totalorder %s5424_s23, %s5425_s25  ;;  %p5431_p11 = scmp.lt.s32.totalorder %s5424_s23, %s7312_s0 }
  0x2e   : > { %p5432_p0 = scmp.lt.s32.totalorder %s5430_s16, %s5425_s25 }
  0x2f   : > { %p5428_p10 = pnand %p5427_p9, %p5426_p8 }
  0x30   : > { %p5433_p2 = por %p5432_p0, %p5431_p11 }
  0x31   : > { %p5429_p13 = pneg %p5428_p10 }
  0x33   : > { %p5434_p4 = pnand %p5433_p2, %p5429_p13 }
  0x35   : > { %5437 = shalt.err (!%p5434_p4)
}
  0x36   : > { %5240 = dma.hbm_to_vmem [thread:$0]  (!%p5702_p7), %s414_s11, 128, %s416_s10, %s403_s14  }
  0x37   : > { %424 = sbr.rel (%p5630_p3) target bundleno = 1850 (0x73a), region = 68 }
  0x3c   : > { %s5719_s17 = sand.u32 1, %s5519_s22  }
  0x3d   : > { %s3747_s26 = sshll.u32 %s5719_s17, 3  ;;  %s427_s30 = scalar_lea.sflag [#allocation3], %s5719_s17 }
  0x3e   : > { %s430_s23 = scalar_lea.vmem [#allocation2], %s3747_s26 }
  0x3f   : > { %5498 = dma.done.wait (%p5681_p12), %s427_s30, 128  }
  0x40   : > { %5500 = vsyncadd (%p5681_p12), %s427_s30, 4294967168 }
  0x41   : > { %5502 = dma.done.wait (%p51_p1), [#allocation6], 64  }
  0x42   : > { %5504 = vsyncadd (%p51_p1), [#allocation6], 4294967232 }
  0x43   : > { %5506 = dma.done.wait (%p51_p1), [#allocation9], 36896  }
  0x44   : > { %5508 = vsyncadd (%p51_p1), [#allocation9], 4294930400  ;;  %v493_v0 = vld [vmem:[%s430_s23] sm:$0xff]  ;;  %vm507_vm0 = vcmask 1041408   ;;  %v494_v7 = vld [vmem:[#allocation5] sm:$0x3] }
  0x45   : > { %496 = vst [vmem:[#allocation1] ss:$2 sm:$0xff] %v493_v0  ;;  %vm503_vm1 = vcmask 31744   ;;  %vm542_vm2 = vcmask 1043456   ;;  %v5535_v20 = vmov 0   ;;  %s5203_s29 = sshll.u32 %s5625_s28, 3 }
  0x46   : > { %5294 = vset.pattern.permute.xlu1 %v5535_v20  ;;  %5295 = vset.pattern.permute.xlu2 %v5535_v20  ;;  %v592_v23 = vld [vmem:[%s7316_s4] sm:$0xf]  ;;  %v593_v29 = vld [vmem:[%s7316_s4 + $0x4] sm:$0xf]  ;;  %v594_v30 = vld [vmem:[%s7316_s4 + $0x8] sm:$0xf]  ;;  %s3623_s1 = scalar_lea.hbm %s7324_s12, %s5203_s29 }
  0x47   : > { %5296 = vset.pattern.permute.xlu0 %v5535_v20  ;;  %603 = vperm.xlu2 %5295, %v592_v23   ;;  %v596_v32 = vld [vmem:[%s7316_s4 + $0x10] sm:$0xf]  ;;  %v598_v37 = vld [vmem:[%s7316_s4 + $0x18] sm:$0xf]  ;;  %v540_v39 = vld [vmem:[%s7314_s2] sm:$0xf] }
  0x48   : > { %v600_v43 = vld [vmem:[%s7316_s4 + $0x20] sm:$0xf]  ;;  %v3813_v44 = vld [vmem:[#allocation8 + $0x70] sm:$0xf]  ;;  %v4930_v45 = vld [vmem:[#allocation8 + $0x74] sm:$0xf0] }
  0x49   : > { %v541_v46 = vld [vmem:[%s7315_s3] sm:$0xf]  ;;  %v5779_v47 = vor.u32 %v4930_v45, %v3813_v44  ;;  %v3877_v48 = vld [vmem:[#allocation8 + $0xf0] sm:$0xf]  ;;  %v4946_v49 = vld [vmem:[#allocation8 + $0xf4] sm:$0xf0] }
  0x4a   : > { %v3941_v50 = vld [vmem:[#allocation8 + $0x170] sm:$0xf]  ;;  %v5781_v52 = vor.u32 %v4946_v49, %v3877_v48  ;;  %v4962_v53 = vld [vmem:[#allocation8 + $0x174] sm:$0xf0]  ;;  %v3805_v58 = vld [vmem:[#allocation8 + $0x60] sm:$0xf] }
  0x4b   : > { %v4005_v54 = vld [vmem:[#allocation8 + $0x1f0] sm:$0xf]  ;;  %v4978_v55 = vld [vmem:[#allocation8 + $0x1f4] sm:$0xf0]  ;;  %2455 = vmatpush.bf16.msra.mxu2 %v5779_v47  ;;  %v5784_v56 = vor.u32 %v4962_v53, %v3941_v50  ;;  %v4928_v59 = vld [vmem:[#allocation8 + $0x64] sm:$0xf0] }
  0x4c   : > { %v497_v1 = vld.sshfl [vmem:[#allocation1] sm:$0xff pattern:$0x75316420]  ;;  %v498_v2 = vld.sshfl [vmem:[#allocation1 + $0x8] sm:$0xff pattern:$0x75316420]  ;;  %v5786_v57 = vor.u32 %v4978_v55, %v4005_v54  ;;  %2468 = vmatpush.bf16.msra.mxu3 %v5781_v52  ;;  %v5789_v61 = vor.u32 %v4928_v59, %v3805_v58 }
  0x4d   : > { %v501_v3 = vpack.c.bf16 %v497_v1, %v497_v1  ;;  %v502_v4 = vpack.c.bf16 %v498_v2, %v498_v2  ;;  %3598 = vst [vmem:[#allocation1] ss:$2 sm:$0xff] %v493_v0  ;;  %v3869_v60 = vld [vmem:[#allocation8 + $0xe0] sm:$0xf]  ;;  %v4944_v62 = vld [vmem:[#allocation8 + $0xe4] sm:$0xf0] }
  0x4e   : > { %v3933_v63 = vld [vmem:[#allocation8 + $0x160] sm:$0xf]  ;;  %v4960_v0 = vld [vmem:[#allocation8 + $0x164] sm:$0xf0]  ;;  %v5793_v1 = vor.u32 %v4944_v62, %v3869_v60  ;;  %v3973_v45 = vld [vmem:[#allocation8 + $0x1b0] sm:$0xf] }
  0x4f   : > { %v509_v5 = vsel %vm507_vm0, %v501_v3, 0  ;;  %v512_v6 = vsel %vm507_vm0, %v502_v4, 0  ;;  %610 = vperm.xlu2 %5295, %v593_v29   ;;  %v5795_v2 = vor.u32 %v4960_v0, %v3933_v63  ;;  %v3997_v3 = vld [vmem:[#allocation8 + $0x1e0] sm:$0xf]  ;;  %v4976_v4 = vld [vmem:[#allocation8 + $0x1e4] sm:$0xf0]  ;;  %2456 = vmatpush.bf16.msra.mxu2 %v5789_v61 }
  0x50   : > { %521 = vmatpush.bf16.msra.mxu0 %v509_v5  ;;  %534 = vmatpush.bf16.msra.mxu1 %v512_v6  ;;  %v3797_v5 = vld [vmem:[#allocation8 + $0x50] sm:$0xf]  ;;  %v4924_v20 = vld [vmem:[#allocation8 + $0x44] sm:$0xf0]  ;;  %v3853_v23 = vld [vmem:[#allocation8 + $0xc0] sm:$0xf] }
  0x51   : > { %2469 = vmatpush.bf16.msra.mxu3 %v5793_v1  ;;  %v3773_v48 = vld [vmem:[#allocation8 + $0x20] sm:$0xf]  ;;  %v4920_v50 = vld [vmem:[#allocation8 + $0x24] sm:$0xf0]  ;;  %s491_s20 = scalar_lea.vmem [#allocation11], %s3747_s26  ;;  %s3627_s7 = sshll.u32 %s3623_s1, 4  ;;  %s3628_s7 = int_to_ptr.hbm [resolvable:$true] %s3627_s7 }
  0x52   : > { %v4936_v53 = vld [vmem:[#allocation8 + $0xa4] sm:$0xf0]  ;;  %v5847_v54 = vor.u32 %v4920_v50, %v3773_v48  ;;  %v3901_v58 = vld [vmem:[#allocation8 + $0x120] sm:$0xf]  ;;  %v5026_v50 = vld [vmem:[#allocation8 + $0x374] sm:$0xf0] }
  0x53   : > { %3753 = vmatmul.msk.bf16.vlgmr.msra.gmra.mxu0 %vm503_vm1, %v494_v7  ;;  %3754 = vmatmul.msk.bf16.vlgmr.msra.gmra.mxu1 %vm503_vm1, %v494_v7  ;;  %v5797_v7 = vor.u32 %v4976_v4, %v3997_v3  ;;  %v4952_v59 = vld [vmem:[#allocation8 + $0x124] sm:$0xf0]  ;;  %v3965_v60 = vld [vmem:[#allocation8 + $0x1a0] sm:$0xf]  ;;  %v3765_v3 = vld [vmem:[#allocation8 + $0x10] sm:$0xf] }
  0x54   : > { %2481 = vmatpush.bf16.msrb.mxu0 %v5784_v56  ;;  %2494 = vmatpush.bf16.msrb.mxu1 %v5786_v57  ;;  %7610 = vst [vmem:[#allocation23_spill] sm:$0xff] %v5847_v54  ;;  %v5852_v62 = vor.u32 %v4952_v59, %v3901_v58  ;;  %v4968_v63 = vld [vmem:[#allocation8 + $0x1a4] sm:$0xf0]  ;;  %v4918_v4 = vld [vmem:[#allocation8 + $0x14] sm:$0xf0]  ;;  %s3625_s13 = sshll.u32 %s491_s20, 4  ;;  %s3626_s13 = int_to_ptr.vmem [resolvable:$true] %s3625_s13 }
  0x55   : > { %v5854_v0 = vor.u32 %v4968_v63, %v3965_v60  ;;  %v4061_v60 = vld [vmem:[#allocation8 + $0x260] sm:$0xf]  ;;  %v4992_v63 = vld [vmem:[#allocation8 + $0x264] sm:$0xf0]  ;;  %s3612_s28 = scalar_lea.sflag [#allocation4], %s5719_s17  ;;  %s5467_s16 = sshra.s32 %s3628_s7, 4  ;;  %s5468_s16 = int_to_ptr.hbm [resolvable:$true] %s5467_s16 }
  0x56   : > { %7612 = vst [vmem:[#allocation25_spill] sm:$0xff] %v5852_v62  ;;  %s5469_s19 = scalar_lea.hbm %s5468_s16, 8  ;;  %s5473_s26 = scalar_lea.hbm %s7324_s12, 16 }
  0x57   : > { %631 = vperm.xlu2 %5295, %v596_v32   ;;  %7613 = vst [vmem:[#allocation26_spill] sm:$0xff] %v5854_v0  ;;  %p5470_p1 = scmp.ne.s32.totalorder %s5468_s16, %s5469_s19  ;;  %p5474_p12 = scmp.lt.s32.totalorder %s5468_s16, %s7324_s12 }
  0x58   : > { %2482 = vmatpush.bf16.msrb.mxu0 %v5795_v2  ;;  %2495 = vmatpush.bf16.msrb.mxu1 %v5797_v7  ;;  %p5475_p7 = scmp.lt.s32.totalorder %s5473_s26, %s5469_s19 }
  0x59   : > { %p5471_p3 = pnand %p5470_p1, %p5688_p5 }
  0x5a   : > { %p5476_p8 = por %p5475_p7, %p5474_p12 }
  0x5b   : > { %p5472_p4 = pneg %p5471_p3 }
  0x5d   : > { %p5477_p9 = pnand %p5476_p8, %p5472_p4 }
  0x5f   : > { %645 = vperm.xlu2 %5295, %v598_v37   ;;  %v4922_v37 = vld [vmem:[#allocation8 + $0x34] sm:$0xf0] }
  0x67   : > { %659 = vperm.xlu2 %5295, %v600_v43  }
  0xd0   : > { %v5741_v8 = vpop.f32.mrf.mxu0  ;;  %v5743_v9 = vpop.f32.mrf.mxu1 }
  0xd1   : > { %v543_v10 = vsel %vm542_vm2, %v5741_v8, 0.0  ;;  %v544_v11 = vsel %vm542_vm2, %v5743_v9, 0.0  ;;  %v548_v13 = vmul.f32 %v5741_v8, %v5741_v8  ;;  %v549_v14 = vmul.f32 %v5743_v9, %v5743_v9 }
  0xd2   : > { %v545_v12 = vadd.f32 %v544_v11, %v543_v10  ;;  %v4926_v10 = vld [vmem:[#allocation8 + $0x54] sm:$0xf0]  ;;  %v3861_v11 = vld [vmem:[#allocation8 + $0xd0] sm:$0xf] }
  0xd3   : > { %v550_v15 = vsel %vm542_vm2, %v548_v13, 0.0  ;;  %v551_v16 = vsel %vm542_vm2, %v549_v14, 0.0  ;;  %v5800_v13 = vor.u32 %v4926_v10, %v3797_v5  ;;  %v3925_v14 = vld [vmem:[#allocation8 + $0x150] sm:$0xf]  ;;  %v4934_v10 = vld [vmem:[#allocation8 + $0x94] sm:$0xf0] }
  0xd4   : > { %546 = vadd.xlane.f32.xlu0 %v545_v12  ;;  %v552_v19 = vadd.f32 %v551_v16, %v550_v15  ;;  %v4942_v12 = vld [vmem:[#allocation8 + $0xd4] sm:$0xf0]  ;;  %v3989_v16 = vld [vmem:[#allocation8 + $0x1d0] sm:$0xf] }
  0xd5   : > { %v4958_v15 = vld [vmem:[#allocation8 + $0x154] sm:$0xf0]  ;;  %2457 = vmatpush.bf16.msra.mxu2 %v5800_v13  ;;  %v3829_v5 = vld [vmem:[#allocation8 + $0x90] sm:$0xf] }
  0xd8   : > { %v525_v17 = vpop.f32.mrf.mxu0  ;;  %v538_v18 = vpop.f32.mrf.mxu1 }
  0xd9   : > { %v5803_v17 = vor.u32 %v4942_v12, %v3861_v11  ;;  %v4974_v18 = vld [vmem:[#allocation8 + $0x1d4] sm:$0xf0]  ;;  %v3893_v11 = vld [vmem:[#allocation8 + $0x110] sm:$0xf] }
  0xda   : > { %v4950_v12 = vld [vmem:[#allocation8 + $0x114] sm:$0xf0] }
  0xdb   : > { %2470 = vmatpush.bf16.msra.mxu3 %v5803_v17 }
  0xdc   : > { %553 = vadd.xlane.f32.xlu0 %v552_v19  ;;  %v3789_v19 = vld [vmem:[#allocation8 + $0x40] sm:$0xf] }
  0xdd   : > { %v5812_v29 = vor.u32 %v4924_v20, %v3789_v19  ;;  %v3757_v19 = vld [vmem:[#allocation8] sm:$0xf] }
  0xdf   : > { %2458 = vmatpush.bf16.msra.mxu2 %v5812_v29 }
  0xf0   : > { %617 = vperm.xlu0 %5296, %v594_v30  }
 0x147   : > { %v547_v21 = vpop.xlane.xlu0 %546 }
 0x148   : > { %v555_v22 = vmul.f32 0.00390625, %v547_v21  ;;  %v5807_v21 = vor.u32 %v4958_v15, %v3925_v14  ;;  %v5862_v14 = vor.u32 %v4934_v10, %v3829_v5  ;;  %v5864_v15 = vor.u32 %v4950_v12, %v3893_v11  ;;  %v5008_v5 = vld [vmem:[#allocation8 + $0x2e4] sm:$0xf0]  ;;  %v4189_v10 = vld [vmem:[#allocation8 + $0x360] sm:$0xf] }
 0x149   : > { %v5024_v11 = vld [vmem:[#allocation8 + $0x364] sm:$0xf0] }
 0x14a   : > { %v557_v25 = vmul.f32 %v555_v22, %v555_v22  ;;  %2483 = vmatpush.bf16.msrb.mxu0 %v5807_v21  ;;  %7615 = vst [vmem:[#allocation28_spill] sm:$0xff] %v5862_v14 }
 0x14b   : > { %7616 = vst [vmem:[#allocation29_spill] sm:$0xff] %v5864_v15 }
 0x14f   : > { %v554_v24 = vpop.xlane.xlu0 %553 }
 0x150   : > { %v556_v26 = vmul.f32 0.00390625, %v554_v24  ;;  %v4940_v24 = vld [vmem:[#allocation8 + $0xc4] sm:$0xf0] }
 0x151   : > { %v5815_v30 = vor.u32 %v4940_v24, %v3853_v23  ;;  %v4916_v23 = vld [vmem:[#allocation8 + $0x4] sm:$0xf0]  ;;  %v3821_v24 = vld [vmem:[#allocation8 + $0x80] sm:$0xf] }
 0x152   : > { %v558_v27 = vsub.f32 %v556_v26, %v557_v25  ;;  %v3917_v25 = vld [vmem:[#allocation8 + $0x140] sm:$0xf]  ;;  %v4956_v26 = vld [vmem:[#allocation8 + $0x144] sm:$0xf0] }
 0x153   : > { %v5822_v32 = vor.u32 %v4956_v26, %v3917_v25  ;;  %2471 = vmatpush.bf16.msra.mxu3 %v5815_v30  ;;  %v4932_v25 = vld [vmem:[#allocation8 + $0x84] sm:$0xf0]  ;;  %v5871_v26 = vor.u32 %v4916_v23, %v3757_v19 }
 0x154   : > { %v559_v28 = vmax.f32 %v558_v27, 0.0  ;;  %v3981_v27 = vld [vmem:[#allocation8 + $0x1c0] sm:$0xf]  ;;  %v5040_v19 = vld [vmem:[#allocation8 + $0x3e4] sm:$0xf0] }
 0x155   : > { %2484 = vmatpush.bf16.msrb.mxu0 %v5822_v32  ;;  %7618 = vst [vmem:[#allocation31_spill] sm:$0xff] %v5871_v26 }
 0x156   : > { %v560_v31 = vadd.f32 1e-05, %v559_v28  ;;  %v4972_v28 = vld [vmem:[#allocation8 + $0x1c4] sm:$0xf0] }
 0x158   : > { %5297 = vrsqrt.f32 %v560_v31  ;;  %vm567_vm4 = vweird.f32 %v560_v31 }
 0x15e   : > { %v5298_v33 = vpop.eup %5297 }
 0x15f   : > { %v562_v34 = vmul.f32 %v5298_v33, %v560_v31  ;;  %vm568_vm3 = vweird.f32 %v5298_v33  ;;  %v595_v31 = vld [vmem:[%s7316_s4 + $0xc] sm:$0xf] }
 0x160   : > { %vm569_vm5 = vmor %vm567_vm4, %vm568_vm3 }
 0x161   : > { %v563_v35 = vmul.f32 %v5298_v33, %v562_v34  ;;  %v597_v34 = vld [vmem:[%s7316_s4 + $0x14] sm:$0xf] }
 0x163   : > { %v564_v36 = vmul.f32 0.5, %v563_v35  ;;  %v599_v35 = vld [vmem:[%s7316_s4 + $0x1c] sm:$0xf] }
 0x165   : > { %v565_v38 = vsub.f32 1.5, %v564_v36  ;;  %v3781_v36 = vld [vmem:[#allocation8 + $0x30] sm:$0xf] }
 0x167   : > { %v566_v40 = vmul.f32 %v5298_v33, %v565_v38  ;;  %v3845_v38 = vld [vmem:[#allocation8 + $0xb0] sm:$0xf] }
 0x169   : > { %v570_v41 = vsel %vm569_vm5, %v5298_v33, %v566_v40  ;;  %v5824_v33 = vor.u32 %v4972_v28, %v3981_v27  ;;  %v4938_v40 = vld [vmem:[#allocation8 + $0xb4] sm:$0xf0]  ;;  %v5873_v27 = vor.u32 %v4932_v25, %v3821_v24  ;;  %v3885_v28 = vld [vmem:[#allocation8 + $0x100] sm:$0xf]  ;;  %v4053_v24 = vld [vmem:[#allocation8 + $0x250] sm:$0xf] }
 0x16a   : > { %v571_v42 = vmul.f32 %v570_v41, %v540_v39  ;;  %v5836_v39 = vor.u32 %v4922_v37, %v3781_v36  ;;  %v3909_v41 = vld [vmem:[#allocation8 + $0x130] sm:$0xf]  ;;  %v5838_v43 = vor.u32 %v4938_v40, %v3845_v38  ;;  %v4964_v36 = vld [vmem:[#allocation8 + $0x184] sm:$0xf0]  ;;  %v4994_v38 = vld [vmem:[#allocation8 + $0x274] sm:$0xf0] }
 0x16b   : > { %7619 = vst [vmem:[#allocation32_spill] sm:$0xff] %v5873_v27  ;;  %v4069_v37 = vld [vmem:[#allocation8 + $0x270] sm:$0xf]  ;;  %v4990_v25 = vld [vmem:[#allocation8 + $0x254] sm:$0xf0] }
 0x16c   : > { %574 = vperm.xlu1 %5294, %v571_v42   ;;  %v579_v51 = vmul.f32 %v571_v42, %v555_v22  ;;  %v5809_v22 = vor.u32 %v4974_v18, %v3989_v16  ;;  %7606 = vst [vmem:[#allocation19_spill] sm:$0xff] %v5836_v39  ;;  %v4954_v42 = vld [vmem:[#allocation8 + $0x134] sm:$0xf0]  ;;  %2459 = vmatpush.bf16.msra.mxu2 %v5836_v39  ;;  %v3957_v16 = vld [vmem:[#allocation8 + $0x190] sm:$0xf] }
 0x16d   : > { %7607 = vst [vmem:[#allocation20_spill] sm:$0xff] %v5838_v43  ;;  %v5840_v44 = vor.u32 %v4954_v42, %v3909_v41  ;;  %2472 = vmatpush.bf16.msra.mxu3 %v5838_v43  ;;  %v4966_v18 = vld [vmem:[#allocation8 + $0x194] sm:$0xf0]  ;;  %v5880_v41 = vor.u32 %v4994_v38, %v4069_v37  ;;  %v4133_v42 = vld [vmem:[#allocation8 + $0x2f0] sm:$0xf] }
 0x16e   : > { %v580_v6 = vsub.f32 %v541_v46, %v579_v51  ;;  %2496 = vmatpush.bf16.msrb.mxu1 %v5809_v22  ;;  %v4970_v46 = vld [vmem:[#allocation8 + $0x1b4] sm:$0xf0]  ;;  %v3837_v51 = vld [vmem:[#allocation8 + $0xa0] sm:$0xf]  ;;  %v5867_v20 = vor.u32 %v4966_v18, %v3957_v16  ;;  %v5899_v16 = vor.u32 %v5024_v11, %v4189_v10  ;;  %v4709_v39 = vld [vmem:[#allocation8 + $0x770] sm:$0xf] }
 0x16f   : > { %7608 = vst [vmem:[#allocation21_spill] sm:$0xff] %v5840_v44  ;;  %v5843_v49 = vor.u32 %v4970_v46, %v3973_v45  ;;  %2485 = vmatpush.bf16.msrb.mxu0 %v5840_v44  ;;  %v5849_v55 = vor.u32 %v4936_v53, %v3837_v51  ;;  %v5010_v45 = vld [vmem:[#allocation8 + $0x2f4] sm:$0xf0]  ;;  %v4197_v46 = vld [vmem:[#allocation8 + $0x370] sm:$0xf] }
 0x170   : > { %2460 = vmatpush.bf16.msra.mxu2 %v5847_v54  ;;  %7617 = vst [vmem:[#allocation30_spill] sm:$0xff] %v5867_v20  ;;  %v5883_v48 = vor.u32 %v5010_v45, %v4133_v42  ;;  %v4261_v51 = vld [vmem:[#allocation8 + $0x3f0] sm:$0xf]  ;;  %v5042_v53 = vld [vmem:[#allocation8 + $0x3f4] sm:$0xf0]  ;;  %v5887_v58 = vor.u32 %v5026_v50, %v4197_v46 }
 0x171   : > { %7609 = vst [vmem:[#allocation22_spill] sm:$0xff] %v5843_v49  ;;  %2473 = vmatpush.bf16.msra.mxu3 %v5849_v55  ;;  %v5889_v59 = vor.u32 %v5042_v53, %v4261_v51  ;;  %v4253_v18 = vld [vmem:[#allocation8 + $0x3e0] sm:$0xf]  ;;  %v5022_v37 = vld [vmem:[#allocation8 + $0x354] sm:$0xf0]  ;;  %v5914_v51 = vpop.permute.xlu2 %603 }
 0x172   : > { %2497 = vmatpush.bf16.msrb.mxu1 %v5824_v33  ;;  %7611 = vst [vmem:[#allocation24_spill] sm:$0xff] %v5849_v55  ;;  %v5902_v23 = vor.u32 %v5040_v19, %v4253_v18  ;;  %v4245_v45 = vld [vmem:[#allocation8 + $0x3d0] sm:$0xf]  ;;  %v5038_v46 = vld [vmem:[#allocation8 + $0x3d4] sm:$0xf0] }
 0x173   : > { %2486 = vmatpush.bf16.msrb.mxu0 %v5852_v62  ;;  %7622 = vst [vmem:[#allocation35_spill] sm:$0xff] %v5880_v41  ;;  %v4045_v50 = vld [vmem:[#allocation8 + $0x240] sm:$0xf]  ;;  %v5917_v53 = vor.u32 %v5038_v46, %v4245_v45  ;;  %v5020_v18 = vld [vmem:[#allocation8 + $0x344] sm:$0xf0] }
 0x174   : > { %583 = vperm.xlu1 %5294, %v580_v6   ;;  %v5860_v6 = vor.u32 %v4918_v4, %v3765_v3  ;;  %7623 = vst [vmem:[#allocation36_spill] sm:$0xff] %v5883_v48  ;;  %v4125_v3 = vld [vmem:[#allocation8 + $0x2e0] sm:$0xf]  ;;  %v5893_v4 = vor.u32 %v4992_v63, %v4061_v60  ;;  %v4988_v60 = vld [vmem:[#allocation8 + $0x244] sm:$0xf0] }
 0x175   : > { %2474 = vmatpush.bf16.msra.mxu3 %v5862_v14  ;;  %7624 = vst [vmem:[#allocation37_spill] sm:$0xff] %v5887_v58  ;;  %v5897_v12 = vor.u32 %v5008_v5, %v4125_v3  ;;  %v4109_v63 = vld [vmem:[#allocation8 + $0x2c0] sm:$0xf]  ;;  %v5004_v3 = vld [vmem:[#allocation8 + $0x2c4] sm:$0xf0]  ;;  %v5921_v5 = vor.u32 %v4988_v60, %v4045_v50 }
 0x176   : > { %2498 = vmatpush.bf16.msrb.mxu1 %v5843_v49  ;;  %7614 = vst [vmem:[#allocation27_spill] sm:$0xff] %v5860_v6  ;;  %2461 = vmatpush.bf16.msra.mxu2 %v5860_v6  ;;  %v5923_v10 = vor.u32 %v5004_v3, %v4109_v63  ;;  %v4173_v11 = vld [vmem:[#allocation8 + $0x340] sm:$0xf]  ;;  %v5002_v46 = vld [vmem:[#allocation8 + $0x2b4] sm:$0xf0] }
 0x177   : > { %2487 = vmatpush.bf16.msrb.mxu0 %v5864_v15  ;;  %7625 = vst [vmem:[#allocation38_spill] sm:$0xff] %v5889_v59  ;;  %v4237_v19 = vld [vmem:[#allocation8 + $0x3c0] sm:$0xf]  ;;  %v4165_v50 = vld [vmem:[#allocation8 + $0x330] sm:$0xf] }
 0x178   : > { %7626 = vst [vmem:[#allocation39_spill] sm:$0xff] %v5893_v4  ;;  %v5018_v60 = vld [vmem:[#allocation8 + $0x334] sm:$0xf0]  ;;  %v5068_v14 = vld [vmem:[#allocation8 + $0x4c4] sm:$0xf0] }
 0x179   : > { %2475 = vmatpush.bf16.msra.mxu3 %v5873_v27  ;;  %7627 = vst [vmem:[#allocation40_spill] sm:$0xff] %v5897_v12  ;;  %v5938_v3 = vor.u32 %v5018_v60, %v4165_v50  ;;  %v5000_v50 = vld [vmem:[#allocation8 + $0x2a4] sm:$0xf0]  ;;  %v4157_v60 = vld [vmem:[#allocation8 + $0x320] sm:$0xf] }
 0x17a   : > { %2499 = vmatpush.bf16.msrb.mxu1 %v5854_v0  ;;  %2462 = vmatpush.bf16.msra.mxu2 %v5871_v26  ;;  %7628 = vst [vmem:[#allocation41_spill] sm:$0xff] %v5899_v16  ;;  %v4373_v26 = vld [vmem:[#allocation8 + $0x4d0] sm:$0xf]  ;;  %v4429_v6 = vld [vmem:[#allocation8 + $0x540] sm:$0xf] }
 0x17b   : > { %7629 = vst [vmem:[#allocation42_spill] sm:$0xff] %v5902_v23  ;;  %v4293_v0 = vld [vmem:[#allocation8 + $0x430] sm:$0xf]  ;;  %v5050_v62 = vld [vmem:[#allocation8 + $0x434] sm:$0xf0] }
 0x17c   : > { %624 = vperm.xlu1 %5294, %v595_v31   ;;  %v4948_v31 = vld [vmem:[#allocation8 + $0x104] sm:$0xf0]  ;;  %7633 = vst [vmem:[#allocation46_spill] sm:$0xff] %v5917_v53  ;;  %v4421_v55 = vld [vmem:[#allocation8 + $0x530] sm:$0xf] }
 0x17d   : > { %2520 = vmatpush.bf16.msrb.mxu3 %v5883_v48  ;;  %7634 = vst [vmem:[#allocation47_spill] sm:$0xff] %v5921_v5  ;;  %v5076_v49 = vld [vmem:[#allocation8 + $0x504] sm:$0xf0]  ;;  %v5138_v43 = vld [vmem:[#allocation8 + $0x6f4] sm:$0xf0] }
 0x17e   : > { %2500 = vmatpush.bf16.msrb.mxu1 %v5867_v20  ;;  %2507 = vmatpush.bf16.msrb.mxu2 %v5880_v41  ;;  %7635 = vst [vmem:[#allocation48_spill] sm:$0xff] %v5923_v10 }
 0x17f   : > { %7640 = vst [vmem:[#allocation53_spill] sm:$0xff] %v5938_v3 }
 0x181   : > { %2521 = vmatpush.bf16.msrb.mxu3 %v5897_v12  ;;  %v5090_v12 = vld [vmem:[#allocation8 + $0x574] sm:$0xf0] }
 0x182   : > { %2508 = vmatpush.bf16.msrb.mxu2 %v5893_v4  ;;  %v618_v4 = vpop.permute.xlu0 %617 }
 0x184   : > { %638 = vperm.xlu1 %5294, %v597_v34   ;;  %v3949_v34 = vld [vmem:[#allocation8 + $0x180] sm:$0xf] }
 0x185   : > { %v5878_v40 = vor.u32 %v4964_v36, %v3949_v34  ;;  %v5006_v34 = vld [vmem:[#allocation8 + $0x2d4] sm:$0xf0]  ;;  %v4181_v36 = vld [vmem:[#allocation8 + $0x350] sm:$0xf] }
 0x186   : > { %v5912_v42 = vor.u32 %v5022_v37, %v4181_v36  ;;  %v4986_v36 = vld [vmem:[#allocation8 + $0x234] sm:$0xf0]  ;;  %v4101_v37 = vld [vmem:[#allocation8 + $0x2b0] sm:$0xf] }
 0x187   : > { %7621 = vst [vmem:[#allocation34_spill] sm:$0xff] %v5878_v40  ;;  %2501 = vmatpush.bf16.msrb.mxu1 %v5878_v40  ;;  %v5936_v63 = vor.u32 %v5002_v46, %v4101_v37  ;;  %v4093_v37 = vld [vmem:[#allocation8 + $0x2a0] sm:$0xf]  ;;  %v5106_v40 = vld [vmem:[#allocation8 + $0x5f4] sm:$0xf0] }
 0x188   : > { %7632 = vst [vmem:[#allocation45_spill] sm:$0xff] %v5912_v42 }
 0x189   : > { %7639 = vst [vmem:[#allocation52_spill] sm:$0xff] %v5936_v63 }
 0x18b   : > { %2546 = vmatpush.bf16.msra.mxu1 %v5889_v59 }
 0x18c   : > { %652 = vperm.xlu1 %5294, %v599_v35   ;;  %v5876_v35 = vor.u32 %v4948_v31, %v3885_v28  ;;  %v4117_v28 = vld [vmem:[#allocation8 + $0x2d0] sm:$0xf]  ;;  %v5908_v31 = vor.u32 %v4990_v25, %v4053_v24  ;;  %v5926_v24 = vor.u32 %v5020_v18, %v4173_v11  ;;  %v5036_v25 = vld [vmem:[#allocation8 + $0x3c4] sm:$0xf0]  ;;  %v5034_v18 = vld [vmem:[#allocation8 + $0x3b4] sm:$0xf0] }
 0x18d   : > { %v5910_v38 = vor.u32 %v5006_v34, %v4117_v28  ;;  %v5928_v28 = vor.u32 %v5036_v25, %v4237_v19  ;;  %v4037_v34 = vld [vmem:[#allocation8 + $0x230] sm:$0xf]  ;;  %v5945_v25 = vpop.permute.xlu2 %610 }
 0x18e   : > { %7620 = vst [vmem:[#allocation33_spill] sm:$0xff] %v5876_v35  ;;  %2488 = vmatpush.bf16.msrb.mxu0 %v5876_v35  ;;  %2509 = vmatpush.bf16.msrb.mxu2 %v5908_v31  ;;  %v5934_v45 = vor.u32 %v4986_v36, %v4037_v34  ;;  %v4229_v11 = vld [vmem:[#allocation8 + $0x3b0] sm:$0xf]  ;;  %v4029_v34 = vld [vmem:[#allocation8 + $0x220] sm:$0xf] }
 0x18f   : > { %2547 = vmatpush.bf16.msra.mxu1 %v5902_v23  ;;  %7630 = vst [vmem:[#allocation43_spill] sm:$0xff] %v5908_v31  ;;  %2522 = vmatpush.bf16.msrb.mxu3 %v5910_v38  ;;  %v5941_v19 = vor.u32 %v5034_v18, %v4229_v11  ;;  %v4984_v36 = vld [vmem:[#allocation8 + $0x224] sm:$0xf0]  ;;  %v4221_v18 = vld [vmem:[#allocation8 + $0x3a0] sm:$0xf] }
 0x190   : > { %7631 = vst [vmem:[#allocation44_spill] sm:$0xff] %v5910_v38  ;;  %v5948_v46 = vor.u32 %v4984_v36, %v4029_v34  ;;  %v4982_v34 = vld [vmem:[#allocation8 + $0x214] sm:$0xf0]  ;;  %v4085_v36 = vld [vmem:[#allocation8 + $0x290] sm:$0xf] }
 0x191   : > { %7636 = vst [vmem:[#allocation49_spill] sm:$0xff] %v5926_v24  ;;  %v5074_v23 = vld [vmem:[#allocation8 + $0x4f4] sm:$0xf0] }
 0x192   : > { %2533 = vmatpush.bf16.msra.mxu0 %v5887_v58  ;;  %7637 = vst [vmem:[#allocation50_spill] sm:$0xff] %v5928_v28  ;;  %2510 = vmatpush.bf16.msrb.mxu2 %v5921_v5 }
 0x193   : > { %2548 = vmatpush.bf16.msra.mxu1 %v5917_v53  ;;  %2523 = vmatpush.bf16.msrb.mxu3 %v5923_v10  ;;  %7638 = vst [vmem:[#allocation51_spill] sm:$0xff] %v5934_v45  ;;  %v4389_v53 = vld [vmem:[#allocation8 + $0x4f0] sm:$0xf] }
 0x194   : > { %7641 = vst [vmem:[#allocation54_spill] sm:$0xff] %v5941_v19 }
 0x195   : > { %7642 = vst [vmem:[#allocation55_spill] sm:$0xff] %v5948_v46 }
 0x196   : > { %2534 = vmatpush.bf16.msra.mxu0 %v5899_v16  ;;  %2511 = vmatpush.bf16.msrb.mxu2 %v5934_v45  ;;  %v4453_v16 = vld [vmem:[#allocation8 + $0x570] sm:$0xf] }
 0x197   : > { %2549 = vmatpush.bf16.msra.mxu1 %v5928_v28  ;;  %2524 = vmatpush.bf16.msrb.mxu3 %v5936_v63  ;;  %v5016_v28 = vld [vmem:[#allocation8 + $0x324] sm:$0xf0] }
 0x198   : > { %v5952_v11 = vor.u32 %v5016_v28, %v4157_v60  ;;  %v5032_v63 = vld [vmem:[#allocation8 + $0x3a4] sm:$0xf0]  ;;  %v4149_v28 = vld [vmem:[#allocation8 + $0x310] sm:$0xf] }
 0x19a   : > { %2535 = vmatpush.bf16.msra.mxu0 %v5912_v42  ;;  %7644 = vst [vmem:[#allocation57_spill] sm:$0xff] %v5952_v11  ;;  %2512 = vmatpush.bf16.msrb.mxu2 %v5948_v46 }
 0x19b   : > { %2550 = vmatpush.bf16.msra.mxu1 %v5941_v19  ;;  %v4021_v19 = vld [vmem:[#allocation8 + $0x210] sm:$0xf] }
 0x19c   : > { %v5960_v45 = vor.u32 %v4982_v34, %v4021_v19  ;;  %v4980_v19 = vld [vmem:[#allocation8 + $0x204] sm:$0xf0]  ;;  %v4077_v34 = vld [vmem:[#allocation8 + $0x280] sm:$0xf] }
 0x19e   : > { %2536 = vmatpush.bf16.msra.mxu0 %v5926_v24  ;;  %v5950_v24 = vor.u32 %v5000_v50, %v4093_v37  ;;  %7646 = vst [vmem:[#allocation59_spill] sm:$0xff] %v5960_v45  ;;  %v4998_v37 = vld [vmem:[#allocation8 + $0x294] sm:$0xf0]  ;;  %2513 = vmatpush.bf16.msrb.mxu2 %v5960_v45 }
 0x19f   : > { %v5014_v50 = vld [vmem:[#allocation8 + $0x314] sm:$0xf0]  ;;  %v5962_v60 = vor.u32 %v4998_v37, %v4085_v36  ;;  %v4996_v36 = vld [vmem:[#allocation8 + $0x284] sm:$0xf0]  ;;  %v4141_v37 = vld [vmem:[#allocation8 + $0x300] sm:$0xf] }
 0x1a0   : > { %7643 = vst [vmem:[#allocation56_spill] sm:$0xff] %v5950_v24  ;;  %2525 = vmatpush.bf16.msrb.mxu3 %v5950_v24  ;;  %v5964_v10 = vor.u32 %v5014_v50, %v4149_v28  ;;  %v5012_v28 = vld [vmem:[#allocation8 + $0x304] sm:$0xf0]  ;;  %v5974_v50 = vpop.permute.xlu2 %631  ;;  %v5976_v46 = vor.u32 %v4996_v36, %v4077_v34 }
 0x1a1   : > { %7647 = vst [vmem:[#allocation60_spill] sm:$0xff] %v5962_v60 }
 0x1a2   : > { %2537 = vmatpush.bf16.msra.mxu0 %v5938_v3  ;;  %v5955_v3 = vor.u32 %v5032_v63, %v4221_v18  ;;  %7648 = vst [vmem:[#allocation61_spill] sm:$0xff] %v5964_v10  ;;  %v4213_v63 = vld [vmem:[#allocation8 + $0x390] sm:$0xf]  ;;  %v5030_v18 = vld [vmem:[#allocation8 + $0x394] sm:$0xf0] }
 0x1a3   : > { %v5967_v24 = vor.u32 %v5030_v18, %v4213_v63  ;;  %7651 = vst [vmem:[#allocation64_spill] sm:$0xff] %v5976_v46  ;;  %v5978_v63 = vor.u32 %v5012_v28, %v4141_v37  ;;  %v4205_v18 = vld [vmem:[#allocation8 + $0x380] sm:$0xf] }
 0x1a4   : > { %7645 = vst [vmem:[#allocation58_spill] sm:$0xff] %v5955_v3  ;;  %2551 = vmatpush.bf16.msra.mxu1 %v5955_v3  ;;  %2526 = vmatpush.bf16.msrb.mxu3 %v5962_v60  ;;  %v4013_v3 = vld [vmem:[#allocation8 + $0x200] sm:$0xf]  ;;  %v5028_v60 = vld [vmem:[#allocation8 + $0x384] sm:$0xf0] }
 0x1a5   : > { %7649 = vst [vmem:[#allocation62_spill] sm:$0xff] %v5967_v24 }
 0x1a6   : > { %2538 = vmatpush.bf16.msra.mxu0 %v5952_v11  ;;  %v5972_v11 = vor.u32 %v4980_v19, %v4013_v3  ;;  %7652 = vst [vmem:[#allocation65_spill] sm:$0xff] %v5978_v63 }
 0x1a8   : > { %2552 = vmatpush.bf16.msra.mxu1 %v5967_v24  ;;  %7650 = vst [vmem:[#allocation63_spill] sm:$0xff] %v5972_v11  ;;  %2514 = vmatpush.bf16.msrb.mxu2 %v5972_v11  ;;  %v5986_v19 = vpop.permute.xlu2 %645 }
 0x1a9   : > { %2527 = vmatpush.bf16.msrb.mxu3 %v5976_v46 }
 0x1aa   : > { %2539 = vmatpush.bf16.msra.mxu0 %v5964_v10  ;;  %v5981_v10 = vor.u32 %v5028_v60, %v4205_v18 }
 0x1ac   : > { %7653 = vst [vmem:[#allocation66_spill] sm:$0xff] %v5981_v10  ;;  %2553 = vmatpush.bf16.msra.mxu1 %v5981_v10 }
 0x1ae   : > { %2540 = vmatpush.bf16.msra.mxu0 %v5978_v63 }
 0x1b0   : > { %v660_v60 = vpop.permute.xlu2 %659 }
 0x1de   : > { %v575_v3 = vpop.permute.xlu1 %574 }
 0x1df   : > { %v577_v34 = vmul.f32 %v575_v3, %v5741_v8  ;;  %v578_v36 = vmul.f32 %v575_v3, %v5743_v9 }
 0x1e6   : > { %v584_v37 = vpop.permute.xlu1 %583 }
 0x1e7   : > { %v586_v28 = vadd.f32 %v584_v37, %v577_v34  ;;  %v587_v24 = vadd.f32 %v584_v37, %v578_v36 }
 0x1e9   : > { %v588_v45 = vmax.f32 %v586_v28, 0.0  ;;  %v589_v11 = vmax.f32 %v587_v24, 0.0 }
 0x1eb   : > { %v5990_v18 = vmin.f32 %v588_v45, 6.0  ;;  %v5992_v46 = vmin.f32 %v589_v11, 6.0 }
 0x1ed   : > { %v662_v63 = vmul.f32 %v660_v60, %v5990_v18  ;;  %v663_v10 = vmul.f32 %v660_v60, %v5992_v46  ;;  %v606_v8 = vmul.f32 %v5914_v51, %v5990_v18  ;;  %v607_v9 = vmul.f32 %v5914_v51, %v5992_v46  ;;  %v4325_v60 = vld [vmem:[#allocation8 + $0x470] sm:$0xf]  ;;  %v5058_v51 = vld [vmem:[#allocation8 + $0x474] sm:$0xf0] }
 0x1ee   : > { %v625_v5 = vpop.permute.xlu1 %624  ;;  %v613_v3 = vmul.f32 %v5945_v25, %v5990_v18  ;;  %v614_v24 = vmul.f32 %v5945_v25, %v5992_v46  ;;  %v6029_v35 = vmul.f32 %v618_v4, %v5990_v18  ;;  %v6032_v27 = vmul.f32 %v618_v4, %v5992_v46  ;;  %v5088_v4 = vld [vmem:[#allocation8 + $0x564] sm:$0xf0] }
 0x1ef   : > { %v6004_v45 = vpack.c.bf16 %v663_v10, %v662_v63  ;;  %v6006_v11 = vpack.c.bf16 %v607_v9, %v606_v8 }
 0x1f0   : > { %v6008_v34 = vpack.c.bf16 %v614_v24, %v613_v3 }
 0x1f1   : > { %7654 = vst [vmem:[#allocation67_spill] sm:$0xff] %v6004_v45  ;;  %v689_v36 = vunpack.c.l.bf16 %v6004_v45  ;;  %v690_v37 = vunpack.c.h.bf16 %v6004_v45  ;;  %v673_v28 = vunpack.c.l.bf16 %v6006_v11  ;;  %v674_v25 = vunpack.c.h.bf16 %v6006_v11 }
 0x1f2   : > { %7655 = vst [vmem:[#allocation68_spill] sm:$0xff] %v6006_v11  ;;  %v675_v31 = vunpack.c.l.bf16 %v6008_v34  ;;  %v6019_v45 = vor.u32 %v5058_v51, %v4325_v60  ;;  %v5072_v60 = vld [vmem:[#allocation8 + $0x4e4] sm:$0xf0]  ;;  %v4445_v51 = vld [vmem:[#allocation8 + $0x560] sm:$0xf] }
 0x1f3   : > { %7656 = vst [vmem:[#allocation69_spill] sm:$0xff] %v6008_v34  ;;  %v6013_v42 = vsub.f32 %v662_v63, %v689_v36  ;;  %v6015_v38 = vsub.f32 %v663_v10, %v690_v37  ;;  %v691_v59 = vsub.f32 %v606_v8, %v673_v28  ;;  %v692_v58 = vsub.f32 %v607_v9, %v674_v25  ;;  %v4517_v37 = vld [vmem:[#allocation8 + $0x5f0] sm:$0xf]  ;;  %v4317_v28 = vld [vmem:[#allocation8 + $0x460] sm:$0xf] }
 0x1f4   : > { %7657 = vst [vmem:[#allocation70_spill] sm:$0xff] %v6019_v45  ;;  %v693_v41 = vsub.f32 %v613_v3, %v675_v31  ;;  %v676_v63 = vunpack.c.h.bf16 %v6008_v34  ;;  %v6024_v36 = vor.u32 %v5074_v23, %v4389_v53  ;;  %v6026_v10 = vor.u32 %v5090_v12, %v4453_v16  ;;  %v5056_v31 = vld [vmem:[#allocation8 + $0x464] sm:$0xf0]  ;;  %v4381_v3 = vld [vmem:[#allocation8 + $0x4e0] sm:$0xf] }
 0x1f5   : > { %v6034_v8 = vpack.c.bf16 %v691_v59, %v691_v59  ;;  %v6036_v9 = vpack.c.bf16 %v692_v58, %v692_v58  ;;  %v6039_v23 = vmul.f32 %v625_v5, %v5990_v18  ;;  %v6042_v12 = vmul.f32 %v625_v5, %v5992_v46  ;;  %v5104_v25 = vld [vmem:[#allocation8 + $0x5e4] sm:$0xf0]  ;;  %v5086_v34 = vld [vmem:[#allocation8 + $0x554] sm:$0xf0] }
 0x1f6   : > { %v6021_v48 = vpop.permute.xlu1 %638  ;;  %7658 = vst [vmem:[#allocation71_spill] sm:$0xff] %v6024_v36  ;;  %v6044_v16 = vpack.c.bf16 %v693_v41, %v693_v41  ;;  %v694_v53 = vsub.f32 %v614_v24, %v676_v63  ;;  %v6048_v58 = vor.u32 %v5106_v40, %v4517_v37  ;;  %v6054_v5 = vor.u32 %v5056_v31, %v4317_v28  ;;  %v4509_v41 = vld [vmem:[#allocation8 + $0x5e0] sm:$0xf]  ;;  %v4309_v37 = vld [vmem:[#allocation8 + $0x450] sm:$0xf] }
 0x1f7   : > { %7659 = vst [vmem:[#allocation72_spill] sm:$0xff] %v6026_v10  ;;  %2463 = vmatmul.bf16.vlgmr.msra.gmra.mxu2 %v6034_v8  ;;  %2476 = vmatmul.bf16.vlgmr.msra.gmra.mxu3 %v6036_v9  ;;  %v6058_v24 = vpack.c.bf16 %v6032_v27, %v6029_v35  ;;  %v6062_v40 = vor.u32 %v5072_v60, %v4381_v3  ;;  %v5070_v31 = vld [vmem:[#allocation8 + $0x4d4] sm:$0xf0] }
 0x1f8   : > { %7660 = vst [vmem:[#allocation73_spill] sm:$0xff] %v6048_v58  ;;  %2489 = vmatmul.bf16.vlgmr.msrb.gmra.mxu0 %v6044_v16  ;;  %v6051_v59 = vpack.c.bf16 %v694_v53, %v694_v53  ;;  %2559 = vmatpush.bf16.msra.mxu2 %v6019_v45  ;;  %v6064_v63 = vor.u32 %v5088_v4, %v4445_v51  ;;  %v5054_v53 = vld [vmem:[#allocation8 + $0x454] sm:$0xf0]  ;;  %v4437_v45 = vld [vmem:[#allocation8 + $0x550] sm:$0xf] }
 0x1f9   : > { %7661 = vst [vmem:[#allocation74_spill] sm:$0xff] %v6054_v5  ;;  %2572 = vmatpush.bf16.msra.mxu3 %v6024_v36  ;;  %2585 = vmatpush.bf16.msrb.mxu0 %v6026_v10  ;;  %v6068_v28 = vpack.c.bf16 %v6042_v12, %v6039_v23  ;;  %v6072_v36 = vor.u32 %v5104_v25, %v4509_v41  ;;  %v4501_v51 = vld [vmem:[#allocation8 + $0x5d0] sm:$0xf]  ;;  %v5102_v4 = vld [vmem:[#allocation8 + $0x5d4] sm:$0xf0]  ;;  %v677_v10 = vunpack.c.l.bf16 %v6058_v24 }
 0x1fa   : > { %7662 = vst [vmem:[#allocation75_spill] sm:$0xff] %v6058_v24  ;;  %2502 = vmatmul.bf16.vlgmr.msrb.gmra.mxu1 %v6051_v59  ;;  %v6075_v60 = vor.u32 %v5054_v53, %v4309_v37  ;;  %v6081_v20 = vor.u32 %v5070_v31, %v4373_v26  ;;  %v4301_v41 = vld [vmem:[#allocation8 + $0x440] sm:$0xf]  ;;  %v5052_v25 = vld [vmem:[#allocation8 + $0x444] sm:$0xf0]  ;;  %v678_v37 = vunpack.c.h.bf16 %v6058_v24 }
 0x1fb   : > { %7663 = vst [vmem:[#allocation76_spill] sm:$0xff] %v6062_v40  ;;  %2598 = vmatpush.bf16.msrb.mxu1 %v6048_v58  ;;  %v6083_v58 = vor.u32 %v5086_v34, %v4437_v45  ;;  %v679_v53 = vunpack.c.l.bf16 %v6068_v28  ;;  %v4493_v26 = vld [vmem:[#allocation8 + $0x5c0] sm:$0xf]  ;;  %v680_v45 = vunpack.c.h.bf16 %v6068_v28  ;;  %v6095_v31 = vor.u32 %v5052_v25, %v4301_v41  ;;  %v5100_v24 = vld [vmem:[#allocation8 + $0x5c4] sm:$0xf0] }
 0x1fc   : > { %7664 = vst [vmem:[#allocation77_spill] sm:$0xff] %v6064_v63  ;;  %2560 = vmatpush.bf16.msra.mxu2 %v6054_v5  ;;  %v4365_v5 = vld [vmem:[#allocation8 + $0x4c0] sm:$0xf] }
 0x1fd   : > { %7665 = vst [vmem:[#allocation78_spill] sm:$0xff] %v6068_v28  ;;  %2573 = vmatpush.bf16.msra.mxu3 %v6062_v40  ;;  %2586 = vmatpush.bf16.msrb.mxu0 %v6064_v63  ;;  %v5084_v40 = vld [vmem:[#allocation8 + $0x544] sm:$0xf0]  ;;  %v6089_v63 = vor.u32 %v5102_v4, %v4501_v51  ;;  %v6100_v51 = vor.u32 %v5068_v14, %v4365_v5  ;;  %v5066_v28 = vld [vmem:[#allocation8 + $0x4b4] sm:$0xf0] }
 0x1fe   : > { %7666 = vst [vmem:[#allocation79_spill] sm:$0xff] %v6072_v36  ;;  %v653_v3 = vpop.permute.xlu1 %652  ;;  %v6102_v4 = vor.u32 %v5084_v40, %v4429_v6  ;;  %v697_v41 = vsub.f32 %v6039_v23, %v679_v53  ;;  %v6109_v14 = vor.u32 %v5100_v24, %v4493_v26  ;;  %v6111_v6 = vor.u32 %v5050_v62, %v4293_v0  ;;  %v4285_v0 = vld [vmem:[#allocation8 + $0x420] sm:$0xf]  ;;  %v5064_v53 = vld [vmem:[#allocation8 + $0x4a4] sm:$0xf0] }
 0x1ff   : > { %7667 = vst [vmem:[#allocation80_spill] sm:$0xff] %v6075_v60  ;;  %v655_v11 = vmul.f32 %v653_v3, %v5990_v18  ;;  %v656_v15 = vmul.f32 %v653_v3, %v5992_v46  ;;  %2599 = vmatpush.bf16.msrb.mxu1 %v6072_v36  ;;  %v695_v3 = vsub.f32 %v6029_v35, %v677_v10  ;;  %v4357_v36 = vld [vmem:[#allocation8 + $0x4b0] sm:$0xf]  ;;  %v5082_v35 = vld [vmem:[#allocation8 + $0x534] sm:$0xf0] }
 0x200   : > { %7668 = vst [vmem:[#allocation81_spill] sm:$0xff] %v6081_v20  ;;  %2561 = vmatpush.bf16.msra.mxu2 %v6075_v60  ;;  %v696_v60 = vsub.f32 %v6032_v27, %v678_v37  ;;  %v4485_v10 = vld [vmem:[#allocation8 + $0x5b0] sm:$0xf]  ;;  %v698_v5 = vsub.f32 %v6042_v12, %v680_v45  ;;  %v6119_v23 = vor.u32 %v5066_v28, %v4357_v36  ;;  %v5048_v36 = vld [vmem:[#allocation8 + $0x424] sm:$0xf0] }
 0x201   : > { %7669 = vst [vmem:[#allocation82_spill] sm:$0xff] %v6083_v58  ;;  %v6092_v34 = vpack.c.bf16 %v656_v15, %v655_v11  ;;  %2574 = vmatpush.bf16.msra.mxu3 %v6081_v20  ;;  %2587 = vmatpush.bf16.msrb.mxu0 %v6083_v58  ;;  %v5098_v20 = vld [vmem:[#allocation8 + $0x5b4] sm:$0xf0]  ;;  %v6123_v37 = vpack.c.bf16 %v695_v3, %v695_v3  ;;  %v4349_v28 = vld [vmem:[#allocation8 + $0x4a0] sm:$0xf] }
 0x202   : > { %7670 = vst [vmem:[#allocation83_spill] sm:$0xff] %v6089_v63  ;;  %v6125_v24 = vor.u32 %v5082_v35, %v4421_v55  ;;  %v6127_v62 = vor.u32 %v5098_v20, %v4485_v10  ;;  %v6129_v12 = vpack.c.bf16 %v697_v41, %v697_v41  ;;  %v4413_v55 = vld [vmem:[#allocation8 + $0x520] sm:$0xf]  ;;  %v5080_v20 = vld [vmem:[#allocation8 + $0x524] sm:$0xf0]  ;;  %v6145_v26 = vmul.f32 %v5974_v50, %v5990_v18 }
 0x203   : > { %7671 = vst [vmem:[#allocation84_spill] sm:$0xff] %v6092_v34  ;;  %v687_v25 = vunpack.c.l.bf16 %v6092_v34  ;;  %v688_v54 = vunpack.c.h.bf16 %v6092_v34  ;;  %2600 = vmatpush.bf16.msrb.mxu1 %v6089_v63  ;;  %v6149_v45 = vmul.f32 %v5974_v50, %v5992_v46  ;;  %v4477_v3 = vld [vmem:[#allocation8 + $0x5a0] sm:$0xf]  ;;  %v5096_v41 = vld [vmem:[#allocation8 + $0x5a4] sm:$0xf0]  ;;  %v6161_v50 = vor.u32 %v5048_v36, %v4285_v0 }
 0x204   : > { %7672 = vst [vmem:[#allocation85_spill] sm:$0xff] %v6095_v31  ;;  %2562 = vmatpush.bf16.msra.mxu2 %v6095_v31  ;;  %v6163_v35 = vor.u32 %v5064_v53, %v4349_v28  ;;  %v5062_v34 = vld [vmem:[#allocation8 + $0x494] sm:$0xf0]  ;;  %v6176_v0 = vor.u32 %v5096_v41, %v4477_v3  ;;  %v4405_v36 = vld [vmem:[#allocation8 + $0x510] sm:$0xf] }
 0x205   : > { %7673 = vst [vmem:[#allocation86_spill] sm:$0xff] %v6100_v51  ;;  %v6114_v40 = vsub.f32 %v655_v11, %v687_v25  ;;  %v6116_v27 = vsub.f32 %v656_v15, %v688_v54  ;;  %2575 = vmatpush.bf16.msra.mxu3 %v6100_v51  ;;  %2588 = vmatpush.bf16.msrb.mxu0 %v6102_v4  ;;  %v5078_v28 = vld [vmem:[#allocation8 + $0x514] sm:$0xf0]  ;;  %v5044_v41 = vld [vmem:[#allocation8 + $0x404] sm:$0xf0] }
 0x206   : > { %7674 = vst [vmem:[#allocation87_spill] sm:$0xff] %v6102_v4  ;;  %v6133_v54 = vmul.f32 %v6021_v48, %v5990_v18  ;;  %v6137_v15 = vmul.f32 %v6021_v48, %v5992_v46  ;;  %v6139_v11 = vpack.c.bf16 %v696_v60, %v696_v60  ;;  %v648_v48 = vmul.f32 %v5986_v19, %v5990_v18  ;;  %v4277_v18 = vld [vmem:[#allocation8 + $0x410] sm:$0xf]  ;;  %v4333_v4 = vld [vmem:[#allocation8 + $0x480] sm:$0xf] }
 0x207   : > { %7675 = vst [vmem:[#allocation88_spill] sm:$0xff] %v6109_v14  ;;  %2601 = vmatpush.bf16.msrb.mxu1 %v6109_v14  ;;  %2515 = vmatmul.bf16.vlgmr.msrb.gmra.mxu2 %v6123_v37  ;;  %v6153_v60 = vpack.c.bf16 %v698_v5, %v698_v5  ;;  %v649_v25 = vmul.f32 %v5986_v19, %v5992_v46  ;;  %v5046_v46 = vld [vmem:[#allocation8 + $0x414] sm:$0xf0]  ;;  %v4341_v19 = vld [vmem:[#allocation8 + $0x490] sm:$0xf] }
 0x208   : > { %7676 = vst [vmem:[#allocation89_spill] sm:$0xff] %v6111_v6  ;;  %2528 = vmatmul.bf16.vlgmr.msrb.gmra.mxu3 %v6139_v11  ;;  %2541 = vmatmul.bf16.vlgmr.msra.gmra.mxu0 %v6129_v12  ;;  %v6167_v10 = vpack.c.bf16 %v6137_v15, %v6133_v54  ;;  %v6171_v5 = vor.u32 %v5080_v20, %v4413_v55  ;;  %v5094_v14 = vld [vmem:[#allocation8 + $0x594] sm:$0xf0]  ;;  %v5060_v51 = vld [vmem:[#allocation8 + $0x484] sm:$0xf0] }
 0x209   : > { %7677 = vst [vmem:[#allocation90_spill] sm:$0xff] %v6119_v23  ;;  %2563 = vmatpush.bf16.msra.mxu2 %v6111_v6  ;;  %2576 = vmatpush.bf16.msra.mxu3 %v6119_v23  ;;  %v6173_v6 = vpack.c.bf16 %v649_v25, %v648_v48  ;;  %v6180_v53 = vpack.c.bf16 %v6149_v45, %v6145_v26  ;;  %v4469_v23 = vld [vmem:[#allocation8 + $0x590] sm:$0xf]  ;;  %v4397_v58 = vld [vmem:[#allocation8 + $0x500] sm:$0xf] }
 0x20a   : > { %7678 = vst [vmem:[#allocation91_spill] sm:$0xff] %v6125_v24  ;;  %2554 = vmatmul.bf16.vlgmr.msra.gmra.mxu1 %v6153_v60  ;;  %2589 = vmatpush.bf16.msrb.mxu0 %v6125_v24  ;;  %v4269_v24 = vld [vmem:[#allocation8 + $0x400] sm:$0xf]  ;;  %v6188_v3 = vor.u32 %v5062_v34, %v4341_v19  ;;  %v683_v31 = vunpack.c.l.bf16 %v6167_v10  ;;  %v6192_v63 = vor.u32 %v5078_v28, %v4405_v36  ;;  %v5122_v19 = vld [vmem:[#allocation8 + $0x674] sm:$0xf0]  ;;  %v684_v36 = vunpack.c.h.bf16 %v6167_v10 }
 0x20b   : > { %7679 = vst [vmem:[#allocation92_spill] sm:$0xff] %v6127_v62  ;;  %2602 = vmatpush.bf16.msrb.mxu1 %v6127_v62  ;;  %v685_v55 = vunpack.c.l.bf16 %v6173_v6  ;;  %v686_v20 = vunpack.c.h.bf16 %v6173_v6  ;;  %v6186_v62 = vor.u32 %v5046_v46, %v4277_v18  ;;  %v6199_v34 = vor.u32 %v5094_v14, %v4469_v23  ;;  %v5092_v18 = vld [vmem:[#allocation8 + $0x584] sm:$0xf0]  ;;  %v4581_v46 = vld [vmem:[#allocation8 + $0x670] sm:$0xf] }
 0x20c   : > { %7680 = vst [vmem:[#allocation93_spill] sm:$0xff] %v6161_v50  ;;  %v4645_v28 = vld [vmem:[#allocation8 + $0x6f0] sm:$0xf]  ;;  %v6208_v14 = vor.u32 %v5060_v51, %v4333_v4  ;;  %v5154_v23 = vld [vmem:[#allocation8 + $0x774] sm:$0xf0] }
 0x20d   : > { %7681 = vst [vmem:[#allocation94_spill] sm:$0xff] %v6163_v35  ;;  %2564 = vmatpush.bf16.msra.mxu2 %v6161_v50  ;;  %2577 = vmatpush.bf16.msra.mxu3 %v6163_v35  ;;  %v6194_v44 = vsub.f32 %v648_v48, %v685_v55  ;;  %v6196_v50 = vsub.f32 %v649_v25, %v686_v20  ;;  %v681_v35 = vunpack.c.l.bf16 %v6180_v53  ;;  %v4773_v25 = vld [vmem:[#allocation8 + $0x7f0] sm:$0xf]  ;;  %v5170_v55 = vld [vmem:[#allocation8 + $0x7f4] sm:$0xf0] }
 0x20e   : > { %7682 = vst [vmem:[#allocation95_spill] sm:$0xff] %v6167_v10  ;;  %2590 = vmatpush.bf16.msrb.mxu0 %v6171_v5  ;;  %v6206_v48 = vor.u32 %v5044_v41, %v4269_v24  ;;  %v701_v20 = vsub.f32 %v6133_v54, %v683_v31  ;;  %v6214_v10 = vor.u32 %v5122_v19, %v4581_v46  ;;  %v4573_v24 = vld [vmem:[#allocation8 + $0x660] sm:$0xf]  ;;  %v5120_v41 = vld [vmem:[#allocation8 + $0x664] sm:$0xf0] }
 0x20f   : > { %7683 = vst [vmem:[#allocation96_spill] sm:$0xff] %v6171_v5  ;;  %2603 = vmatpush.bf16.msrb.mxu1 %v6176_v0  ;;  %v682_v5 = vunpack.c.h.bf16 %v6180_v53  ;;  %v699_v51 = vsub.f32 %v6145_v26, %v681_v35  ;;  %v702_v31 = vsub.f32 %v6137_v15, %v684_v36  ;;  %v6224_v54 = vor.u32 %v5154_v23, %v4709_v39  ;;  %v5136_v46 = vld [vmem:[#allocation8 + $0x6e4] sm:$0xf0]  ;;  %v4701_v19 = vld [vmem:[#allocation8 + $0x760] sm:$0xf] }
 0x210   : > { %7684 = vst [vmem:[#allocation97_spill] sm:$0xff] %v6173_v6  ;;  %v4461_v6 = vld [vmem:[#allocation8 + $0x580] sm:$0xf]  ;;  %v5168_v26 = vld [vmem:[#allocation8 + $0x7e4] sm:$0xf0]  ;;  %v6230_v35 = vpack.c.bf16 %v701_v20, %v701_v20  ;;  %v6234_v39 = vor.u32 %v5120_v41, %v4573_v24 }
 0x211   : > { %7685 = vst [vmem:[#allocation98_spill] sm:$0xff] %v6180_v53  ;;  %2565 = vmatpush.bf16.msra.mxu2 %v6186_v62  ;;  %2578 = vmatpush.bf16.msra.mxu3 %v6188_v3  ;;  %v6212_v53 = vor.u32 %v5076_v49, %v4397_v58  ;;  %v700_v4 = vsub.f32 %v6149_v45, %v682_v5  ;;  %v4637_v58 = vld [vmem:[#allocation8 + $0x6e0] sm:$0xf]  ;;  %v5118_v36 = vld [vmem:[#allocation8 + $0x654] sm:$0xf0] }
 0x212   : > { %7686 = vst [vmem:[#allocation99_spill] sm:$0xff] %v6186_v62  ;;  %2591 = vmatpush.bf16.msrb.mxu0 %v6192_v63  ;;  %v6217_v62 = vor.u32 %v5092_v18, %v4461_v6  ;;  %v6226_v49 = vor.u32 %v5170_v55, %v4773_v25  ;;  %v4765_v6 = vld [vmem:[#allocation8 + $0x7e0] sm:$0xf]  ;;  %v6238_v15 = vpack.c.bf16 %v699_v51, %v699_v51  ;;  %v4565_v18 = vld [vmem:[#allocation8 + $0x650] sm:$0xf] }
 0x213   : > { %7687 = vst [vmem:[#allocation100_spill] sm:$0xff] %v6188_v3  ;;  %2604 = vmatpush.bf16.msrb.mxu1 %v6199_v34  ;;  %v6219_v3 = vor.u32 %v5138_v43, %v4645_v28  ;;  %v5152_v43 = vld [vmem:[#allocation8 + $0x764] sm:$0xf0]  ;;  %v6240_v45 = vpack.c.bf16 %v700_v4, %v700_v4  ;;  %v6242_v5 = vor.u32 %v5136_v46, %v4637_v58  ;;  %v4629_v55 = vld [vmem:[#allocation8 + $0x6d0] sm:$0xf] }
 0x214   : > { %7688 = vst [vmem:[#allocation101_spill] sm:$0xff] %v6206_v48  ;;  %v6244_v28 = vpack.c.bf16 %v702_v31, %v702_v31  ;;  %v6248_v23 = vor.u32 %v5152_v43, %v4701_v19  ;;  %v6250_v25 = vor.u32 %v5168_v26, %v4765_v6  ;;  %v5134_v20 = vld [vmem:[#allocation8 + $0x6d4] sm:$0xf0]  ;;  %v4693_v51 = vld [vmem:[#allocation8 + $0x750] sm:$0xf]  ;;  %v6258_v31 = vor.u32 %v5118_v36, %v4565_v18 }
 0x215   : > { %7689 = vst [vmem:[#allocation102_spill] sm:$0xff] %v6208_v14  ;;  %2566 = vmatpush.bf16.msra.mxu2 %v6206_v48  ;;  %2579 = vmatpush.bf16.msra.mxu3 %v6208_v14  ;;  %v5150_v4 = vld [vmem:[#allocation8 + $0x754] sm:$0xf0]  ;;  %v4757_v24 = vld [vmem:[#allocation8 + $0x7d0] sm:$0xf]  ;;  %v6260_v58 = vor.u32 %v5134_v20, %v4629_v55 }
 0x216   : > { %7690 = vst [vmem:[#allocation103_spill] sm:$0xff] %v6212_v53  ;;  %2592 = vmatpush.bf16.msrb.mxu0 %v6212_v53  ;;  %v5166_v41 = vld [vmem:[#allocation8 + $0x7d4] sm:$0xf0]  ;;  %v4557_v46 = vld [vmem:[#allocation8 + $0x640] sm:$0xf]  ;;  %v6264_v43 = vor.u32 %v5150_v4, %v4693_v51 }
 0x217   : > { %7691 = vst [vmem:[#allocation104_spill] sm:$0xff] %v6214_v10  ;;  %2605 = vmatpush.bf16.msrb.mxu1 %v6217_v62  ;;  %v5116_v19 = vld [vmem:[#allocation8 + $0x644] sm:$0xf0]  ;;  %v6266_v6 = vor.u32 %v5166_v41, %v4757_v24  ;;  %v4621_v26 = vld [vmem:[#allocation8 + $0x6c0] sm:$0xf] }
 0x218   : > { %7692 = vst [vmem:[#allocation105_spill] sm:$0xff] %v6217_v62  ;;  %2567 = vmatmul.bf16.vlgmr.msra.gmra.mxu2 %v6238_v15  ;;  %2580 = vmatmul.bf16.vlgmr.msra.gmra.mxu3 %v6240_v45  ;;  %v6270_v18 = vor.u32 %v5116_v19, %v4557_v46  ;;  %v4549_v55 = vld [vmem:[#allocation8 + $0x630] sm:$0xf]  ;;  %v5114_v20 = vld [vmem:[#allocation8 + $0x634] sm:$0xf0] }
 0x219   : > { %7693 = vst [vmem:[#allocation106_spill] sm:$0xff] %v6219_v3  ;;  %2611 = vmatpush.bf16.msrb.mxu2 %v6214_v10  ;;  %2624 = vmatpush.bf16.msrb.mxu3 %v6219_v3  ;;  %v4749_v3 = vld [vmem:[#allocation8 + $0x7c0] sm:$0xf]  ;;  %v4613_v24 = vld [vmem:[#allocation8 + $0x6b0] sm:$0xf] }
 0x21a   : > { %7694 = vst [vmem:[#allocation107_spill] sm:$0xff] %v6224_v54  ;;  %2637 = vmatpush.bf16.msra.mxu0 %v6224_v54  ;;  %2606 = vmatmul.bf16.vlgmr.msrb.gmra.mxu1 %v6244_v28  ;;  %v4685_v54 = vld [vmem:[#allocation8 + $0x740] sm:$0xf]  ;;  %v5130_v41 = vld [vmem:[#allocation8 + $0x6b4] sm:$0xf0] }
 0x21b   : > { %7695 = vst [vmem:[#allocation108_spill] sm:$0xff] %v6226_v49  ;;  %2650 = vmatpush.bf16.msra.mxu1 %v6226_v49  ;;  %2593 = vmatmul.bf16.vlgmr.msrb.gmra.mxu0 %v6230_v35  ;;  %v5132_v49 = vld [vmem:[#allocation8 + $0x6c4] sm:$0xf0]  ;;  %v6284_v46 = vor.u32 %v5130_v41, %v4613_v24  ;;  %v4541_v19 = vld [vmem:[#allocation8 + $0x620] sm:$0xf] }
 0x21c   : > { %7696 = vst [vmem:[#allocation109_spill] sm:$0xff] %v6234_v39  ;;  %v6272_v36 = vor.u32 %v5132_v49, %v4621_v26  ;;  %v6282_v49 = vor.u32 %v5114_v20, %v4549_v55  ;;  %v5112_v26 = vld [vmem:[#allocation8 + $0x624] sm:$0xf0]  ;;  %v4533_v24 = vld [vmem:[#allocation8 + $0x610] sm:$0xf] }
 0x21d   : > { %7697 = vst [vmem:[#allocation110_spill] sm:$0xff] %v6242_v5  ;;  %2612 = vmatpush.bf16.msrb.mxu2 %v6234_v39  ;;  %2625 = vmatpush.bf16.msrb.mxu3 %v6242_v5  ;;  %v5148_v39 = vld [vmem:[#allocation8 + $0x744] sm:$0xf0]  ;;  %v6294_v55 = vor.u32 %v5112_v26, %v4541_v19  ;;  %v5110_v41 = vld [vmem:[#allocation8 + $0x614] sm:$0xf0] }
 0x21e   : > { %7698 = vst [vmem:[#allocation111_spill] sm:$0xff] %v6248_v23  ;;  %2638 = vmatpush.bf16.msra.mxu0 %v6248_v23  ;;  %v5164_v5 = vld [vmem:[#allocation8 + $0x7c4] sm:$0xf0]  ;;  %v6276_v51 = vor.u32 %v5148_v39, %v4685_v54  ;;  %v4741_v23 = vld [vmem:[#allocation8 + $0x7b0] sm:$0xf]  ;;  %v6306_v26 = vor.u32 %v5110_v41, %v4533_v24 }
 0x21f   : > { %7699 = vst [vmem:[#allocation112_spill] sm:$0xff] %v6250_v25  ;;  %2651 = vmatpush.bf16.msra.mxu1 %v6250_v25  ;;  %v6278_v4 = vor.u32 %v5164_v5, %v4749_v3  ;;  %v4677_v25 = vld [vmem:[#allocation8 + $0x730] sm:$0xf]  ;;  %v4605_v39 = vld [vmem:[#allocation8 + $0x6a0] sm:$0xf] }
 0x220   : > { %7700 = vst [vmem:[#allocation113_spill] sm:$0xff] %v6258_v31  ;;  %v5128_v5 = vld [vmem:[#allocation8 + $0x6a4] sm:$0xf0]  ;;  %v4525_v19 = vld [vmem:[#allocation8 + $0x600] sm:$0xf] }
 0x221   : > { %7701 = vst [vmem:[#allocation114_spill] sm:$0xff] %v6260_v58  ;;  %2613 = vmatpush.bf16.msrb.mxu2 %v6258_v31  ;;  %2626 = vmatpush.bf16.msrb.mxu3 %v6260_v58  ;;  %v5146_v31 = vld [vmem:[#allocation8 + $0x734] sm:$0xf0]  ;;  %v6296_v20 = vor.u32 %v5128_v5, %v4605_v39  ;;  %v5108_v5 = vld [vmem:[#allocation8 + $0x604] sm:$0xf0] }
 0x222   : > { %7702 = vst [vmem:[#allocation115_spill] sm:$0xff] %v6264_v43  ;;  %2639 = vmatpush.bf16.msra.mxu0 %v6264_v43  ;;  %v5162_v58 = vld [vmem:[#allocation8 + $0x7b4] sm:$0xf0]  ;;  %v6288_v3 = vor.u32 %v5146_v31, %v4677_v25  ;;  %v4733_v43 = vld [vmem:[#allocation8 + $0x7a0] sm:$0xf] }
 0x223   : > { %7703 = vst [vmem:[#allocation116_spill] sm:$0xff] %v6266_v6  ;;  %2652 = vmatpush.bf16.msra.mxu1 %v6266_v6  ;;  %v6290_v54 = vor.u32 %v5162_v58, %v4741_v23  ;;  %v4669_v6 = vld [vmem:[#allocation8 + $0x720] sm:$0xf]  ;;  %v4597_v31 = vld [vmem:[#allocation8 + $0x690] sm:$0xf] }
 0x224   : > { %7704 = vst [vmem:[#allocation117_spill] sm:$0xff] %v6270_v18  ;;  %v5126_v58 = vld [vmem:[#allocation8 + $0x694] sm:$0xf0]  ;;  %v5156_v10 = vld [vmem:[#allocation8 + $0x784] sm:$0xf0] }
 0x225   : > { %7705 = vst [vmem:[#allocation118_spill] sm:$0xff] %v6272_v36  ;;  %2614 = vmatpush.bf16.msrb.mxu2 %v6270_v18  ;;  %2627 = vmatpush.bf16.msrb.mxu3 %v6272_v36  ;;  %v5144_v18 = vld [vmem:[#allocation8 + $0x724] sm:$0xf0]  ;;  %v6308_v39 = vor.u32 %v5126_v58, %v4597_v31  ;;  %v5186_v24 = vld [vmem:[#allocation8 + $0x874] sm:$0xf0] }
 0x226   : > { %7706 = vst [vmem:[#allocation119_spill] sm:$0xff] %v6276_v51  ;;  %2640 = vmatpush.bf16.msra.mxu0 %v6276_v51  ;;  %v5160_v36 = vld [vmem:[#allocation8 + $0x7a4] sm:$0xf0]  ;;  %v6300_v23 = vor.u32 %v5144_v18, %v4669_v6  ;;  %v4725_v51 = vld [vmem:[#allocation8 + $0x790] sm:$0xf] }
 0x227   : > { %7707 = vst [vmem:[#allocation120_spill] sm:$0xff] %v6278_v4  ;;  %2653 = vmatpush.bf16.msra.mxu1 %v6278_v4  ;;  %v6302_v25 = vor.u32 %v5160_v36, %v4733_v43  ;;  %v4661_v4 = vld [vmem:[#allocation8 + $0x710] sm:$0xf]  ;;  %v4589_v6 = vld [vmem:[#allocation8 + $0x680] sm:$0xf] }
 0x228   : > { %7708 = vst [vmem:[#allocation121_spill] sm:$0xff] %v6282_v49  ;;  %v5124_v18 = vld [vmem:[#allocation8 + $0x684] sm:$0xf0]  ;;  %v4901_v41 = vld [vmem:[#allocation8 + $0x8f0] sm:$0xf] }
 0x229   : > { %7709 = vst [vmem:[#allocation122_spill] sm:$0xff] %v6284_v46  ;;  %2615 = vmatpush.bf16.msrb.mxu2 %v6282_v49  ;;  %2628 = vmatpush.bf16.msrb.mxu3 %v6284_v46  ;;  %v5142_v49 = vld [vmem:[#allocation8 + $0x714] sm:$0xf0]  ;;  %v4929_v58 = vld [vmem:[#allocation8 + $0x74] sm:$0xf] }
 0x22a   : > { %7710 = vst [vmem:[#allocation123_spill] sm:$0xff] %v6288_v3  ;;  %2641 = vmatpush.bf16.msra.mxu0 %v6288_v3  ;;  %v5158_v46 = vld [vmem:[#allocation8 + $0x794] sm:$0xf0]  ;;  %v6312_v43 = vor.u32 %v5142_v49, %v4661_v4  ;;  %v5140_v3 = vld [vmem:[#allocation8 + $0x704] sm:$0xf0] }
 0x22b   : > { %7711 = vst [vmem:[#allocation124_spill] sm:$0xff] %v6290_v54  ;;  %2654 = vmatpush.bf16.msra.mxu1 %v6290_v54  ;;  %v6314_v36 = vor.u32 %v5158_v46, %v4725_v51  ;;  %v4653_v54 = vld [vmem:[#allocation8 + $0x700] sm:$0xf]  ;;  %v5202_v31 = vld [vmem:[#allocation8 + $0x8f4] sm:$0xf0] }
 0x22c   : > { %7712 = vst [vmem:[#allocation125_spill] sm:$0xff] %v6294_v55  ;;  %v3815_v4 = vld [vmem:[#allocation8 + $0x78] sm:$0xf0]  ;;  %v4945_v51 = vld [vmem:[#allocation8 + $0xf4] sm:$0xf]  ;;  %v6324_v46 = vor.u32 %v5140_v3, %v4653_v54 }
 0x22d   : > { %7713 = vst [vmem:[#allocation126_spill] sm:$0xff] %v6296_v20  ;;  %2616 = vmatpush.bf16.msrb.mxu2 %v6294_v55  ;;  %2629 = vmatpush.bf16.msrb.mxu3 %v6296_v20  ;;  %v4717_v55 = vld [vmem:[#allocation8 + $0x780] sm:$0xf]  ;;  %v4837_v20 = vld [vmem:[#allocation8 + $0x870] sm:$0xf] }
 0x22e   : > { %7714 = vst [vmem:[#allocation127_spill] sm:$0xff] %v6300_v23  ;;  %2642 = vmatpush.bf16.msra.mxu0 %v6300_v23  ;;  %v6318_v23 = vor.u32 %v5108_v5, %v4525_v19  ;;  %v3879_v49 = vld [vmem:[#allocation8 + $0xf8] sm:$0xf0]  ;;  %v6326_v62 = vor.u32 %v5156_v10, %v4717_v55  ;;  %v6328_v53 = vor.u32 %v5186_v24, %v4837_v20  ;;  %v5184_v19 = vld [vmem:[#allocation8 + $0x864] sm:$0xf0] }
 0x22f   : > { %7715 = vst [vmem:[#allocation128_spill] sm:$0xff] %v6302_v25  ;;  %2655 = vmatpush.bf16.msra.mxu1 %v6302_v25  ;;  %v6320_v25 = vor.u32 %v5124_v18, %v4589_v6  ;;  %v6332_v5 = vor.u32 %v4929_v58, %v3815_v4  ;;  %v6334_v6 = vor.u32 %v4945_v51, %v3879_v49  ;;  %v4893_v18 = vld [vmem:[#allocation8 + $0x8e0] sm:$0xf]  ;;  %v5200_v14 = vld [vmem:[#allocation8 + $0x8e4] sm:$0xf0] }
 0x230   : > { %7716 = vst [vmem:[#allocation129_spill] sm:$0xff] %v6306_v26  ;;  %v4927_v48 = vld [vmem:[#allocation8 + $0x64] sm:$0xf]  ;;  %v3807_v3 = vld [vmem:[#allocation8 + $0x68] sm:$0xf0]  ;;  %v6340_v55 = vpack.c.bf16 %v6114_v40, %v6114_v40  ;;  %v6346_v20 = vpack.c.bf16 %v6194_v44, %v6194_v44  ;;  %v6352_v24 = vpack.c.bf16 %v6196_v50, %v6196_v50  ;;  %v6356_v40 = vor.u32 %v5200_v14, %v4893_v18 }
 0x231   : > { %7717 = vst [vmem:[#allocation130_spill] sm:$0xff] %v6308_v39  ;;  %2617 = vmatpush.bf16.msrb.mxu2 %v6306_v26  ;;  %2630 = vmatpush.bf16.msrb.mxu3 %v6308_v39  ;;  %v6330_v26 = vor.u32 %v5202_v31, %v4901_v41  ;;  %v4829_v39 = vld [vmem:[#allocation8 + $0x860] sm:$0xf]  ;;  %v4943_v10 = vld [vmem:[#allocation8 + $0xe4] sm:$0xf]  ;;  %v6360_v4 = vpack.c.bf16 %v6116_v27, %v6116_v27 }
 0x232   : > { %7718 = vst [vmem:[#allocation131_spill] sm:$0xff] %v6312_v43  ;;  %2643 = vmatpush.bf16.msra.mxu0 %v6312_v43  ;;  %v3871_v54 = vld [vmem:[#allocation8 + $0xe8] sm:$0xf0]  ;;  %v6354_v41 = vor.u32 %v5184_v19, %v4829_v39  ;;  %v4821_v31 = vld [vmem:[#allocation8 + $0x850] sm:$0xf]  ;;  %v6364_v44 = vor.u32 %v4927_v48, %v3807_v3 }
 0x233   : > { %7719 = vst [vmem:[#allocation132_spill] sm:$0xff] %v6314_v36  ;;  %2656 = vmatpush.bf16.msra.mxu1 %v6314_v36  ;;  %v5182_v58 = vld [vmem:[#allocation8 + $0x854] sm:$0xf0]  ;;  %v6366_v51 = vor.u32 %v4943_v10, %v3871_v54  ;;  %v4885_v50 = vld [vmem:[#allocation8 + $0x8d0] sm:$0xf] }
 0x234   : > { %7720 = vst [vmem:[#allocation133_spill] sm:$0xff] %v6318_v23  ;;  %v5198_v49 = vld [vmem:[#allocation8 + $0x8d4] sm:$0xf0]  ;;  %v4925_v39 = vld [vmem:[#allocation8 + $0x54] sm:$0xf]  ;;  %v6374_v27 = vor.u32 %v5182_v58, %v4821_v31 }
 0x235   : > { %7721 = vst [vmem:[#allocation134_spill] sm:$0xff] %v6320_v25  ;;  %2618 = vmatpush.bf16.msrb.mxu2 %v6318_v23  ;;  %2631 = vmatpush.bf16.msrb.mxu3 %v6320_v25  ;;  %v3799_v14 = vld [vmem:[#allocation8 + $0x58] sm:$0xf0]  ;;  %v4941_v19 = vld [vmem:[#allocation8 + $0xd4] sm:$0xf]  ;;  %v6376_v48 = vor.u32 %v5198_v49, %v4885_v50 }
 0x236   : > { %7722 = vst [vmem:[#allocation135_spill] sm:$0xff] %v6324_v46  ;;  %2644 = vmatpush.bf16.msra.mxu0 %v6324_v46  ;;  %v3863_v18 = vld [vmem:[#allocation8 + $0xd8] sm:$0xf0]  ;;  %v4813_v3 = vld [vmem:[#allocation8 + $0x840] sm:$0xf]  ;;  %v6380_v54 = vor.u32 %v4925_v39, %v3799_v14 }
 0x237   : > { %7723 = vst [vmem:[#allocation136_spill] sm:$0xff] %v6326_v62  ;;  %2657 = vmatpush.bf16.msra.mxu1 %v6326_v62  ;;  %v5180_v10 = vld [vmem:[#allocation8 + $0x844] sm:$0xf0]  ;;  %v4939_v62 = vld [vmem:[#allocation8 + $0xc4] sm:$0xf] }
 0x238   : > { %7724 = vst [vmem:[#allocation137_spill] sm:$0xff] %v6328_v53  ;;  %2619 = vmatmul.bf16.vlgmr.msrb.gmra.mxu2 %v6346_v20  ;;  %2632 = vmatmul.bf16.vlgmr.msrb.gmra.mxu3 %v6352_v24  ;;  %v6386_v31 = vor.u32 %v5180_v10, %v4813_v3  ;;  %v4805_v50 = vld [vmem:[#allocation8 + $0x830] sm:$0xf]  ;;  %v5178_v49 = vld [vmem:[#allocation8 + $0x834] sm:$0xf0] }
 0x239   : > { %7725 = vst [vmem:[#allocation138_spill] sm:$0xff] %v6330_v26  ;;  %2663 = vmatpush.bf16.msra.mxu2 %v6328_v53  ;;  %2676 = vmatpush.bf16.msra.mxu3 %v6330_v26  ;;  %v5196_v26 = vld [vmem:[#allocation8 + $0x8c4] sm:$0xf0]  ;;  %v4923_v53 = vld [vmem:[#allocation8 + $0x44] sm:$0xf] }
 0x23a   : > { %7726 = vst [vmem:[#allocation139_spill] sm:$0xff] %v6332_v5  ;;  %2689 = vmatpush.bf16.msrb.mxu0 %v6332_v5  ;;  %2658 = vmatmul.bf16.vlgmr.msra.gmra.mxu1 %v6360_v4  ;;  %v4877_v5 = vld [vmem:[#allocation8 + $0x8c0] sm:$0xf]  ;;  %v5176_v10 = vld [vmem:[#allocation8 + $0x824] sm:$0xf0] }
 0x23b   : > { %7727 = vst [vmem:[#allocation140_spill] sm:$0xff] %v6334_v6  ;;  %2702 = vmatpush.bf16.msrb.mxu1 %v6334_v6  ;;  %2645 = vmatmul.bf16.vlgmr.msra.gmra.mxu0 %v6340_v55  ;;  %v6382_v6 = vor.u32 %v4941_v19, %v3863_v18  ;;  %v6388_v58 = vor.u32 %v5196_v26, %v4877_v5  ;;  %v4869_v19 = vld [vmem:[#allocation8 + $0x8b0] sm:$0xf]  ;;  %v5194_v18 = vld [vmem:[#allocation8 + $0x8b4] sm:$0xf0] }
 0x23c   : > { %7728 = vst [vmem:[#allocation141_spill] sm:$0xff] %v6354_v41  ;;  %v6398_v26 = vor.u32 %v5178_v49, %v4805_v50  ;;  %v6400_v5 = vor.u32 %v5194_v18, %v4869_v19  ;;  %v4797_v3 = vld [vmem:[#allocation8 + $0x820] sm:$0xf]  ;;  %v4789_v19 = vld [vmem:[#allocation8 + $0x810] sm:$0xf] }
 0x23d   : > { %7729 = vst [vmem:[#allocation142_spill] sm:$0xff] %v6356_v40  ;;  %2664 = vmatpush.bf16.msra.mxu2 %v6354_v41  ;;  %2677 = vmatpush.bf16.msra.mxu3 %v6356_v40  ;;  %v3791_v41 = vld [vmem:[#allocation8 + $0x48] sm:$0xf0]  ;;  %v6410_v50 = vor.u32 %v5176_v10, %v4797_v3  ;;  %v5174_v18 = vld [vmem:[#allocation8 + $0x814] sm:$0xf0] }
 0x23e   : > { %7730 = vst [vmem:[#allocation143_spill] sm:$0xff] %v6364_v44  ;;  %2690 = vmatpush.bf16.msrb.mxu0 %v6364_v44  ;;  %v3855_v40 = vld [vmem:[#allocation8 + $0xc8] sm:$0xf0]  ;;  %v6392_v39 = vor.u32 %v4923_v53, %v3791_v41  ;;  %v4937_v44 = vld [vmem:[#allocation8 + $0xb4] sm:$0xf]  ;;  %v6422_v10 = vor.u32 %v5174_v18, %v4789_v19 }
 0x23f   : > { %7731 = vst [vmem:[#allocation144_spill] sm:$0xff] %v6366_v51  ;;  %2703 = vmatpush.bf16.msrb.mxu1 %v6366_v51  ;;  %v6394_v14 = vor.u32 %v4939_v62, %v3855_v40  ;;  %v4921_v51 = vld [vmem:[#allocation8 + $0x34] sm:$0xf]  ;;  %v4861_v41 = vld [vmem:[#allocation8 + $0x8a0] sm:$0xf] }
 0x240   : > { %7732 = vst [vmem:[#allocation145_spill] sm:$0xff] %v6374_v27  ;;  %v5192_v40 = vld [vmem:[#allocation8 + $0x8a4] sm:$0xf0]  ;;  %v4781_v3 = vld [vmem:[#allocation8 + $0x800] sm:$0xf] }
 0x241   : > { %7733 = vst [vmem:[#allocation146_spill] sm:$0xff] %v6376_v48  ;;  %2665 = vmatpush.bf16.msra.mxu2 %v6374_v27  ;;  %2678 = vmatpush.bf16.msra.mxu3 %v6376_v48  ;;  %v3783_v27 = vld [vmem:[#allocation8 + $0x38] sm:$0xf0]  ;;  %v6412_v49 = vor.u32 %v5192_v40, %v4861_v41  ;;  %v5172_v40 = vld [vmem:[#allocation8 + $0x804] sm:$0xf0] }
 0x242   : > { %7734 = vst [vmem:[#allocation147_spill] sm:$0xff] %v6380_v54  ;;  %2691 = vmatpush.bf16.msrb.mxu0 %v6380_v54  ;;  %v3847_v48 = vld [vmem:[#allocation8 + $0xb8] sm:$0xf0]  ;;  %v6404_v62 = vor.u32 %v4921_v51, %v3783_v27  ;;  %v4935_v54 = vld [vmem:[#allocation8 + $0xa4] sm:$0xf] }
 0x243   : > { %7735 = vst [vmem:[#allocation148_spill] sm:$0xff] %v6382_v6  ;;  %2704 = vmatpush.bf16.msrb.mxu1 %v6382_v6  ;;  %v6406_v53 = vor.u32 %v4937_v44, %v3847_v48  ;;  %v4919_v6 = vld [vmem:[#allocation8 + $0x24] sm:$0xf]  ;;  %v4853_v27 = vld [vmem:[#allocation8 + $0x890] sm:$0xf] }
 0x244   : > { %7736 = vst [vmem:[#allocation149_spill] sm:$0xff] %v6386_v31  ;;  %v5190_v48 = vld [vmem:[#allocation8 + $0x894] sm:$0xf0]  ;;  %v3823_v46 = vld [vmem:[#allocation8 + $0x88] sm:$0xf0] }
 0x245   : > { %7737 = vst [vmem:[#allocation150_spill] sm:$0xff] %v6388_v58  ;;  %2666 = vmatpush.bf16.msra.mxu2 %v6386_v31  ;;  %2679 = vmatpush.bf16.msra.mxu3 %v6388_v58  ;;  %v3775_v31 = vld [vmem:[#allocation8 + $0x28] sm:$0xf0]  ;;  %v6424_v41 = vor.u32 %v5190_v48, %v4853_v27  ;;  %v3943_v19 = vld [vmem:[#allocation8 + $0x178] sm:$0xf0] }
 0x246   : > { %7738 = vst [vmem:[#allocation151_spill] sm:$0xff] %v6392_v39  ;;  %2692 = vmatpush.bf16.msrb.mxu0 %v6392_v39  ;;  %v3839_v58 = vld [vmem:[#allocation8 + $0xa8] sm:$0xf0]  ;;  %v6416_v44 = vor.u32 %v4919_v6, %v3775_v31  ;;  %v4933_v39 = vld [vmem:[#allocation8 + $0x94] sm:$0xf] }
 0x247   : > { %7739 = vst [vmem:[#allocation152_spill] sm:$0xff] %v6394_v14  ;;  %2705 = vmatpush.bf16.msrb.mxu1 %v6394_v14  ;;  %v6418_v51 = vor.u32 %v4935_v54, %v3839_v58  ;;  %v4917_v14 = vld [vmem:[#allocation8 + $0x14] sm:$0xf]  ;;  %v4845_v6 = vld [vmem:[#allocation8 + $0x880] sm:$0xf] }
 0x248   : > { %7740 = vst [vmem:[#allocation153_spill] sm:$0xff] %v6398_v26  ;;  %v5188_v31 = vld [vmem:[#allocation8 + $0x884] sm:$0xf0]  ;;  %v4977_v18 = vld [vmem:[#allocation8 + $0x1f4] sm:$0xf] }
 0x249   : > { %7741 = vst [vmem:[#allocation154_spill] sm:$0xff] %v6400_v5  ;;  %2667 = vmatpush.bf16.msra.mxu2 %v6398_v26  ;;  %2680 = vmatpush.bf16.msra.mxu3 %v6400_v5  ;;  %v3767_v26 = vld [vmem:[#allocation8 + $0x18] sm:$0xf0]  ;;  %v4993_v48 = vld [vmem:[#allocation8 + $0x274] sm:$0xf] }
 0x24a   : > { %7742 = vst [vmem:[#allocation155_spill] sm:$0xff] %v6404_v62  ;;  %2693 = vmatpush.bf16.msrb.mxu0 %v6404_v62  ;;  %v3831_v5 = vld [vmem:[#allocation8 + $0x98] sm:$0xf0]  ;;  %v6428_v54 = vor.u32 %v4917_v14, %v3767_v26  ;;  %v3759_v62 = vld [vmem:[#allocation8 + $0x8] sm:$0xf0] }
 0x24b   : > { %7743 = vst [vmem:[#allocation156_spill] sm:$0xff] %v6406_v53  ;;  %2706 = vmatpush.bf16.msrb.mxu1 %v6406_v53  ;;  %v6430_v58 = vor.u32 %v4933_v39, %v3831_v5  ;;  %v4915_v53 = vld [vmem:[#allocation8 + $0x4] sm:$0xf]  ;;  %v4007_v27 = vld [vmem:[#allocation8 + $0x1f8] sm:$0xf0] }
 0x24c   : > { %7744 = vst [vmem:[#allocation157_spill] sm:$0xff] %v6410_v50  ;;  %v4071_v14 = vld [vmem:[#allocation8 + $0x278] sm:$0xf0]  ;;  %v5009_v39 = vld [vmem:[#allocation8 + $0x2f4] sm:$0xf]  ;;  %v6440_v5 = vor.u32 %v4915_v53, %v3759_v62 }
 0x24d   : > { %7745 = vst [vmem:[#allocation158_spill] sm:$0xff] %v6412_v49  ;;  %2668 = vmatpush.bf16.msra.mxu2 %v6410_v50  ;;  %2681 = vmatpush.bf16.msra.mxu3 %v6412_v49  ;;  %v4931_v50 = vld [vmem:[#allocation8 + $0x84] sm:$0xf]  ;;  %v4961_v49 = vld [vmem:[#allocation8 + $0x174] sm:$0xf] }
 0x24e   : > { %7746 = vst [vmem:[#allocation159_spill] sm:$0xff] %v6416_v44  ;;  %2694 = vmatpush.bf16.msrb.mxu0 %v6416_v44  ;;  %v6434_v44 = vor.u32 %v5172_v40, %v4781_v3  ;;  %v4135_v26 = vld [vmem:[#allocation8 + $0x2f8] sm:$0xf0]  ;;  %v6442_v25 = vor.u32 %v4931_v50, %v3823_v46  ;;  %v6444_v23 = vor.u32 %v4961_v49, %v3943_v19  ;;  %v3935_v3 = vld [vmem:[#allocation8 + $0x168] sm:$0xf0] }
 0x24f   : > { %7747 = vst [vmem:[#allocation160_spill] sm:$0xff] %v6418_v51  ;;  %2707 = vmatpush.bf16.msrb.mxu1 %v6418_v51  ;;  %v6436_v51 = vor.u32 %v5188_v31, %v4845_v6  ;;  %v6448_v40 = vor.u32 %v4993_v48, %v4071_v14  ;;  %v6450_v6 = vor.u32 %v5009_v39, %v4135_v26  ;;  %v4975_v31 = vld [vmem:[#allocation8 + $0x1e4] sm:$0xf]  ;;  %v3999_v36 = vld [vmem:[#allocation8 + $0x1e8] sm:$0xf0] }
 0x250   : > { %7748 = vst [vmem:[#allocation161_spill] sm:$0xff] %v6422_v10  ;;  %v4991_v43 = vld [vmem:[#allocation8 + $0x264] sm:$0xf]  ;;  %v4063_v62 = vld [vmem:[#allocation8 + $0x268] sm:$0xf0]  ;;  %v6456_v50 = vpack.c.bf16 %v6013_v42, %v6013_v42  ;;  %v6462_v49 = vpack.c.bf16 %v6015_v38, %v6015_v38 }
 0x251   : > { %7749 = vst [vmem:[#allocation162_spill] sm:$0xff] %v6424_v41  ;;  %2669 = vmatpush.bf16.msra.mxu2 %v6422_v10  ;;  %2682 = vmatpush.bf16.msra.mxu3 %v6424_v41  ;;  %v6446_v10 = vor.u32 %v4977_v18, %v4007_v27  ;;  %v4959_v41 = vld [vmem:[#allocation8 + $0x164] sm:$0xf]  ;;  %v4127_v53 = vld [vmem:[#allocation8 + $0x2e8] sm:$0xf0]  ;;  %v6468_v18 = vor.u32 %v4975_v31, %v3999_v36 }
 0x252   : > { %7750 = vst [vmem:[#allocation163_spill] sm:$0xff] %v6434_v44  ;;  %2695 = vmatpush.bf16.msrb.mxu0 %v6428_v54  ;;  %v5007_v46 = vld [vmem:[#allocation8 + $0x2e4] sm:$0xf]  ;;  %v6466_v19 = vor.u32 %v4959_v41, %v3935_v3  ;;  %v4957_v27 = vld [vmem:[#allocation8 + $0x154] sm:$0xf]  ;;  %v6472_v42 = vor.u32 %v4991_v43, %v4063_v62 }
 0x253   : > { %7751 = vst [vmem:[#allocation164_spill] sm:$0xff] %v6436_v51  ;;  %2708 = vmatpush.bf16.msrb.mxu1 %v6430_v58  ;;  %v3927_v48 = vld [vmem:[#allocation8 + $0x158] sm:$0xf0]  ;;  %v6474_v14 = vor.u32 %v5007_v46, %v4127_v53  ;;  %v4973_v38 = vld [vmem:[#allocation8 + $0x1d4] sm:$0xf] }
 0x254   : > { %7752 = vst [vmem:[#allocation165_spill] sm:$0xff] %v6440_v5  ;;  %v3991_v39 = vld [vmem:[#allocation8 + $0x1d8] sm:$0xf0]  ;;  %v4989_v26 = vld [vmem:[#allocation8 + $0x254] sm:$0xf]  ;;  %v6482_v43 = vor.u32 %v4957_v27, %v3927_v48 }
 0x255   : > { %7753 = vst [vmem:[#allocation166_spill] sm:$0xff] %v6442_v25  ;;  %2670 = vmatpush.bf16.msra.mxu2 %v6434_v44  ;;  %2683 = vmatpush.bf16.msra.mxu3 %v6436_v51  ;;  %v4055_v41 = vld [vmem:[#allocation8 + $0x258] sm:$0xf0]  ;;  %v5005_v36 = vld [vmem:[#allocation8 + $0x2d4] sm:$0xf]  ;;  %v6484_v31 = vor.u32 %v4973_v38, %v3991_v39 }
 0x256   : > { %7754 = vst [vmem:[#allocation167_spill] sm:$0xff] %v6444_v23  ;;  %2696 = vmatpush.bf16.msrb.mxu0 %v6440_v5  ;;  %v4119_v3 = vld [vmem:[#allocation8 + $0x2d8] sm:$0xf0]  ;;  %v4955_v62 = vld [vmem:[#allocation8 + $0x144] sm:$0xf]  ;;  %v6488_v53 = vor.u32 %v4989_v26, %v4055_v41 }
 0x257   : > { %7755 = vst [vmem:[#allocation168_spill] sm:$0xff] %v6446_v10  ;;  %2709 = vmatpush.bf16.msrb.mxu1 %v6442_v25  ;;  %v3919_v46 = vld [vmem:[#allocation8 + $0x148] sm:$0xf0]  ;;  %v4953_v38 = vld [vmem:[#allocation8 + $0x134] sm:$0xf] }
 0x258   : > { %7756 = vst [vmem:[#allocation169_spill] sm:$0xff] %v6448_v40  ;;  %2671 = vmatmul.bf16.vlgmr.msra.gmra.mxu2 %v6456_v50  ;;  %2684 = vmatmul.bf16.vlgmr.msra.gmra.mxu3 %v6462_v49  ;;  %v6494_v27 = vor.u32 %v4955_v62, %v3919_v46  ;;  %v3911_v39 = vld [vmem:[#allocation8 + $0x138] sm:$0xf0]  ;;  %v4255_v51 = vld [vmem:[#allocation8 + $0x3e8] sm:$0xf0] }
 0x259   : > { %7757 = vst [vmem:[#allocation170_spill] sm:$0xff] %v6450_v6  ;;  %2715 = vmatpush.bf16.msrb.mxu2 %v6444_v23  ;;  %2728 = vmatpush.bf16.msrb.mxu3 %v6446_v10  ;;  %v5003_v10 = vld [vmem:[#allocation8 + $0x2c4] sm:$0xf]  ;;  %v6506_v62 = vor.u32 %v4953_v38, %v3911_v39  ;;  %v4079_v23 = vld [vmem:[#allocation8 + $0x288] sm:$0xf0] }
 0x25a   : > { %7758 = vst [vmem:[#allocation171_spill] sm:$0xff] %v6466_v19  ;;  %2741 = vmatpush.bf16.msra.mxu0 %v6448_v40  ;;  %2710 = vmatmul.bf16.vlgmr.msrb.gmra.mxu1 %v6036_v9  ;;  %v3983_v9 = vld [vmem:[#allocation8 + $0x1c8] sm:$0xf0]  ;;  %v4987_v40 = vld [vmem:[#allocation8 + $0x244] sm:$0xf] }
 0x25b   : > { %7759 = vst [vmem:[#allocation172_spill] sm:$0xff] %v6468_v18  ;;  %2754 = vmatpush.bf16.msra.mxu1 %v6450_v6  ;;  %2697 = vmatmul.bf16.vlgmr.msrb.gmra.mxu0 %v6034_v8  ;;  %v6490_v6 = vor.u32 %v5005_v36, %v4119_v3  ;;  %v4971_v8 = vld [vmem:[#allocation8 + $0x1c4] sm:$0xf]  ;;  %v4969_v36 = vld [vmem:[#allocation8 + $0x1b4] sm:$0xf] }
 0x25c   : > { %7760 = vst [vmem:[#allocation173_spill] sm:$0xff] %v6472_v42  ;;  %v6496_v48 = vor.u32 %v4971_v8, %v3983_v9  ;;  %v3975_v3 = vld [vmem:[#allocation8 + $0x1b8] sm:$0xf0]  ;;  %v4951_v8 = vld [vmem:[#allocation8 + $0x124] sm:$0xf] }
 0x25d   : > { %7761 = vst [vmem:[#allocation174_spill] sm:$0xff] %v6474_v14  ;;  %2716 = vmatpush.bf16.msrb.mxu2 %v6466_v19  ;;  %2729 = vmatpush.bf16.msrb.mxu3 %v6468_v18  ;;  %v4047_v19 = vld [vmem:[#allocation8 + $0x248] sm:$0xf0]  ;;  %v6508_v46 = vor.u32 %v4969_v36, %v3975_v3  ;;  %v4949_v36 = vld [vmem:[#allocation8 + $0x114] sm:$0xf] }
 0x25e   : > { %7762 = vst [vmem:[#allocation175_spill] sm:$0xff] %v6482_v43  ;;  %2742 = vmatpush.bf16.msra.mxu0 %v6472_v42  ;;  %v4111_v18 = vld [vmem:[#allocation8 + $0x2c8] sm:$0xf0]  ;;  %v6500_v26 = vor.u32 %v4987_v40, %v4047_v19  ;;  %v5001_v42 = vld [vmem:[#allocation8 + $0x2b4] sm:$0xf] }
 0x25f   : > { %7763 = vst [vmem:[#allocation176_spill] sm:$0xff] %v6484_v31  ;;  %2755 = vmatpush.bf16.msra.mxu1 %v6474_v14  ;;  %v6502_v41 = vor.u32 %v5003_v10, %v4111_v18  ;;  %v4985_v14 = vld [vmem:[#allocation8 + $0x234] sm:$0xf]  ;;  %v3903_v9 = vld [vmem:[#allocation8 + $0x128] sm:$0xf0] }
 0x260   : > { %7764 = vst [vmem:[#allocation177_spill] sm:$0xff] %v6488_v53  ;;  %v4967_v19 = vld [vmem:[#allocation8 + $0x1a4] sm:$0xf]  ;;  %v3967_v18 = vld [vmem:[#allocation8 + $0x1a8] sm:$0xf0]  ;;  %v6518_v38 = vor.u32 %v4951_v8, %v3903_v9 }
 0x261   : > { %7765 = vst [vmem:[#allocation178_spill] sm:$0xff] %v6490_v6  ;;  %2717 = vmatpush.bf16.msrb.mxu2 %v6482_v43  ;;  %2730 = vmatpush.bf16.msrb.mxu3 %v6484_v31  ;;  %v4039_v43 = vld [vmem:[#allocation8 + $0x238] sm:$0xf0]  ;;  %v6520_v39 = vor.u32 %v4967_v19, %v3967_v18  ;;  %v4947_v8 = vld [vmem:[#allocation8 + $0x104] sm:$0xf] }
 0x262   : > { %7766 = vst [vmem:[#allocation179_spill] sm:$0xff] %v6494_v27  ;;  %2743 = vmatpush.bf16.msra.mxu0 %v6488_v53  ;;  %v4103_v31 = vld [vmem:[#allocation8 + $0x2b8] sm:$0xf0]  ;;  %v6512_v10 = vor.u32 %v4985_v14, %v4039_v43  ;;  %v4999_v53 = vld [vmem:[#allocation8 + $0x2a4] sm:$0xf] }
 0x263   : > { %7767 = vst [vmem:[#allocation180_spill] sm:$0xff] %v6496_v48  ;;  %2756 = vmatpush.bf16.msra.mxu1 %v6490_v6  ;;  %v6514_v40 = vor.u32 %v5001_v42, %v4103_v31  ;;  %v4983_v6 = vld [vmem:[#allocation8 + $0x224] sm:$0xf]  ;;  %v3895_v3 = vld [vmem:[#allocation8 + $0x118] sm:$0xf0] }
 0x264   : > { %7768 = vst [vmem:[#allocation181_spill] sm:$0xff] %v6500_v26  ;;  %v4965_v43 = vld [vmem:[#allocation8 + $0x194] sm:$0xf]  ;;  %v3959_v31 = vld [vmem:[#allocation8 + $0x198] sm:$0xf0]  ;;  %v6530_v9 = vor.u32 %v4949_v36, %v3895_v3 }
 0x265   : > { %7769 = vst [vmem:[#allocation182_spill] sm:$0xff] %v6502_v41  ;;  %2718 = vmatpush.bf16.msrb.mxu2 %v6494_v27  ;;  %2731 = vmatpush.bf16.msrb.mxu3 %v6496_v48  ;;  %v4031_v27 = vld [vmem:[#allocation8 + $0x228] sm:$0xf0]  ;;  %v6532_v19 = vor.u32 %v4965_v43, %v3959_v31  ;;  %v4199_v36 = vld [vmem:[#allocation8 + $0x378] sm:$0xf0] }
 0x266   : > { %7770 = vst [vmem:[#allocation183_spill] sm:$0xff] %v6506_v62  ;;  %2744 = vmatpush.bf16.msra.mxu0 %v6500_v26  ;;  %v4095_v48 = vld [vmem:[#allocation8 + $0x2a8] sm:$0xf0]  ;;  %v6524_v42 = vor.u32 %v4983_v6, %v4031_v27  ;;  %v4997_v26 = vld [vmem:[#allocation8 + $0x294] sm:$0xf] }
 0x267   : > { %7771 = vst [vmem:[#allocation184_spill] sm:$0xff] %v6508_v46  ;;  %2757 = vmatpush.bf16.msra.mxu1 %v6502_v41  ;;  %v6526_v14 = vor.u32 %v4999_v53, %v4095_v48  ;;  %v4981_v41 = vld [vmem:[#allocation8 + $0x214] sm:$0xf]  ;;  %v3887_v18 = vld [vmem:[#allocation8 + $0x108] sm:$0xf0] }
 0x268   : > { %7772 = vst [vmem:[#allocation185_spill] sm:$0xff] %v6512_v10  ;;  %v4963_v6 = vld [vmem:[#allocation8 + $0x184] sm:$0xf]  ;;  %v3951_v27 = vld [vmem:[#allocation8 + $0x188] sm:$0xf0] }
 0x269   : > { %7773 = vst [vmem:[#allocation186_spill] sm:$0xff] %v6514_v40  ;;  %2719 = vmatpush.bf16.msrb.mxu2 %v6506_v62  ;;  %2732 = vmatpush.bf16.msrb.mxu3 %v6508_v46  ;;  %v4023_v62 = vld [vmem:[#allocation8 + $0x218] sm:$0xf0]  ;;  %v5041_v3 = vld [vmem:[#allocation8 + $0x3f4] sm:$0xf] }
 0x26a   : > { %7774 = vst [vmem:[#allocation187_spill] sm:$0xff] %v6518_v38  ;;  %2745 = vmatpush.bf16.msra.mxu0 %v6512_v10  ;;  %v4087_v46 = vld [vmem:[#allocation8 + $0x298] sm:$0xf0]  ;;  %v6536_v53 = vor.u32 %v4981_v41, %v4023_v62  ;;  %v4015_v10 = vld [vmem:[#allocation8 + $0x208] sm:$0xf0] }
 0x26b   : > { %7775 = vst [vmem:[#allocation188_spill] sm:$0xff] %v6520_v39  ;;  %2758 = vmatpush.bf16.msra.mxu1 %v6514_v40  ;;  %v6538_v48 = vor.u32 %v4997_v26, %v4087_v46  ;;  %v4979_v40 = vld [vmem:[#allocation8 + $0x204] sm:$0xf]  ;;  %v4263_v43 = vld [vmem:[#allocation8 + $0x3f8] sm:$0xf0] }
 0x26c   : > { %7776 = vst [vmem:[#allocation189_spill] sm:$0xff] %v6524_v42  ;;  %v5057_v31 = vld [vmem:[#allocation8 + $0x474] sm:$0xf]  ;;  %v4327_v41 = vld [vmem:[#allocation8 + $0x478] sm:$0xf0]  ;;  %v6548_v46 = vor.u32 %v4979_v40, %v4015_v10 }
 0x26d   : > { %7777 = vst [vmem:[#allocation190_spill] sm:$0xff] %v6526_v14  ;;  %2720 = vmatpush.bf16.msrb.mxu2 %v6518_v38  ;;  %2733 = vmatpush.bf16.msrb.mxu3 %v6520_v39  ;;  %v4995_v38 = vld [vmem:[#allocation8 + $0x284] sm:$0xf]  ;;  %v5025_v39 = vld [vmem:[#allocation8 + $0x374] sm:$0xf] }
 0x26e   : > { %7778 = vst [vmem:[#allocation191_spill] sm:$0xff] %v6530_v9  ;;  %2746 = vmatpush.bf16.msra.mxu0 %v6524_v42  ;;  %v6542_v42 = vor.u32 %v4947_v8, %v3887_v18  ;;  %v5073_v26 = vld [vmem:[#allocation8 + $0x4f4] sm:$0xf]  ;;  %v4391_v62 = vld [vmem:[#allocation8 + $0x4f8] sm:$0xf0]  ;;  %v6550_v25 = vor.u32 %v4995_v38, %v4079_v23  ;;  %v6552_v5 = vor.u32 %v5025_v39, %v4199_v36 }
 0x26f   : > { %7779 = vst [vmem:[#allocation192_spill] sm:$0xff] %v6532_v19  ;;  %2759 = vmatpush.bf16.msra.mxu1 %v6526_v14  ;;  %v6544_v14 = vor.u32 %v4963_v6, %v3951_v27  ;;  %v4191_v8 = vld [vmem:[#allocation8 + $0x368] sm:$0xf0]  ;;  %v6556_v18 = vor.u32 %v5057_v31, %v4327_v41  ;;  %v6558_v6 = vor.u32 %v5073_v26, %v4391_v62  ;;  %v5039_v27 = vld [vmem:[#allocation8 + $0x3e4] sm:$0xf] }
 0x270   : > { %7780 = vst [vmem:[#allocation193_spill] sm:$0xff] %v6536_v53  ;;  %v5055_v44 = vld [vmem:[#allocation8 + $0x464] sm:$0xf]  ;;  %v4319_v10 = vld [vmem:[#allocation8 + $0x468] sm:$0xf0]  ;;  %v6568_v39 = vor.u32 %v5039_v27, %v4255_v51 }
 0x271   : > { %7781 = vst [vmem:[#allocation194_spill] sm:$0xff] %v6538_v48  ;;  %2721 = vmatpush.bf16.msrb.mxu2 %v6530_v9  ;;  %2734 = vmatpush.bf16.msrb.mxu3 %v6532_v19  ;;  %v6554_v9 = vor.u32 %v5041_v3, %v4263_v43  ;;  %v5023_v19 = vld [vmem:[#allocation8 + $0x364] sm:$0xf]  ;;  %v4383_v40 = vld [vmem:[#allocation8 + $0x4e8] sm:$0xf0]  ;;  %v6572_v43 = vor.u32 %v5055_v44, %v4319_v10 }
 0x272   : > { %7782 = vst [vmem:[#allocation195_spill] sm:$0xff] %v6542_v42  ;;  %2747 = vmatpush.bf16.msra.mxu0 %v6536_v53  ;;  %v5071_v23 = vld [vmem:[#allocation8 + $0x4e4] sm:$0xf]  ;;  %v6566_v38 = vor.u32 %v5023_v19, %v4191_v8  ;;  %v5021_v36 = vld [vmem:[#allocation8 + $0x354] sm:$0xf] }
 0x273   : > { %7783 = vst [vmem:[#allocation196_spill] sm:$0xff] %v6544_v14  ;;  %2760 = vmatpush.bf16.msra.mxu1 %v6538_v48  ;;  %v4183_v3 = vld [vmem:[#allocation8 + $0x358] sm:$0xf0]  ;;  %v6574_v31 = vor.u32 %v5071_v23, %v4383_v40  ;;  %v5037_v41 = vld [vmem:[#allocation8 + $0x3d4] sm:$0xf] }
 0x274   : > { %7784 = vst [vmem:[#allocation197_spill] sm:$0xff] %v6548_v46  ;;  %v4247_v26 = vld [vmem:[#allocation8 + $0x3d8] sm:$0xf0]  ;;  %v5053_v62 = vld [vmem:[#allocation8 + $0x454] sm:$0xf]  ;;  %v6582_v44 = vor.u32 %v5021_v36, %v4183_v3 }
 0x275   : > { %7785 = vst [vmem:[#allocation198_spill] sm:$0xff] %v6550_v25  ;;  %2722 = vmatpush.bf16.msrb.mxu2 %v6542_v42  ;;  %2735 = vmatpush.bf16.msrb.mxu3 %v6544_v14  ;;  %v4311_v19 = vld [vmem:[#allocation8 + $0x458] sm:$0xf0]  ;;  %v5069_v51 = vld [vmem:[#allocation8 + $0x4d4] sm:$0xf]  ;;  %v6584_v27 = vor.u32 %v5037_v41, %v4247_v26  ;;  %v2490_v10 = vpop.f32.mrf.mxu0 }
 0x276   : > { %7786 = vst [vmem:[#allocation199_spill] sm:$0xff] %v6552_v5  ;;  %2748 = vmatpush.bf16.msra.mxu0 %v6548_v46  ;;  %v4375_v8 = vld [vmem:[#allocation8 + $0x4d8] sm:$0xf0]  ;;  %v5019_v23 = vld [vmem:[#allocation8 + $0x344] sm:$0xf] }
 0x277   : > { %7787 = vst [vmem:[#allocation200_spill] sm:$0xff] %v6554_v9  ;;  %2761 = vmatpush.bf16.msra.mxu1 %v6550_v25  ;;  %v4239_v40 = vld [vmem:[#allocation8 + $0x3c8] sm:$0xf0]  ;;  %v5067_v36 = vld [vmem:[#allocation8 + $0x4c4] sm:$0xf] }
 0x278   : > { %7788 = vst [vmem:[#allocation201_spill] sm:$0xff] %v6556_v18  ;;  %2723 = vmatmul.bf16.vlgmr.msrb.gmra.mxu2 %v6044_v16  ;;  %2736 = vmatmul.bf16.vlgmr.msrb.gmra.mxu3 %v6051_v59  ;;  %v4175_v16 = vld [vmem:[#allocation8 + $0x348] sm:$0xf0]  ;;  %v6588_v59 = vor.u32 %v5053_v62, %v4311_v19  ;;  %v4167_v62 = vld [vmem:[#allocation8 + $0x338] sm:$0xf0] }
 0x279   : > { %7789 = vst [vmem:[#allocation202_spill] sm:$0xff] %v6558_v6  ;;  %2767 = vmatpush.bf16.msra.mxu2 %v6552_v5  ;;  %2780 = vmatpush.bf16.msra.mxu3 %v6554_v9  ;;  %v4367_v3 = vld [vmem:[#allocation8 + $0x4c8] sm:$0xf0]  ;;  %v6594_v41 = vor.u32 %v5019_v23, %v4175_v16  ;;  %v5049_v9 = vld [vmem:[#allocation8 + $0x434] sm:$0xf] }
 0x27a   : > { %7790 = vst [vmem:[#allocation203_spill] sm:$0xff] %v6566_v38  ;;  %2793 = vmatpush.bf16.msrb.mxu0 %v6556_v18  ;;  %2762 = vmatmul.bf16.vlgmr.msra.gmra.mxu1 %v6139_v11  ;;  %v5035_v11 = vld [vmem:[#allocation8 + $0x3c4] sm:$0xf]  ;;  %v5033_v18 = vld [vmem:[#allocation8 + $0x3b4] sm:$0xf] }
 0x27b   : > { %7791 = vst [vmem:[#allocation204_spill] sm:$0xff] %v6568_v39  ;;  %2806 = vmatpush.bf16.msrb.mxu1 %v6558_v6  ;;  %2749 = vmatmul.bf16.vlgmr.msra.gmra.mxu0 %v6123_v37  ;;  %v6590_v37 = vor.u32 %v5069_v51, %v4375_v8  ;;  %v2503_v6 = vpop.f32.mrf.mxu1  ;;  %v6596_v26 = vor.u32 %v5035_v11, %v4239_v40  ;;  %v2464_v8 = vpop.f32.mrf.mxu2  ;;  %v4295_v23 = vld [vmem:[#allocation8 + $0x438] sm:$0xf0]  ;;  %v5065_v16 = vld [vmem:[#allocation8 + $0x4b4] sm:$0xf] }
 0x27c   : > { %7792 = vst [vmem:[#allocation205_spill] sm:$0xff] %v6572_v43  ;;  %v6602_v51 = vor.u32 %v5067_v36, %v4367_v3  ;;  %v4359_v11 = vld [vmem:[#allocation8 + $0x4b8] sm:$0xf0]  ;;  %v5015_v36 = vld [vmem:[#allocation8 + $0x324] sm:$0xf] }
 0x27d   : > { %7793 = vst [vmem:[#allocation206_spill] sm:$0xff] %v6574_v31  ;;  %2768 = vmatpush.bf16.msra.mxu2 %v6566_v38  ;;  %2781 = vmatpush.bf16.msra.mxu3 %v6568_v39  ;;  %v5051_v38 = vld [vmem:[#allocation8 + $0x444] sm:$0xf]  ;;  %v4303_v39 = vld [vmem:[#allocation8 + $0x448] sm:$0xf0] }
 0x27e   : > { %7794 = vst [vmem:[#allocation207_spill] sm:$0xff] %v6582_v44  ;;  %2794 = vmatpush.bf16.msrb.mxu0 %v6572_v43  ;;  %v6600_v19 = vor.u32 %v5051_v38, %v4303_v39  ;;  %v2477_v43 = vpop.f32.mrf.mxu3  ;;  %v2492_v39 = vpop.f32.mrf.mxu0  ;;  %v4159_v3 = vld [vmem:[#allocation8 + $0x328] sm:$0xf0]  ;;  %v5047_v5 = vld [vmem:[#allocation8 + $0x424] sm:$0xf] }
 0x27f   : > { %7795 = vst [vmem:[#allocation208_spill] sm:$0xff] %v6584_v27  ;;  %2807 = vmatpush.bf16.msrb.mxu1 %v6574_v31  ;;  %v5017_v31 = vld [vmem:[#allocation8 + $0x334] sm:$0xf]  ;;  %v4215_v39 = vld [vmem:[#allocation8 + $0x398] sm:$0xf0] }
 0x280   : > { %7796 = vst [vmem:[#allocation209_spill] sm:$0xff] %v6588_v59  ;;  %v5121_v25 = vld [vmem:[#allocation8 + $0x674] sm:$0xf]  ;;  %v4511_v53 = vld [vmem:[#allocation8 + $0x5e8] sm:$0xf0] }
 0x281   : > { %7797 = vst [vmem:[#allocation210_spill] sm:$0xff] %v6590_v37  ;;  %2769 = vmatpush.bf16.msra.mxu2 %v6582_v44  ;;  %2782 = vmatpush.bf16.msra.mxu3 %v6584_v27  ;;  %v4231_v44 = vld [vmem:[#allocation8 + $0x3b8] sm:$0xf0]  ;;  %v2478_v27 = vadd.f32 %v2477_v43, %v2464_v8  ;;  %v6612_v43 = vor.u32 %v5049_v9, %v4295_v23  ;;  %v5013_v9 = vld [vmem:[#allocation8 + $0x314] sm:$0xf] }
 0x282   : > { %7798 = vst [vmem:[#allocation211_spill] sm:$0xff] %v6594_v41  ;;  %2795 = vmatpush.bf16.msrb.mxu0 %v6588_v59  ;;  %v6606_v59 = vor.u32 %v5017_v31, %v4167_v62  ;;  %v6608_v38 = vor.u32 %v5033_v18, %v4231_v44  ;;  %v6614_v8 = vor.u32 %v5065_v16, %v4359_v11  ;;  %v5063_v31 = vld [vmem:[#allocation8 + $0x4a4] sm:$0xf]  ;;  %v4151_v23 = vld [vmem:[#allocation8 + $0x318] sm:$0xf0] }
 0x283   : > { %7799 = vst [vmem:[#allocation212_spill] sm:$0xff] %v6596_v26  ;;  %2808 = vmatpush.bf16.msrb.mxu1 %v6590_v37  ;;  %v2491_v40 = vadd.f32 %v2490_v10, %v2478_v27  ;;  %v5031_v37 = vld [vmem:[#allocation8 + $0x3a4] sm:$0xf]  ;;  %v4287_v27 = vld [vmem:[#allocation8 + $0x428] sm:$0xf0]  ;;  %v6618_v44 = vor.u32 %v5015_v36, %v4159_v3  ;;  %v2466_v11 = vpop.f32.mrf.mxu2 }
 0x284   : > { %7800 = vst [vmem:[#allocation213_spill] sm:$0xff] %v6600_v19  ;;  %v4351_v10 = vld [vmem:[#allocation8 + $0x4a8] sm:$0xf0]  ;;  %v6624_v16 = vor.u32 %v5047_v5, %v4287_v27  ;;  %v5061_v36 = vld [vmem:[#allocation8 + $0x494] sm:$0xf] }
 0x285   : > { %7801 = vst [vmem:[#allocation214_spill] sm:$0xff] %v6602_v51  ;;  %2770 = vmatpush.bf16.msra.mxu2 %v6594_v41  ;;  %2783 = vmatpush.bf16.msra.mxu3 %v6596_v26  ;;  %v4223_v41 = vld [vmem:[#allocation8 + $0x3a8] sm:$0xf0]  ;;  %v2505_v26 = vpop.f32.mrf.mxu1  ;;  %v2504_v18 = vadd.f32 %v2503_v6, %v2491_v40  ;;  %v5029_v40 = vld [vmem:[#allocation8 + $0x394] sm:$0xf] }
 0x286   : > { %7802 = vst [vmem:[#allocation215_spill] sm:$0xff] %v6606_v59  ;;  %2796 = vmatpush.bf16.msrb.mxu0 %v6600_v19  ;;  %v6620_v62 = vor.u32 %v5031_v37, %v4223_v41  ;;  %v6626_v26 = vor.u32 %v5063_v31, %v4351_v10  ;;  %v2479_v6 = vpop.f32.mrf.mxu3  ;;  %v4343_v3 = vld [vmem:[#allocation8 + $0x498] sm:$0xf0]  ;;  %v5011_v37 = vld [vmem:[#allocation8 + $0x304] sm:$0xf]  ;;  %v6630_v41 = vor.u32 %v5013_v9, %v4151_v23  ;;  %v2542_v5 = vpop.f32.mrf.mxu0 }
 0x287   : > { %7803 = vst [vmem:[#allocation216_spill] sm:$0xff] %v6608_v38  ;;  %2809 = vmatpush.bf16.msrb.mxu1 %v6602_v51  ;;  %v4143_v27 = vld [vmem:[#allocation8 + $0x308] sm:$0xf0]  ;;  %v5027_v31 = vld [vmem:[#allocation8 + $0x384] sm:$0xf]  ;;  %v6638_v6 = vor.u32 %v5061_v36, %v4343_v3 }
 0x288   : > { %7804 = vst [vmem:[#allocation217_spill] sm:$0xff] %v6612_v43  ;;  %v4207_v10 = vld [vmem:[#allocation8 + $0x388] sm:$0xf0]  ;;  %v5059_v51 = vld [vmem:[#allocation8 + $0x484] sm:$0xf] }
 0x289   : > { %7805 = vst [vmem:[#allocation218_spill] sm:$0xff] %v6614_v8  ;;  %2771 = vmatpush.bf16.msra.mxu2 %v6606_v59  ;;  %2784 = vmatpush.bf16.msra.mxu3 %v6608_v38  ;;  %v5045_v59 = vld [vmem:[#allocation8 + $0x414] sm:$0xf]  ;;  %v4279_v38 = vld [vmem:[#allocation8 + $0x418] sm:$0xf0] }
 0x28a   : > { %7806 = vst [vmem:[#allocation219_spill] sm:$0xff] %v6618_v44  ;;  %2797 = vmatpush.bf16.msrb.mxu0 %v6612_v43  ;;  %v6636_v11 = vor.u32 %v5045_v59, %v4279_v38  ;;  %v5043_v43 = vld [vmem:[#allocation8 + $0x404] sm:$0xf]  ;;  %v4335_v9 = vld [vmem:[#allocation8 + $0x488] sm:$0xf0]  ;;  %v6644_v59 = vor.u32 %v5027_v31, %v4207_v10 }
 0x28b   : > { %7807 = vst [vmem:[#allocation220_spill] sm:$0xff] %v6620_v62  ;;  %2810 = vmatpush.bf16.msrb.mxu1 %v6614_v8  ;;  %v6632_v8 = vor.u32 %v5029_v40, %v4215_v39  ;;  %v5089_v23 = vld [vmem:[#allocation8 + $0x574] sm:$0xf]  ;;  %v4455_v40 = vld [vmem:[#allocation8 + $0x578] sm:$0xf0]  ;;  %v6650_v46 = vor.u32 %v5059_v51, %v4335_v9  ;;  %v2516_v14 = vpop.f32.mrf.mxu2 }
 0x28c   : > { %7808 = vst [vmem:[#allocation221_spill] sm:$0xff] %v6624_v16  ;;  %v5105_v39 = vld [vmem:[#allocation8 + $0x5f4] sm:$0xf]  ;;  %v4519_v19 = vld [vmem:[#allocation8 + $0x5f8] sm:$0xf0]  ;;  %v6652_v42 = vor.u32 %v5089_v23, %v4455_v40 }
 0x28d   : > { %7809 = vst [vmem:[#allocation222_spill] sm:$0xff] %v6626_v26  ;;  %2772 = vmatpush.bf16.msra.mxu2 %v6618_v44  ;;  %2785 = vmatpush.bf16.msra.mxu3 %v6620_v62  ;;  %v4271_v44 = vld [vmem:[#allocation8 + $0x408] sm:$0xf0]  ;;  %v2555_v62 = vpop.f32.mrf.mxu1  ;;  %v4583_v38 = vld [vmem:[#allocation8 + $0x678] sm:$0xf0] }
 0x28e   : > { %7810 = vst [vmem:[#allocation223_spill] sm:$0xff] %v6630_v41  ;;  %2798 = vmatpush.bf16.msrb.mxu0 %v6624_v16  ;;  %v6642_v16 = vor.u32 %v5011_v37, %v4143_v27  ;;  %v5137_v36 = vld [vmem:[#allocation8 + $0x6f4] sm:$0xf]  ;;  %v4647_v3 = vld [vmem:[#allocation8 + $0x6f8] sm:$0xf0]  ;;  %v2517_v37 = vadd.f32 %v2516_v14, %v2504_v18  ;;  %v2529_v27 = vpop.f32.mrf.mxu3 }
 0x28f   : > { %7811 = vst [vmem:[#allocation224_spill] sm:$0xff] %v6632_v8  ;;  %2811 = vmatpush.bf16.msrb.mxu1 %v6626_v26  ;;  %v6648_v26 = vor.u32 %v5043_v43, %v4271_v44  ;;  %v5087_v31 = vld [vmem:[#allocation8 + $0x564] sm:$0xf]  ;;  %v4447_v10 = vld [vmem:[#allocation8 + $0x568] sm:$0xf0]  ;;  %v6658_v48 = vor.u32 %v5137_v36, %v4647_v3  ;;  %v2544_v43 = vpop.f32.mrf.mxu0 }
 0x290   : > { %7812 = vst [vmem:[#allocation225_spill] sm:$0xff] %v6636_v11  ;;  %v2530_v51 = vadd.f32 %v2529_v27, %v2517_v37  ;;  %v4575_v44 = vld [vmem:[#allocation8 + $0x668] sm:$0xf0]  ;;  %v6666_v18 = vor.u32 %v5087_v31, %v4447_v10  ;;  %v5085_v40 = vld [vmem:[#allocation8 + $0x554] sm:$0xf] }
 0x291   : > { %7813 = vst [vmem:[#allocation226_spill] sm:$0xff] %v6638_v6  ;;  %2773 = vmatpush.bf16.msra.mxu2 %v6630_v41  ;;  %2786 = vmatpush.bf16.msra.mxu3 %v6632_v8  ;;  %v6654_v41 = vor.u32 %v5105_v39, %v4519_v19  ;;  %v6656_v8 = vor.u32 %v5121_v25, %v4583_v38  ;;  %v5135_v19 = vld [vmem:[#allocation8 + $0x6e4] sm:$0xf]  ;;  %v4639_v9 = vld [vmem:[#allocation8 + $0x6e8] sm:$0xf0] }
 0x292   : > { %2799 = vmatpush.bf16.msrb.mxu0 %v6636_v11  ;;  %7814 = vst [vmem:[#allocation227_spill] sm:$0xff] %v6658_v48  ;;  %v5103_v11 = vld [vmem:[#allocation8 + $0x5e4] sm:$0xf]  ;;  %v2543_v25 = vadd.f32 %v2542_v5, %v2530_v51  ;;  %v4439_v39 = vld [vmem:[#allocation8 + $0x558] sm:$0xf0]  ;;  %v6674_v36 = vor.u32 %v5135_v19, %v4639_v9 }
 0x293   : > { %2812 = vmatpush.bf16.msrb.mxu1 %v6638_v6  ;;  %v5119_v6 = vld [vmem:[#allocation8 + $0x664] sm:$0xf]  ;;  %7815 = vst [vmem:[#allocation228_spill] sm:$0xff] %v6666_v18  ;;  %v6668_v23 = vor.u32 %v5103_v11, %v4511_v53  ;;  %v5101_v3 = vld [vmem:[#allocation8 + $0x5d4] sm:$0xf]  ;;  %v2518_v10 = vpop.f32.mrf.mxu2 }
 0x294   : > { %v6672_v38 = vor.u32 %v5119_v6, %v4575_v44  ;;  %7818 = vst [vmem:[#allocation231_spill] sm:$0xff] %v6674_v36  ;;  %v4503_v37 = vld [vmem:[#allocation8 + $0x5d8] sm:$0xf0]  ;;  %v5117_v27 = vld [vmem:[#allocation8 + $0x654] sm:$0xf]  ;;  %v2556_v31 = vadd.f32 %v2555_v62, %v2543_v25  ;;  %v6682_v6 = vor.u32 %v5085_v40, %v4439_v39 }
 0x295   : > { %2774 = vmatpush.bf16.msra.mxu2 %v6642_v16  ;;  %2787 = vmatpush.bf16.msra.mxu3 %v6644_v59  ;;  %v2557_v14 = vpop.f32.mrf.mxu1  ;;  %7816 = vst [vmem:[#allocation229_spill] sm:$0xff] %v6668_v23  ;;  %v4567_v5 = vld [vmem:[#allocation8 + $0x658] sm:$0xf0]  ;;  %v5133_v53 = vld [vmem:[#allocation8 + $0x6d4] sm:$0xf]  ;;  %v6684_v51 = vor.u32 %v5101_v3, %v4503_v37 }
 0x296   : > { %2800 = vmatpush.bf16.msrb.mxu0 %v6648_v26  ;;  %7817 = vst [vmem:[#allocation230_spill] sm:$0xff] %v6672_v38  ;;  %v4631_v11 = vld [vmem:[#allocation8 + $0x6d8] sm:$0xf0]  ;;  %v5083_v43 = vld [vmem:[#allocation8 + $0x544] sm:$0xf]  ;;  %v6688_v62 = vor.u32 %v5117_v27, %v4567_v5 }
 0x297   : > { %2813 = vmatpush.bf16.msrb.mxu1 %v6650_v46  ;;  %7819 = vst [vmem:[#allocation232_spill] sm:$0xff] %v6682_v6  ;;  %v4495_v44 = vld [vmem:[#allocation8 + $0x5c8] sm:$0xf0]  ;;  %v5115_v19 = vld [vmem:[#allocation8 + $0x644] sm:$0xf] }
 0x298   : > { %2775 = vmatmul.bf16.vlgmr.msra.gmra.mxu2 %v6129_v12  ;;  %2788 = vmatmul.bf16.vlgmr.msra.gmra.mxu3 %v6153_v60  ;;  %7820 = vst [vmem:[#allocation233_spill] sm:$0xff] %v6684_v51  ;;  %v2531_v12 = vpop.f32.mrf.mxu3  ;;  %v4431_v60 = vld [vmem:[#allocation8 + $0x548] sm:$0xf0]  ;;  %v5131_v25 = vld [vmem:[#allocation8 + $0x6c4] sm:$0xf]  ;;  %v2594_v40 = vpop.f32.mrf.mxu0 }
 0x299   : > { %2819 = vmatpush.bf16.msrb.mxu2 %v6652_v42  ;;  %2832 = vmatpush.bf16.msrb.mxu3 %v6654_v41  ;;  %7821 = vst [vmem:[#allocation234_spill] sm:$0xff] %v6688_v62  ;;  %v4559_v9 = vld [vmem:[#allocation8 + $0x648] sm:$0xf0]  ;;  %v6694_v3 = vor.u32 %v5083_v43, %v4431_v60  ;;  %v5081_v27 = vld [vmem:[#allocation8 + $0x534] sm:$0xf] }
 0x29a   : > { %2845 = vmatpush.bf16.msra.mxu0 %v6656_v8  ;;  %2814 = vmatmul.bf16.vlgmr.msrb.gmra.mxu1 %v6240_v45  ;;  %v5099_v45 = vld [vmem:[#allocation8 + $0x5c4] sm:$0xf]  ;;  %v4623_v14 = vld [vmem:[#allocation8 + $0x6c8] sm:$0xf0]  ;;  %v4423_v5 = vld [vmem:[#allocation8 + $0x538] sm:$0xf0] }
 0x29b   : > { %2858 = vmatpush.bf16.msra.mxu1 %v6658_v48  ;;  %2801 = vmatmul.bf16.vlgmr.msrb.gmra.mxu0 %v6238_v15  ;;  %v6690_v15 = vor.u32 %v5133_v53, %v4631_v11  ;;  %7823 = vst [vmem:[#allocation236_spill] sm:$0xff] %v6694_v3  ;;  %v6696_v37 = vor.u32 %v5099_v45, %v4495_v44  ;;  %v5097_v10 = vld [vmem:[#allocation8 + $0x5b4] sm:$0xf]  ;;  %v4487_v12 = vld [vmem:[#allocation8 + $0x5b8] sm:$0xf0] }
 0x29c   : > { %v6700_v53 = vor.u32 %v5115_v19, %v4559_v9  ;;  %v6702_v11 = vor.u32 %v5131_v25, %v4623_v14  ;;  %v6706_v43 = vor.u32 %v5081_v27, %v4423_v5  ;;  %v6708_v60 = vor.u32 %v5097_v10, %v4487_v12  ;;  %v5079_v45 = vld [vmem:[#allocation8 + $0x524] sm:$0xf]  ;;  %v4415_v44 = vld [vmem:[#allocation8 + $0x528] sm:$0xf0]  ;;  %v2568_v25 = vpop.f32.mrf.mxu2 }
 0x29d   : > { %2820 = vmatpush.bf16.msrb.mxu2 %v6666_v18  ;;  %2833 = vmatpush.bf16.msrb.mxu3 %v6668_v23  ;;  %7822 = vst [vmem:[#allocation235_spill] sm:$0xff] %v6690_v15  ;;  %v2607_v39 = vpop.f32.mrf.mxu1  ;;  %v4543_v27 = vld [vmem:[#allocation8 + $0x628] sm:$0xf0]  ;;  %v5127_v5 = vld [vmem:[#allocation8 + $0x6a4] sm:$0xf] }
 0x29e   : > { %2846 = vmatpush.bf16.msra.mxu0 %v6672_v38  ;;  %7824 = vst [vmem:[#allocation237_spill] sm:$0xff] %v6696_v37  ;;  %v4615_v38 = vld [vmem:[#allocation8 + $0x6b8] sm:$0xf0]  ;;  %v4607_v10 = vld [vmem:[#allocation8 + $0x6a8] sm:$0xf0] }
 0x29f   : > { %2859 = vmatpush.bf16.msra.mxu1 %v6674_v36  ;;  %7825 = vst [vmem:[#allocation238_spill] sm:$0xff] %v6700_v53  ;;  %v5129_v36 = vld [vmem:[#allocation8 + $0x6b4] sm:$0xf]  ;;  %v4471_v23 = vld [vmem:[#allocation8 + $0x598] sm:$0xf0] }
 0x2a0   : > { %7826 = vst [vmem:[#allocation239_spill] sm:$0xff] %v6702_v11  ;;  %v6714_v9 = vor.u32 %v5129_v36, %v4615_v38  ;;  %v2581_v14 = vpop.f32.mrf.mxu3  ;;  %v5077_v36 = vld [vmem:[#allocation8 + $0x514] sm:$0xf]  ;;  %v4775_v18 = vld [vmem:[#allocation8 + $0x7f8] sm:$0xf0] }
 0x2a1   : > { %2821 = vmatpush.bf16.msrb.mxu2 %v6682_v6  ;;  %2834 = vmatpush.bf16.msrb.mxu3 %v6684_v51  ;;  %v5113_v6 = vld [vmem:[#allocation8 + $0x634] sm:$0xf]  ;;  %v4551_v51 = vld [vmem:[#allocation8 + $0x638] sm:$0xf0]  ;;  %7827 = vst [vmem:[#allocation240_spill] sm:$0xff] %v6706_v43 }
 0x2a2   : > { %2847 = vmatpush.bf16.msra.mxu0 %v6688_v62  ;;  %7828 = vst [vmem:[#allocation241_spill] sm:$0xff] %v6708_v60  ;;  %v6712_v19 = vor.u32 %v5113_v6, %v4551_v51  ;;  %v5111_v62 = vld [vmem:[#allocation8 + $0x624] sm:$0xf]  ;;  %v6718_v6 = vor.u32 %v5079_v45, %v4415_v44  ;;  %v4407_v51 = vld [vmem:[#allocation8 + $0x518] sm:$0xf0] }
 0x2a3   : > { %2860 = vmatpush.bf16.msra.mxu1 %v6690_v15  ;;  %7830 = vst [vmem:[#allocation243_spill] sm:$0xff] %v6714_v9  ;;  %v5095_v15 = vld [vmem:[#allocation8 + $0x5a4] sm:$0xf]  ;;  %v4599_v45 = vld [vmem:[#allocation8 + $0x698] sm:$0xf0] }
 0x2a4   : > { %7829 = vst [vmem:[#allocation242_spill] sm:$0xff] %v6712_v19  ;;  %v5075_v44 = vld [vmem:[#allocation8 + $0x504] sm:$0xf] }
 0x2a5   : > { %2822 = vmatpush.bf16.msrb.mxu2 %v6694_v3  ;;  %2835 = vmatpush.bf16.msrb.mxu3 %v6696_v37  ;;  %v4479_v3 = vld [vmem:[#allocation8 + $0x5a8] sm:$0xf0]  ;;  %v2569_v37 = vadd.f32 %v2568_v25, %v2556_v31  ;;  %7831 = vst [vmem:[#allocation244_spill] sm:$0xff] %v6718_v6  ;;  %v6724_v31 = vor.u32 %v5111_v62, %v4543_v27  ;;  %v5183_v48 = vld [vmem:[#allocation8 + $0x864] sm:$0xf] }
 0x2a6   : > { %2848 = vmatpush.bf16.msra.mxu0 %v6700_v53  ;;  %v2596_v53 = vpop.f32.mrf.mxu0  ;;  %v6720_v38 = vor.u32 %v5095_v15, %v4479_v3  ;;  %v6726_v25 = vor.u32 %v5127_v5, %v4607_v10  ;;  %v6730_v15 = vor.u32 %v5077_v36, %v4407_v51  ;;  %v4399_v62 = vld [vmem:[#allocation8 + $0x508] sm:$0xf0]  ;;  %v5123_v51 = vld [vmem:[#allocation8 + $0x684] sm:$0xf] }
 0x2a7   : > { %2861 = vmatpush.bf16.msra.mxu1 %v6702_v11  ;;  %v2582_v12 = vadd.f32 %v2581_v14, %v2569_v37  ;;  %v2609_v11 = vpop.f32.mrf.mxu1  ;;  %7833 = vst [vmem:[#allocation246_spill] sm:$0xff] %v6724_v31  ;;  %v4535_v53 = vld [vmem:[#allocation8 + $0x618] sm:$0xf0]  ;;  %v5091_v14 = vld [vmem:[#allocation8 + $0x584] sm:$0xf] }
 0x2a8   : > { %7832 = vst [vmem:[#allocation245_spill] sm:$0xff] %v6720_v38  ;;  %v5125_v11 = vld [vmem:[#allocation8 + $0x694] sm:$0xf]  ;;  %v4463_v27 = vld [vmem:[#allocation8 + $0x588] sm:$0xf0] }
 0x2a9   : > { %2823 = vmatpush.bf16.msrb.mxu2 %v6706_v43  ;;  %2836 = vmatpush.bf16.msrb.mxu3 %v6708_v60  ;;  %7834 = vst [vmem:[#allocation247_spill] sm:$0xff] %v6726_v25  ;;  %v5093_v43 = vld [vmem:[#allocation8 + $0x594] sm:$0xf]  ;;  %v2595_v37 = vadd.f32 %v2594_v40, %v2582_v12  ;;  %v6740_v10 = vor.u32 %v5125_v11, %v4599_v45  ;;  %v2570_v12 = vpop.f32.mrf.mxu2  ;;  %v4527_v36 = vld [vmem:[#allocation8 + $0x608] sm:$0xf0] }
 0x2aa   : > { %2849 = vmatpush.bf16.msra.mxu0 %v6712_v19  ;;  %v5109_v60 = vld [vmem:[#allocation8 + $0x614] sm:$0xf]  ;;  %7835 = vst [vmem:[#allocation248_spill] sm:$0xff] %v6730_v15  ;;  %v6732_v3 = vor.u32 %v5093_v43, %v4471_v23  ;;  %v4591_v23 = vld [vmem:[#allocation8 + $0x688] sm:$0xf0] }
 0x2ab   : > { %2862 = vmatpush.bf16.msra.mxu1 %v6714_v9  ;;  %v6734_v5 = vadd.f32 %v2607_v39, %v2595_v37  ;;  %v6738_v40 = vor.u32 %v5109_v60, %v4535_v53  ;;  %v5153_v43 = vld [vmem:[#allocation8 + $0x774] sm:$0xf]  ;;  %v4711_v9 = vld [vmem:[#allocation8 + $0x778] sm:$0xf0]  ;;  %v6744_v37 = vor.u32 %v5075_v44, %v4399_v62  ;;  %v6746_v60 = vor.u32 %v5091_v14, %v4463_v27  ;;  %v4703_v44 = vld [vmem:[#allocation8 + $0x768] sm:$0xf0] }
 0x2ac   : > { %7836 = vst [vmem:[#allocation249_spill] sm:$0xff] %v6732_v3  ;;  %v5169_v19 = vld [vmem:[#allocation8 + $0x7f4] sm:$0xf]  ;;  %v4839_v53 = vld [vmem:[#allocation8 + $0x878] sm:$0xf0]  ;;  %v6752_v12 = vor.u32 %v5123_v51, %v4591_v23 }
 0x2ad   : > { %2824 = vmatpush.bf16.msrb.mxu2 %v6718_v6  ;;  %2837 = vmatpush.bf16.msrb.mxu3 %v6720_v38  ;;  %v2583_v6 = vpop.f32.mrf.mxu3  ;;  %v5107_v38 = vld [vmem:[#allocation8 + $0x604] sm:$0xf]  ;;  %v5185_v39 = vld [vmem:[#allocation8 + $0x874] sm:$0xf]  ;;  %v4895_v51 = vld [vmem:[#allocation8 + $0x8e8] sm:$0xf0] }
 0x2ae   : > { %2850 = vmatpush.bf16.msra.mxu0 %v6724_v31  ;;  %v5201_v11 = vld [vmem:[#allocation8 + $0x8f4] sm:$0xf]  ;;  %v4903_v6 = vld [vmem:[#allocation8 + $0x8f8] sm:$0xf0]  ;;  %v6750_v45 = vor.u32 %v5107_v38, %v4527_v36  ;;  %v6758_v62 = vor.u32 %v5185_v39, %v4839_v53  ;;  %v5167_v27 = vld [vmem:[#allocation8 + $0x7e4] sm:$0xf] }
 0x2af   : > { %2863 = vmatpush.bf16.msra.mxu1 %v6726_v25  ;;  %v6754_v25 = vor.u32 %v5153_v43, %v4711_v9  ;;  %v6760_v14 = vor.u32 %v5201_v11, %v4903_v6  ;;  %v4767_v31 = vld [vmem:[#allocation8 + $0x7e8] sm:$0xf0]  ;;  %v5199_v36 = vld [vmem:[#allocation8 + $0x8e4] sm:$0xf]  ;;  %v5149_v9 = vld [vmem:[#allocation8 + $0x754] sm:$0xf] }
 0x2b0   : > { %7839 = vst [vmem:[#allocation252_spill] sm:$0xff] %v6758_v62  ;;  %v4831_v38 = vld [vmem:[#allocation8 + $0x868] sm:$0xf0]  ;;  %v4695_v23 = vld [vmem:[#allocation8 + $0x758] sm:$0xf0]  ;;  %v6776_v39 = vor.u32 %v5199_v36, %v4895_v51 }
 0x2b1   : > { %2825 = vmatpush.bf16.msrb.mxu2 %v6730_v15  ;;  %2838 = vmatpush.bf16.msrb.mxu3 %v6732_v3  ;;  %7837 = vst [vmem:[#allocation250_spill] sm:$0xff] %v6754_v25  ;;  %v6756_v15 = vor.u32 %v5169_v19, %v4775_v18  ;;  %v5151_v3 = vld [vmem:[#allocation8 + $0x764] sm:$0xf]  ;;  %v6770_v19 = vor.u32 %v5167_v27, %v4767_v31  ;;  %v5165_v53 = vld [vmem:[#allocation8 + $0x7d4] sm:$0xf] }
 0x2b2   : > { %2851 = vmatpush.bf16.msra.mxu0 %v6738_v40  ;;  %7840 = vst [vmem:[#allocation253_spill] sm:$0xff] %v6760_v14  ;;  %v6768_v18 = vor.u32 %v5151_v3, %v4703_v44  ;;  %v6774_v43 = vor.u32 %v5183_v48, %v4831_v38  ;;  %v4759_v11 = vld [vmem:[#allocation8 + $0x7d8] sm:$0xf0]  ;;  %v5181_v6 = vld [vmem:[#allocation8 + $0x854] sm:$0xf]  ;;  %v6784_v48 = vor.u32 %v5149_v9, %v4695_v23 }
 0x2b3   : > { %2864 = vmatpush.bf16.msra.mxu1 %v6740_v10  ;;  %7838 = vst [vmem:[#allocation251_spill] sm:$0xff] %v6756_v15  ;;  %v4823_v3 = vld [vmem:[#allocation8 + $0x858] sm:$0xf0]  ;;  %v5197_v31 = vld [vmem:[#allocation8 + $0x8d4] sm:$0xf]  ;;  %v6786_v27 = vor.u32 %v5165_v53, %v4759_v11 }
 0x2b4   : > { %7841 = vst [vmem:[#allocation254_spill] sm:$0xff] %v6768_v18  ;;  %v4887_v44 = vld [vmem:[#allocation8 + $0x8d8] sm:$0xf0]  ;;  %v5147_v38 = vld [vmem:[#allocation8 + $0x744] sm:$0xf] }
 0x2b5   : > { %2826 = vmatpush.bf16.msrb.mxu2 %v6744_v37  ;;  %2839 = vmatpush.bf16.msrb.mxu3 %v6746_v60  ;;  %7842 = vst [vmem:[#allocation255_spill] sm:$0xff] %v6770_v19  ;;  %v4687_v36 = vld [vmem:[#allocation8 + $0x748] sm:$0xf0]  ;;  %v5179_v51 = vld [vmem:[#allocation8 + $0x844] sm:$0xf] }
 0x2b6   : > { %2852 = vmatpush.bf16.msra.mxu0 %v6750_v45  ;;  %7843 = vst [vmem:[#allocation256_spill] sm:$0xff] %v6774_v43  ;;  %v6796_v53 = vor.u32 %v5147_v38, %v4687_v36 }
 0x2b7   : > { %2865 = vmatpush.bf16.msra.mxu1 %v6752_v12  ;;  %7844 = vst [vmem:[#allocation257_spill] sm:$0xff] %v6776_v39  ;;  %v2659_v23 = vpop.f32.mrf.mxu1 }
 0x2b8   : > { %2827 = vmatmul.bf16.vlgmr.msrb.gmra.mxu2 %v6230_v35  ;;  %2840 = vmatmul.bf16.vlgmr.msrb.gmra.mxu3 %v6244_v28  ;;  %7845 = vst [vmem:[#allocation258_spill] sm:$0xff] %v6784_v48  ;;  %v6790_v35 = vor.u32 %v5181_v6, %v4823_v3  ;;  %v6792_v28 = vor.u32 %v5197_v31, %v4887_v44  ;;  %v2646_v9 = vpop.f32.mrf.mxu0  ;;  %v5145_v6 = vld [vmem:[#allocation8 + $0x734] sm:$0xf]  ;;  %v4679_v3 = vld [vmem:[#allocation8 + $0x738] sm:$0xf0] }
 0x2b9   : > { %2871 = vmatpush.bf16.msra.mxu2 %v6754_v25  ;;  %2884 = vmatpush.bf16.msra.mxu3 %v6756_v15  ;;  %7846 = vst [vmem:[#allocation259_spill] sm:$0xff] %v6786_v27  ;;  %v4871_v15 = vld [vmem:[#allocation8 + $0x8b8] sm:$0xf0]  ;;  %v6808_v38 = vor.u32 %v5145_v6, %v4679_v3  ;;  %v4799_v3 = vld [vmem:[#allocation8 + $0x828] sm:$0xf0] }
 0x2ba   : > { %2897 = vmatpush.bf16.msrb.mxu0 %v6758_v62  ;;  %2866 = vmatmul.bf16.vlgmr.msra.gmra.mxu1 %v6352_v24  ;;  %7847 = vst [vmem:[#allocation260_spill] sm:$0xff] %v6790_v35  ;;  %v4751_v24 = vld [vmem:[#allocation8 + $0x7c8] sm:$0xf0]  ;;  %v5193_v62 = vld [vmem:[#allocation8 + $0x8b4] sm:$0xf] }
 0x2bb   : > { %2910 = vmatpush.bf16.msrb.mxu1 %v6760_v14  ;;  %2853 = vmatmul.bf16.vlgmr.msra.gmra.mxu0 %v6346_v20  ;;  %7848 = vst [vmem:[#allocation261_spill] sm:$0xff] %v6792_v28  ;;  %v5163_v20 = vld [vmem:[#allocation8 + $0x7c4] sm:$0xf]  ;;  %v4727_v25 = vld [vmem:[#allocation8 + $0x798] sm:$0xf0] }
 0x2bc   : > { %v5195_v14 = vld [vmem:[#allocation8 + $0x8c4] sm:$0xf]  ;;  %7849 = vst [vmem:[#allocation262_spill] sm:$0xff] %v6796_v53  ;;  %v6798_v11 = vor.u32 %v5163_v20, %v4751_v24  ;;  %v4671_v24 = vld [vmem:[#allocation8 + $0x728] sm:$0xf0] }
 0x2bd   : > { %2872 = vmatpush.bf16.msra.mxu2 %v6768_v18  ;;  %2885 = vmatpush.bf16.msra.mxu3 %v6770_v19  ;;  %v4815_v18 = vld [vmem:[#allocation8 + $0x848] sm:$0xf0]  ;;  %7853 = vst [vmem:[#allocation266_spill] sm:$0xff] %v6808_v38  ;;  %v5143_v20 = vld [vmem:[#allocation8 + $0x724] sm:$0xf] }
 0x2be   : > { %2898 = vmatpush.bf16.msrb.mxu0 %v6774_v43  ;;  %v4879_v19 = vld [vmem:[#allocation8 + $0x8c8] sm:$0xf0]  ;;  %7850 = vst [vmem:[#allocation263_spill] sm:$0xff] %v6798_v11  ;;  %v6802_v31 = vor.u32 %v5179_v51, %v4815_v18  ;;  %v5177_v43 = vld [vmem:[#allocation8 + $0x834] sm:$0xf]  ;;  %v6816_v18 = vor.u32 %v5193_v62, %v4871_v15  ;;  %v2633_v51 = vpop.f32.mrf.mxu3 }
 0x2bf   : > { %2911 = vmatpush.bf16.msrb.mxu1 %v6776_v39  ;;  %v6804_v44 = vor.u32 %v5195_v14, %v4879_v19  ;;  %v5161_v39 = vld [vmem:[#allocation8 + $0x7b4] sm:$0xf]  ;;  %v2620_v19 = vpop.f32.mrf.mxu2 }
 0x2c0   : > { %7851 = vst [vmem:[#allocation264_spill] sm:$0xff] %v6802_v31  ;;  %v2621_v6 = vadd.f32 %v2620_v19, %v6734_v5  ;;  %v5141_v62 = vld [vmem:[#allocation8 + $0x714] sm:$0xf] }
 0x2c1   : > { %2873 = vmatpush.bf16.msra.mxu2 %v6784_v48  ;;  %2886 = vmatpush.bf16.msra.mxu3 %v6786_v27  ;;  %7852 = vst [vmem:[#allocation265_spill] sm:$0xff] %v6804_v44  ;;  %v4743_v48 = vld [vmem:[#allocation8 + $0x7b8] sm:$0xf0] }
 0x2c2   : > { %2899 = vmatpush.bf16.msrb.mxu0 %v6790_v35  ;;  %v4807_v27 = vld [vmem:[#allocation8 + $0x838] sm:$0xf0]  ;;  %v6810_v36 = vor.u32 %v5161_v39, %v4743_v48  ;;  %v5175_v35 = vld [vmem:[#allocation8 + $0x824] sm:$0xf]  ;;  %v4863_v48 = vld [vmem:[#allocation8 + $0x8a8] sm:$0xf0] }
 0x2c3   : > { %2912 = vmatpush.bf16.msrb.mxu1 %v6792_v28  ;;  %v6814_v14 = vor.u32 %v5177_v43, %v4807_v27  ;;  %v5159_v28 = vld [vmem:[#allocation8 + $0x7a4] sm:$0xf]  ;;  %v2661_v43 = vpop.f32.mrf.mxu1  ;;  %v6821_v27 = vor.u32 %v5143_v20, %v4671_v24  ;;  %v6827_v5 = vor.u32 %v5175_v35, %v4799_v3  ;;  %v4855_v20 = vld [vmem:[#allocation8 + $0x898] sm:$0xf0]  ;;  %v4655_v35 = vld [vmem:[#allocation8 + $0x708] sm:$0xf0] }
 0x2c4   : > { %7854 = vst [vmem:[#allocation267_spill] sm:$0xff] %v6810_v36  ;;  %v5191_v39 = vld [vmem:[#allocation8 + $0x8a4] sm:$0xf] }
 0x2c5   : > { %2874 = vmatpush.bf16.msra.mxu2 %v6796_v53  ;;  %2887 = vmatpush.bf16.msra.mxu3 %v6798_v11  ;;  %v4735_v53 = vld [vmem:[#allocation8 + $0x7a8] sm:$0xf0]  ;;  %7855 = vst [vmem:[#allocation268_spill] sm:$0xff] %v6821_v27  ;;  %v4663_v11 = vld [vmem:[#allocation8 + $0x718] sm:$0xf0]  ;;  %v6829_v19 = vor.u32 %v5191_v39, %v4863_v48 }
 0x2c6   : > { %2900 = vmatpush.bf16.msrb.mxu0 %v6802_v31  ;;  %v2634_v31 = vadd.f32 %v2633_v51, %v2621_v6  ;;  %v6823_v15 = vor.u32 %v5159_v28, %v4735_v53  ;;  %v5189_v6 = vld [vmem:[#allocation8 + $0x894] sm:$0xf]  ;;  %v6833_v28 = vor.u32 %v5141_v62, %v4663_v11  ;;  %v5139_v24 = vld [vmem:[#allocation8 + $0x704] sm:$0xf]  ;;  %v2635_v48 = vpop.f32.mrf.mxu3  ;;  %v4783_v11 = vld [vmem:[#allocation8 + $0x808] sm:$0xf0] }
 0x2c7   : > { %2913 = vmatpush.bf16.msrb.mxu1 %v6804_v44  ;;  %v2648_v44 = vpop.f32.mrf.mxu0  ;;  %v5155_v43 = vld [vmem:[#allocation8 + $0x784] sm:$0xf]  ;;  %v7871_v48 = vld [vmem:[#allocation31_spill] sm:$0xff] }
 0x2c8   : > { %7856 = vst [vmem:[#allocation269_spill] sm:$0xff] %v6823_v15  ;;  %v2647_v51 = vadd.f32 %v2646_v9, %v2634_v31  ;;  %v4791_v44 = vld [vmem:[#allocation8 + $0x818] sm:$0xf0]  ;;  %v6841_v9 = vor.u32 %v5189_v6, %v4855_v20  ;;  %v2622_v31 = vpop.f32.mrf.mxu2  ;;  %v5187_v62 = vld [vmem:[#allocation8 + $0x884] sm:$0xf] }
 0x2c9   : > { %2875 = vmatpush.bf16.msra.mxu2 %v6808_v38  ;;  %2888 = vmatpush.bf16.msra.mxu3 %v6810_v36  ;;  %v5157_v38 = vld [vmem:[#allocation8 + $0x794] sm:$0xf]  ;;  %v7869_v6 = vld [vmem:[#allocation68_spill] sm:$0xff] }
 0x2ca   : > { %2901 = vmatpush.bf16.msrb.mxu0 %v6814_v14  ;;  %v5173_v36 = vld [vmem:[#allocation8 + $0x814] sm:$0xf]  ;;  %v6835_v53 = vor.u32 %v5157_v38, %v4727_v25  ;;  %v2660_v3 = vadd.f32 %v2659_v23, %v2647_v51  ;;  %v4847_v25 = vld [vmem:[#allocation8 + $0x888] sm:$0xf0]  ;;  %v6845_v23 = vor.u32 %v5139_v24, %v4655_v35  ;;  %v2932_v20 = vunpack.c.l.b16 %v7869_v6  ;;  %v7870_v35 = vld [vmem:[#allocation69_spill] sm:$0xff] }
 0x2cb   : > { %2914 = vmatpush.bf16.msrb.mxu1 %v6816_v18  ;;  %v6839_v39 = vor.u32 %v5173_v36, %v4791_v44  ;;  %v6853_v51 = vor.u32 %v5187_v62, %v4847_v25  ;;  %v7868_v44 = vld [vmem:[#allocation30_spill] sm:$0xff]  ;;  %v2933_v24 = vunpack.c.h.b16 %v7869_v6  ;;  %v2935_v31 = vunpack.c.h.b16 %v7870_v35  ;;  %v7875_v25 = vld [vmem:[#allocation35_spill] sm:$0xff] }
 0x2cc   : > { %v7874_v62 = vld [vmem:[#allocation34_spill] sm:$0xff] }
 0x2cd   : > { %2876 = vmatpush.bf16.msra.mxu2 %v6821_v27  ;;  %2889 = vmatpush.bf16.msra.mxu3 %v6823_v15  ;;  %v4719_v27 = vld [vmem:[#allocation8 + $0x788] sm:$0xf0]  ;;  %v5171_v15 = vld [vmem:[#allocation8 + $0x804] sm:$0xf] }
 0x2ce   : > { %2902 = vmatpush.bf16.msrb.mxu0 %v6827_v5  ;;  %v6847_v38 = vor.u32 %v5155_v43, %v4719_v27  ;;  %v6851_v36 = vor.u32 %v5171_v15, %v4783_v11  ;;  %v7866_v27 = vld [vmem:[#allocation28_spill] sm:$0xff]  ;;  %v7867_v15 = vld [vmem:[#allocation29_spill] sm:$0xff] }
 0x2cf   : > { %2915 = vmatpush.bf16.msrb.mxu1 %v6829_v19  ;;  %v7872_v43 = vld [vmem:[#allocation32_spill] sm:$0xff]  ;;  %v7873_v11 = vld [vmem:[#allocation33_spill] sm:$0xff] }
 0x2d1   : > { %2877 = vmatpush.bf16.msra.mxu2 %v6833_v28  ;;  %2890 = vmatpush.bf16.msra.mxu3 %v6835_v53 }
 0x2d2   : > { %2903 = vmatpush.bf16.msrb.mxu0 %v6839_v39 }
 0x2d3   : > { %2916 = vmatpush.bf16.msrb.mxu1 %v6841_v9 }
 0x2d5   : > { %2878 = vmatpush.bf16.msra.mxu2 %v6845_v23  ;;  %2891 = vmatpush.bf16.msra.mxu3 %v6847_v38 }
 0x2d6   : > { %2904 = vmatpush.bf16.msrb.mxu0 %v6851_v36 }
 0x2d7   : > { %2917 = vmatpush.bf16.msrb.mxu1 %v6853_v51 }
 0x2d8   : > { %2879 = vmatmul.bf16.vlgmr.msra.gmra.mxu2 %v6340_v55  ;;  %2892 = vmatmul.bf16.vlgmr.msra.gmra.mxu3 %v6360_v4  ;;  %v7864_v55 = vld [vmem:[#allocation26_spill] sm:$0xff] }
 0x2d9   : > { %2986 = vmatpush.bf16.msrb.mxu2 %v5779_v47  ;;  %2999 = vmatpush.bf16.msrb.mxu3 %v5781_v52  ;;  %v2698_v47 = vpop.f32.mrf.mxu0  ;;  %v2711_v52 = vpop.f32.mrf.mxu1 }
 0x2da   : > { %3012 = vmatpush.bf16.msra.mxu0 %v5784_v56  ;;  %2918 = vmatmul.bf16.vlgmr.msrb.gmra.mxu1 %v6462_v49  ;;  %v2712_v56 = vadd.f32 %v2711_v52, %v2698_v47  ;;  %v7865_v49 = vld [vmem:[#allocation27_spill] sm:$0xff]  ;;  %v7876_v47 = vld [vmem:[#allocation36_spill] sm:$0xff]  ;;  %v6903_v52 = vpack.c.b16 %v2932_v20, %v2932_v20 }
 0x2db   : > { %3025 = vmatpush.bf16.msra.mxu1 %v5786_v57  ;;  %2905 = vmatmul.bf16.vlgmr.msrb.gmra.mxu0 %v6456_v50  ;;  %v2672_v57 = vpop.f32.mrf.mxu2 }
 0x2dd   : > { %2987 = vmatpush.bf16.msrb.mxu2 %v5789_v61  ;;  %3000 = vmatpush.bf16.msrb.mxu3 %v5793_v1  ;;  %v2685_v61 = vpop.f32.mrf.mxu3  ;;  %v2673_v1 = vadd.f32 %v2672_v57, %v2660_v3  ;;  %v2934_v3 = vunpack.c.l.b16 %v7870_v35  ;;  %v6905_v57 = vpack.c.b16 %v2933_v24, %v2933_v24  ;;  %v7891_v35 = vld [vmem:[#allocation51_spill] sm:$0xff] }
 0x2de   : > { %3013 = vmatpush.bf16.msra.mxu0 %v5795_v2  ;;  %v7857_v2 = vld [vmem:[#allocation19_spill] sm:$0xff] }
 0x2df   : > { %3026 = vmatpush.bf16.msra.mxu1 %v5797_v7  ;;  %v7858_v7 = vld [vmem:[#allocation20_spill] sm:$0xff] }
 0x2e1   : > { %2988 = vmatpush.bf16.msrb.mxu2 %v5800_v13  ;;  %3001 = vmatpush.bf16.msrb.mxu3 %v5803_v17  ;;  %v6881_v13 = vadd.f32 %v2685_v61, %v2673_v1  ;;  %v2700_v17 = vpop.f32.mrf.mxu0  ;;  %v7877_v61 = vld [vmem:[#allocation37_spill] sm:$0xff]  ;;  %v7878_v1 = vld [vmem:[#allocation38_spill] sm:$0xff] }
 0x2e2   : > { %3014 = vmatpush.bf16.msra.mxu0 %v5807_v21  ;;  %v2713_v21 = vpop.f32.mrf.mxu1  ;;  %v7879_v17 = vld [vmem:[#allocation39_spill] sm:$0xff] }
 0x2e3   : > { %3027 = vmatpush.bf16.msra.mxu1 %v5809_v22  ;;  %v7859_v22 = vld [vmem:[#allocation21_spill] sm:$0xff]  ;;  %v2674_v4 = vpop.f32.mrf.mxu2  ;;  %v7880_v21 = vld [vmem:[#allocation40_spill] sm:$0xff] }
 0x2e4   : > { %v7885_v4 = vld [vmem:[#allocation45_spill] sm:$0xff] }
 0x2e5   : > { %2989 = vmatpush.bf16.msrb.mxu2 %v5812_v29  ;;  %3002 = vmatpush.bf16.msrb.mxu3 %v5815_v30  ;;  %v7860_v29 = vld [vmem:[#allocation22_spill] sm:$0xff]  ;;  %v7861_v30 = vld [vmem:[#allocation23_spill] sm:$0xff]  ;;  %v2687_v50 = vpop.f32.mrf.mxu3 }
 0x2e6   : > { %3015 = vmatpush.bf16.msra.mxu0 %v5822_v32  ;;  %v7862_v32 = vld [vmem:[#allocation24_spill] sm:$0xff]  ;;  %v7886_v50 = vld [vmem:[#allocation46_spill] sm:$0xff] }
 0x2e7   : > { %3028 = vmatpush.bf16.msra.mxu1 %v5824_v33  ;;  %v7863_v33 = vld [vmem:[#allocation25_spill] sm:$0xff] }
 0x2e9   : > { %2990 = vmatpush.bf16.msrb.mxu2 %v7857_v2  ;;  %3003 = vmatpush.bf16.msrb.mxu3 %v7858_v7  ;;  %v6909_v2 = vpack.c.b16 %v2934_v3, %v2934_v3  ;;  %v6911_v7 = vpack.c.b16 %v2935_v31, %v2935_v31  ;;  %v7892_v3 = vld [vmem:[#allocation52_spill] sm:$0xff] }
 0x2ea   : > { %3016 = vmatpush.bf16.msra.mxu0 %v7859_v22  ;;  %v7881_v22 = vld [vmem:[#allocation41_spill] sm:$0xff] }
 0x2eb   : > { %3029 = vmatpush.bf16.msra.mxu1 %v7860_v29  ;;  %v7882_v29 = vld [vmem:[#allocation42_spill] sm:$0xff] }
 0x2ed   : > { %2991 = vmatpush.bf16.msrb.mxu2 %v7861_v30  ;;  %3004 = vmatpush.bf16.msrb.mxu3 %v7862_v32  ;;  %v7883_v30 = vld [vmem:[#allocation43_spill] sm:$0xff]  ;;  %v7884_v32 = vld [vmem:[#allocation44_spill] sm:$0xff] }
 0x2ee   : > { %3017 = vmatpush.bf16.msra.mxu0 %v7863_v33 }
 0x2ef   : > { %3030 = vmatpush.bf16.msra.mxu1 %v7864_v55 }
 0x2f1   : > { %2992 = vmatpush.bf16.msrb.mxu2 %v7865_v49  ;;  %3005 = vmatpush.bf16.msrb.mxu3 %v7866_v27  ;;  %v7887_v49 = vld [vmem:[#allocation47_spill] sm:$0xff]  ;;  %v7888_v27 = vld [vmem:[#allocation48_spill] sm:$0xff] }
 0x2f2   : > { %3018 = vmatpush.bf16.msra.mxu0 %v7867_v15  ;;  %v7889_v15 = vld [vmem:[#allocation49_spill] sm:$0xff] }
 0x2f3   : > { %3031 = vmatpush.bf16.msra.mxu1 %v7868_v44  ;;  %v7890_v44 = vld [vmem:[#allocation50_spill] sm:$0xff] }
 0x2f5   : > { %2993 = vmatpush.bf16.msrb.mxu2 %v7871_v48  ;;  %3006 = vmatpush.bf16.msrb.mxu3 %v7872_v43 }
 0x2f6   : > { %3019 = vmatpush.bf16.msra.mxu0 %v7873_v11  ;;  %v7893_v11 = vld [vmem:[#allocation53_spill] sm:$0xff] }
 0x2f7   : > { %3032 = vmatpush.bf16.msra.mxu1 %v7874_v62  ;;  %v2763_v55 = vpop.f32.mrf.mxu1  ;;  %v7894_v62 = vld [vmem:[#allocation54_spill] sm:$0xff] }
 0x2f8   : > { %2994 = vmatmul.bf16.vlgmr.msrb.gmra.mxu2 %v6903_v52  ;;  %3007 = vmatmul.bf16.vlgmr.msrb.gmra.mxu3 %v6905_v57  ;;  %v2750_v33 = vpop.f32.mrf.mxu0 }
 0x2f9   : > { %3038 = vmatpush.bf16.msra.mxu2 %v7875_v25  ;;  %3051 = vmatpush.bf16.msra.mxu3 %v7876_v47  ;;  %v7895_v47 = vld [vmem:[#allocation55_spill] sm:$0xff] }
 0x2fa   : > { %3064 = vmatpush.bf16.msrb.mxu0 %v7877_v61  ;;  %3033 = vmatmul.bf16.vlgmr.msra.gmra.mxu1 %v6911_v7  ;;  %v7896_v61 = vld [vmem:[#allocation56_spill] sm:$0xff] }
 0x2fb   : > { %3077 = vmatpush.bf16.msrb.mxu1 %v7878_v1  ;;  %3020 = vmatmul.bf16.vlgmr.msra.gmra.mxu0 %v6909_v2  ;;  %v2724_v6 = vpop.f32.mrf.mxu2  ;;  %v2737_v20 = vpop.f32.mrf.mxu3 }
 0x2fc   : > { %v2725_v24 = vadd.f32 %v2724_v6, %v2712_v56  ;;  %v7898_v56 = vld [vmem:[#allocation58_spill] sm:$0xff]  ;;  %v7906_v6 = vld [vmem:[#allocation64_spill] sm:$0xff] }
 0x2fd   : > { %3039 = vmatpush.bf16.msra.mxu2 %v7879_v17  ;;  %3052 = vmatpush.bf16.msra.mxu3 %v7880_v21  ;;  %v7897_v17 = vld [vmem:[#allocation57_spill] sm:$0xff] }
 0x2fe   : > { %3065 = vmatpush.bf16.msrb.mxu0 %v7881_v22  ;;  %v2738_v31 = vadd.f32 %v2737_v20, %v2725_v24  ;;  %v7907_v20 = vld [vmem:[#allocation65_spill] sm:$0xff]  ;;  %v7908_v24 = vld [vmem:[#allocation66_spill] sm:$0xff] }
 0x2ff   : > { %3078 = vmatpush.bf16.msrb.mxu1 %v7882_v29  ;;  %v2765_v43 = vpop.f32.mrf.mxu1  ;;  %v7899_v29 = vld [vmem:[#allocation59_spill] sm:$0xff] }
 0x300   : > { %v2752_v48 = vpop.f32.mrf.mxu0  ;;  %v2751_v25 = vadd.f32 %v2750_v33, %v2738_v31  ;;  %v7903_v33 = vld [vmem:[#allocation75_spill] sm:$0xff]  ;;  %v7911_v43 = vld [vmem:[#allocation72_spill] sm:$0xff] }
 0x301   : > { %3040 = vmatpush.bf16.msra.mxu2 %v7883_v30  ;;  %3053 = vmatpush.bf16.msra.mxu3 %v7884_v32  ;;  %v7900_v30 = vld [vmem:[#allocation60_spill] sm:$0xff]  ;;  %v7901_v32 = vld [vmem:[#allocation61_spill] sm:$0xff] }
 0x302   : > { %3066 = vmatpush.bf16.msrb.mxu0 %v7885_v4  ;;  %v2764_v1 = vadd.f32 %v2763_v55, %v2751_v25  ;;  %v7902_v4 = vld [vmem:[#allocation62_spill] sm:$0xff] }
 0x303   : > { %3079 = vmatpush.bf16.msrb.mxu1 %v7886_v50  ;;  %v2726_v21 = vpop.f32.mrf.mxu2  ;;  %v2739_v22 = vpop.f32.mrf.mxu3  ;;  %v2936_v50 = vunpack.c.l.b16 %v7903_v33 }
 0x304   : > { %v7917_v21 = vld [vmem:[#allocation80_spill] sm:$0xff]  ;;  %v7918_v22 = vld [vmem:[#allocation81_spill] sm:$0xff] }
 0x305   : > { %3041 = vmatpush.bf16.msra.mxu2 %v7887_v49  ;;  %3054 = vmatpush.bf16.msra.mxu3 %v7888_v27  ;;  %v2937_v49 = vunpack.c.h.b16 %v7903_v33  ;;  %v7904_v27 = vld [vmem:[#allocation78_spill] sm:$0xff]  ;;  %v6951_v31 = vpack.c.b16 %v2936_v50, %v2936_v50  ;;  %v7921_v33 = vld [vmem:[#allocation85_spill] sm:$0xff] }
 0x306   : > { %3067 = vmatpush.bf16.msrb.mxu0 %v7889_v15  ;;  %v2938_v55 = vunpack.c.l.b16 %v7904_v27  ;;  %v2939_v15 = vunpack.c.h.b16 %v7904_v27  ;;  %v7922_v50 = vld [vmem:[#allocation86_spill] sm:$0xff]  ;;  %v7924_v27 = vld [vmem:[#allocation88_spill] sm:$0xff] }
 0x307   : > { %3080 = vmatpush.bf16.msrb.mxu1 %v7890_v44  ;;  %v7905_v44 = vld [vmem:[#allocation63_spill] sm:$0xff]  ;;  %v6953_v48 = vpack.c.b16 %v2937_v49, %v2937_v49 }
 0x308   : > { %v6959_v25 = vpack.c.b16 %v2939_v15, %v2939_v15  ;;  %v7923_v49 = vld [vmem:[#allocation87_spill] sm:$0xff] }
 0x309   : > { %3042 = vmatpush.bf16.msra.mxu2 %v7891_v35  ;;  %3055 = vmatpush.bf16.msra.mxu3 %v7892_v3  ;;  %v7909_v35 = vld [vmem:[#allocation70_spill] sm:$0xff]  ;;  %v7910_v3 = vld [vmem:[#allocation71_spill] sm:$0xff] }
 0x30a   : > { %3068 = vmatpush.bf16.msrb.mxu0 %v7893_v11  ;;  %v7912_v11 = vld [vmem:[#allocation73_spill] sm:$0xff] }
 0x30b   : > { %3081 = vmatpush.bf16.msrb.mxu1 %v7894_v62  ;;  %v6957_v62 = vpack.c.b16 %v2938_v55, %v2938_v55 }
 0x30d   : > { %3043 = vmatpush.bf16.msra.mxu2 %v7895_v47  ;;  %3056 = vmatpush.bf16.msra.mxu3 %v7896_v61  ;;  %v7913_v47 = vld [vmem:[#allocation74_spill] sm:$0xff]  ;;  %v7914_v61 = vld [vmem:[#allocation76_spill] sm:$0xff] }
 0x30e   : > { %3069 = vmatpush.bf16.msrb.mxu0 %v7897_v17  ;;  %v7915_v17 = vld [vmem:[#allocation77_spill] sm:$0xff] }
 0x30f   : > { %3082 = vmatpush.bf16.msrb.mxu1 %v7898_v56  ;;  %v7916_v56 = vld [vmem:[#allocation79_spill] sm:$0xff] }
 0x311   : > { %3044 = vmatpush.bf16.msra.mxu2 %v7899_v29  ;;  %3057 = vmatpush.bf16.msra.mxu3 %v7900_v30 }
 0x312   : > { %3070 = vmatpush.bf16.msrb.mxu0 %v7901_v32  ;;  %v7919_v32 = vld [vmem:[#allocation82_spill] sm:$0xff] }
 0x313   : > { %3083 = vmatpush.bf16.msrb.mxu1 %v7902_v4  ;;  %v7920_v4 = vld [vmem:[#allocation83_spill] sm:$0xff] }
 0x315   : > { %3045 = vmatpush.bf16.msra.mxu2 %v7905_v44  ;;  %3058 = vmatpush.bf16.msra.mxu3 %v7906_v6  ;;  %v7925_v6 = vld [vmem:[#allocation89_spill] sm:$0xff] }
 0x316   : > { %3071 = vmatpush.bf16.msrb.mxu0 %v7907_v20  ;;  %v7926_v20 = vld [vmem:[#allocation90_spill] sm:$0xff] }
 0x317   : > { %3084 = vmatpush.bf16.msrb.mxu1 %v7908_v24  ;;  %v2815_v30 = vpop.f32.mrf.mxu1 }
 0x318   : > { %3046 = vmatmul.bf16.vlgmr.msra.gmra.mxu2 %v6951_v31  ;;  %3059 = vmatmul.bf16.vlgmr.msra.gmra.mxu3 %v6953_v48  ;;  %v2802_v29 = vpop.f32.mrf.mxu0 }
 0x319   : > { %3090 = vmatpush.bf16.msrb.mxu2 %v7909_v35  ;;  %3103 = vmatpush.bf16.msrb.mxu3 %v7910_v3 }
 0x31a   : > { %3116 = vmatpush.bf16.msra.mxu0 %v7911_v43  ;;  %3085 = vmatmul.bf16.vlgmr.msrb.gmra.mxu1 %v6959_v25  ;;  %v7927_v43 = vld [vmem:[#allocation91_spill] sm:$0xff] }
 0x31b   : > { %3129 = vmatpush.bf16.msra.mxu1 %v7912_v11  ;;  %3072 = vmatmul.bf16.vlgmr.msrb.gmra.mxu0 %v6957_v62  ;;  %v2776_v55 = vpop.f32.mrf.mxu2  ;;  %v2789_v15 = vpop.f32.mrf.mxu3  ;;  %v7928_v11 = vld [vmem:[#allocation92_spill] sm:$0xff] }
 0x31c   : > { %v2777_v44 = vadd.f32 %v2776_v55, %v2764_v1  ;;  %v7936_v55 = vld [vmem:[#allocation101_spill] sm:$0xff] }
 0x31d   : > { %3091 = vmatpush.bf16.msrb.mxu2 %v7913_v47  ;;  %3104 = vmatpush.bf16.msrb.mxu3 %v7914_v61  ;;  %v7929_v61 = vld [vmem:[#allocation93_spill] sm:$0xff] }
 0x31e   : > { %3117 = vmatpush.bf16.msra.mxu0 %v7915_v17  ;;  %v2790_v24 = vadd.f32 %v2789_v15, %v2777_v44  ;;  %v7930_v17 = vld [vmem:[#allocation94_spill] sm:$0xff]  ;;  %v7938_v15 = vld [vmem:[#allocation103_spill] sm:$0xff]  ;;  %v7939_v44 = vld [vmem:[#allocation105_spill] sm:$0xff] }
 0x31f   : > { %3130 = vmatpush.bf16.msra.mxu1 %v7916_v56  ;;  %v2817_v3 = vpop.f32.mrf.mxu1 }
 0x320   : > { %v2804_v35 = vpop.f32.mrf.mxu0  ;;  %v2803_v47 = vadd.f32 %v2802_v29, %v2790_v24  ;;  %v7934_v29 = vld [vmem:[#allocation98_spill] sm:$0xff]  ;;  %v7942_v24 = vld [vmem:[#allocation107_spill] sm:$0xff] }
 0x321   : > { %3092 = vmatpush.bf16.msrb.mxu2 %v7917_v21  ;;  %3105 = vmatpush.bf16.msrb.mxu3 %v7918_v22  ;;  %v7931_v21 = vld [vmem:[#allocation96_spill] sm:$0xff] }
 0x322   : > { %3118 = vmatpush.bf16.msra.mxu0 %v7919_v32  ;;  %v2816_v56 = vadd.f32 %v2815_v30, %v2803_v47  ;;  %v7932_v32 = vld [vmem:[#allocation99_spill] sm:$0xff]  ;;  %v7943_v35 = vld [vmem:[#allocation108_spill] sm:$0xff]  ;;  %v7945_v47 = vld [vmem:[#allocation110_spill] sm:$0xff] }
 0x323   : > { %3131 = vmatpush.bf16.msra.mxu1 %v7920_v4  ;;  %v2778_v1 = vpop.f32.mrf.mxu2  ;;  %v2791_v22 = vpop.f32.mrf.mxu3  ;;  %v7933_v4 = vld [vmem:[#allocation100_spill] sm:$0xff] }
 0x324   : > { %v7949_v1 = vld [vmem:[#allocation114_spill] sm:$0xff] }
 0x325   : > { %3093 = vmatpush.bf16.msrb.mxu2 %v7921_v33  ;;  %3106 = vmatpush.bf16.msrb.mxu3 %v7922_v50  ;;  %v2940_v33 = vunpack.c.l.b16 %v7934_v29  ;;  %v2941_v50 = vunpack.c.h.b16 %v7934_v29  ;;  %v7951_v29 = vld [vmem:[#allocation116_spill] sm:$0xff] }
 0x326   : > { %3119 = vmatpush.bf16.msra.mxu0 %v7923_v49  ;;  %v7935_v49 = vld [vmem:[#allocation95_spill] sm:$0xff] }
 0x327   : > { %3132 = vmatpush.bf16.msra.mxu1 %v7924_v27  ;;  %v2942_v30 = vunpack.c.l.b16 %v7935_v49  ;;  %v2943_v27 = vunpack.c.h.b16 %v7935_v49  ;;  %v7954_v49 = vld [vmem:[#allocation119_spill] sm:$0xff] }
 0x329   : > { %3094 = vmatpush.bf16.msrb.mxu2 %v7925_v6  ;;  %3107 = vmatpush.bf16.msrb.mxu3 %v7926_v20  ;;  %v7940_v6 = vld [vmem:[#allocation104_spill] sm:$0xff]  ;;  %v7001_v20 = vpack.c.b16 %v2941_v50, %v2941_v50  ;;  %v7005_v3 = vpack.c.b16 %v2942_v30, %v2942_v30  ;;  %v7953_v50 = vld [vmem:[#allocation118_spill] sm:$0xff] }
 0x32a   : > { %3120 = vmatpush.bf16.msra.mxu0 %v7927_v43  ;;  %v7007_v43 = vpack.c.b16 %v2943_v27, %v2943_v27  ;;  %v7955_v30 = vld [vmem:[#allocation120_spill] sm:$0xff] }
 0x32b   : > { %3133 = vmatpush.bf16.msra.mxu1 %v7928_v11  ;;  %v7944_v11 = vld [vmem:[#allocation109_spill] sm:$0xff] }
 0x32d   : > { %3095 = vmatpush.bf16.msrb.mxu2 %v7929_v61  ;;  %3108 = vmatpush.bf16.msrb.mxu3 %v7930_v17  ;;  %v7946_v61 = vld [vmem:[#allocation111_spill] sm:$0xff]  ;;  %v7947_v17 = vld [vmem:[#allocation112_spill] sm:$0xff] }
 0x32e   : > { %3121 = vmatpush.bf16.msra.mxu0 %v7931_v21  ;;  %v7948_v21 = vld [vmem:[#allocation113_spill] sm:$0xff] }
 0x32f   : > { %3134 = vmatpush.bf16.msra.mxu1 %v6176_v0  ;;  %v7937_v0 = vld [vmem:[#allocation102_spill] sm:$0xff] }
 0x331   : > { %3096 = vmatpush.bf16.msrb.mxu2 %v7932_v32  ;;  %3109 = vmatpush.bf16.msrb.mxu3 %v7933_v4  ;;  %v7950_v4 = vld [vmem:[#allocation115_spill] sm:$0xff] }
 0x332   : > { %3122 = vmatpush.bf16.msra.mxu0 %v6192_v63  ;;  %v7941_v63 = vld [vmem:[#allocation106_spill] sm:$0xff] }
 0x333   : > { %3135 = vmatpush.bf16.msra.mxu1 %v6199_v34  ;;  %v6999_v34 = vpack.c.b16 %v2940_v33, %v2940_v33  ;;  %v7952_v33 = vld [vmem:[#allocation117_spill] sm:$0xff] }
 0x335   : > { %3097 = vmatpush.bf16.msrb.mxu2 %v7936_v55  ;;  %3110 = vmatpush.bf16.msrb.mxu3 %v7937_v0 }
 0x336   : > { %3123 = vmatpush.bf16.msra.mxu0 %v7938_v15  ;;  %v7956_v15 = vld [vmem:[#allocation121_spill] sm:$0xff] }
 0x337   : > { %3136 = vmatpush.bf16.msra.mxu1 %v7939_v44  ;;  %v2867_v32 = vpop.f32.mrf.mxu1  ;;  %v7957_v44 = vld [vmem:[#allocation122_spill] sm:$0xff] }
 0x338   : > { %3098 = vmatmul.bf16.vlgmr.msrb.gmra.mxu2 %v6999_v34  ;;  %3111 = vmatmul.bf16.vlgmr.msrb.gmra.mxu3 %v7001_v20  ;;  %v2854_v22 = vpop.f32.mrf.mxu0 }
 0x339   : > { %3142 = vmatpush.bf16.msra.mxu2 %v7940_v6  ;;  %3155 = vmatpush.bf16.msra.mxu3 %v7941_v63 }
 0x33a   : > { %3168 = vmatpush.bf16.msrb.mxu0 %v7942_v24  ;;  %3137 = vmatmul.bf16.vlgmr.msra.gmra.mxu1 %v7007_v43 }
 0x33b   : > { %3181 = vmatpush.bf16.msrb.mxu1 %v7943_v35  ;;  %3124 = vmatmul.bf16.vlgmr.msra.gmra.mxu0 %v7005_v3  ;;  %v2828_v27 = vpop.f32.mrf.mxu2  ;;  %v2841_v55 = vpop.f32.mrf.mxu3  ;;  %v7958_v35 = vld [vmem:[#allocation123_spill] sm:$0xff] }
 0x33c   : > { %v2829_v0 = vadd.f32 %v2828_v27, %v2816_v56  ;;  %v7963_v56 = vld [vmem:[#allocation128_spill] sm:$0xff] }
 0x33d   : > { %3143 = vmatpush.bf16.msra.mxu2 %v7944_v11  ;;  %3156 = vmatpush.bf16.msra.mxu3 %v7945_v47  ;;  %v7959_v11 = vld [vmem:[#allocation124_spill] sm:$0xff] }
 0x33e   : > { %3169 = vmatpush.bf16.msrb.mxu0 %v7946_v61  ;;  %v2842_v6 = vadd.f32 %v2841_v55, %v2829_v0  ;;  %v7960_v61 = vld [vmem:[#allocation125_spill] sm:$0xff]  ;;  %v7969_v0 = vld [vmem:[#allocation84_spill] sm:$0xff] }
 0x33f   : > { %3182 = vmatpush.bf16.msrb.mxu1 %v7947_v17  ;;  %v2869_v24 = vpop.f32.mrf.mxu1  ;;  %v7961_v17 = vld [vmem:[#allocation126_spill] sm:$0xff] }
 0x340   : > { %v2856_v63 = vpop.f32.mrf.mxu0  ;;  %v2855_v47 = vadd.f32 %v2854_v22, %v2842_v6  ;;  %v7968_v22 = vld [vmem:[#allocation97_spill] sm:$0xff]  ;;  %v7971_v6 = vld [vmem:[#allocation134_spill] sm:$0xff]  ;;  %v7973_v24 = vld [vmem:[#allocation136_spill] sm:$0xff] }
 0x341   : > { %3144 = vmatpush.bf16.msra.mxu2 %v7948_v21  ;;  %3157 = vmatpush.bf16.msra.mxu3 %v7949_v1  ;;  %v7962_v1 = vld [vmem:[#allocation127_spill] sm:$0xff]  ;;  %v2944_v27 = vunpack.c.l.b16 %v7968_v22  ;;  %v2945_v55 = vunpack.c.h.b16 %v7968_v22  ;;  %v7983_v22 = vld [vmem:[#allocation146_spill] sm:$0xff] }
 0x342   : > { %3170 = vmatpush.bf16.msrb.mxu0 %v7950_v4  ;;  %v2868_v21 = vadd.f32 %v2867_v32, %v2855_v47  ;;  %v2946_v32 = vunpack.c.l.b16 %v7969_v0  ;;  %v7972_v63 = vld [vmem:[#allocation135_spill] sm:$0xff] }
 0x343   : > { %3183 = vmatpush.bf16.msrb.mxu1 %v7951_v29  ;;  %v2830_v4 = vpop.f32.mrf.mxu2  ;;  %v2843_v29 = vpop.f32.mrf.mxu3  ;;  %v7047_v47 = vpack.c.b16 %v2944_v27, %v2944_v27 }
 0x344   : > { %v7978_v29 = vld [vmem:[#allocation141_spill] sm:$0xff] }
 0x345   : > { %3145 = vmatpush.bf16.msra.mxu2 %v7952_v33  ;;  %3158 = vmatpush.bf16.msra.mxu3 %v7953_v50  ;;  %v7964_v33 = vld [vmem:[#allocation129_spill] sm:$0xff]  ;;  %v7965_v50 = vld [vmem:[#allocation130_spill] sm:$0xff] }
 0x346   : > { %3171 = vmatpush.bf16.msrb.mxu0 %v7954_v49  ;;  %v7966_v49 = vld [vmem:[#allocation131_spill] sm:$0xff] }
 0x347   : > { %3184 = vmatpush.bf16.msrb.mxu1 %v7955_v30  ;;  %v7967_v30 = vld [vmem:[#allocation132_spill] sm:$0xff] }
 0x349   : > { %3146 = vmatpush.bf16.msra.mxu2 %v7956_v15  ;;  %3159 = vmatpush.bf16.msra.mxu3 %v7957_v44  ;;  %v2947_v15 = vunpack.c.h.b16 %v7969_v0  ;;  %v7970_v44 = vld [vmem:[#allocation133_spill] sm:$0xff]  ;;  %v7984_v0 = vld [vmem:[#allocation147_spill] sm:$0xff] }
 0x34a   : > { %3172 = vmatpush.bf16.msrb.mxu0 %v7958_v35  ;;  %v7974_v35 = vld [vmem:[#allocation137_spill] sm:$0xff] }
 0x34b   : > { %3185 = vmatpush.bf16.msrb.mxu1 %v7959_v11  ;;  %v7975_v11 = vld [vmem:[#allocation138_spill] sm:$0xff]  ;;  %v7055_v4 = vpack.c.b16 %v2947_v15, %v2947_v15  ;;  %v7986_v15 = vld [vmem:[#allocation149_spill] sm:$0xff] }
 0x34d   : > { %3147 = vmatpush.bf16.msra.mxu2 %v7960_v61  ;;  %3160 = vmatpush.bf16.msra.mxu3 %v7961_v17  ;;  %v7049_v61 = vpack.c.b16 %v2945_v55, %v2945_v55  ;;  %v7976_v17 = vld [vmem:[#allocation139_spill] sm:$0xff] }
 0x34e   : > { %3173 = vmatpush.bf16.msrb.mxu0 %v7962_v1  ;;  %v7977_v1 = vld [vmem:[#allocation140_spill] sm:$0xff] }
 0x34f   : > { %3186 = vmatpush.bf16.msrb.mxu1 %v7963_v56  ;;  %v7053_v56 = vpack.c.b16 %v2946_v32, %v2946_v32  ;;  %v7985_v32 = vld [vmem:[#allocation148_spill] sm:$0xff] }
 0x351   : > { %3148 = vmatpush.bf16.msra.mxu2 %v7964_v33  ;;  %3161 = vmatpush.bf16.msra.mxu3 %v7965_v50  ;;  %v7979_v33 = vld [vmem:[#allocation142_spill] sm:$0xff]  ;;  %v7980_v50 = vld [vmem:[#allocation143_spill] sm:$0xff] }
 0x352   : > { %3174 = vmatpush.bf16.msrb.mxu0 %v7966_v49  ;;  %v7981_v49 = vld [vmem:[#allocation144_spill] sm:$0xff] }
 0x353   : > { %3187 = vmatpush.bf16.msrb.mxu1 %v7967_v30  ;;  %v7982_v30 = vld [vmem:[#allocation145_spill] sm:$0xff] }
 0x355   : > { %3149 = vmatpush.bf16.msra.mxu2 %v7970_v44  ;;  %3162 = vmatpush.bf16.msra.mxu3 %v7971_v6  ;;  %v7987_v44 = vld [vmem:[#allocation150_spill] sm:$0xff]  ;;  %v7988_v6 = vld [vmem:[#allocation151_spill] sm:$0xff] }
 0x356   : > { %3175 = vmatpush.bf16.msrb.mxu0 %v7972_v63  ;;  %v7989_v63 = vld [vmem:[#allocation152_spill] sm:$0xff] }
 0x357   : > { %3188 = vmatpush.bf16.msrb.mxu1 %v7973_v24  ;;  %v2919_v55 = vpop.f32.mrf.mxu1 }
 0x358   : > { %3150 = vmatmul.bf16.vlgmr.msra.gmra.mxu2 %v7047_v47  ;;  %3163 = vmatmul.bf16.vlgmr.msra.gmra.mxu3 %v7049_v61  ;;  %v2906_v27 = vpop.f32.mrf.mxu0 }
 0x359   : > { %3194 = vmatpush.bf16.msrb.mxu2 %v7974_v35  ;;  %3207 = vmatpush.bf16.msrb.mxu3 %v7975_v11 }
 0x35a   : > { %3220 = vmatpush.bf16.msra.mxu0 %v7976_v17  ;;  %3189 = vmatmul.bf16.vlgmr.msrb.gmra.mxu1 %v7055_v4  ;;  %v7990_v17 = vld [vmem:[#allocation153_spill] sm:$0xff] }
 0x35b   : > { %3233 = vmatpush.bf16.msra.mxu1 %v7977_v1  ;;  %3176 = vmatmul.bf16.vlgmr.msrb.gmra.mxu0 %v7053_v56  ;;  %v2880_v24 = vpop.f32.mrf.mxu2  ;;  %v2893_v35 = vpop.f32.mrf.mxu3  ;;  %v7991_v1 = vld [vmem:[#allocation154_spill] sm:$0xff] }
 0x35c   : > { %v2881_v11 = vadd.f32 %v2880_v24, %v2868_v21  ;;  %v7997_v21 = vld [vmem:[#allocation160_spill] sm:$0xff]  ;;  %v7998_v24 = vld [vmem:[#allocation161_spill] sm:$0xff] }
 0x35d   : > { %3195 = vmatpush.bf16.msrb.mxu2 %v7978_v29  ;;  %3208 = vmatpush.bf16.msrb.mxu3 %v7979_v33 }
 0x35e   : > { %3221 = vmatpush.bf16.msra.mxu0 %v7980_v50  ;;  %v2894_v29 = vadd.f32 %v2893_v35, %v2881_v11  ;;  %v7999_v35 = vld [vmem:[#allocation162_spill] sm:$0xff] }
 0x35f   : > { %3234 = vmatpush.bf16.msra.mxu1 %v7981_v49  ;;  %v2921_v50 = vpop.f32.mrf.mxu1  ;;  %v7992_v49 = vld [vmem:[#allocation155_spill] sm:$0xff] }
 0x360   : > { %v2908_v33 = vpop.f32.mrf.mxu0  ;;  %v8005_v50 = vld [vmem:[#allocation167_spill] sm:$0xff] }
 0x361   : > { %3196 = vmatpush.bf16.msrb.mxu2 %v7982_v30  ;;  %3209 = vmatpush.bf16.msrb.mxu3 %v7983_v22  ;;  %v7993_v30 = vld [vmem:[#allocation156_spill] sm:$0xff]  ;;  %v2907_v22 = vadd.f32 %v2906_v27, %v2894_v29  ;;  %v8000_v27 = vld [vmem:[#allocation67_spill] sm:$0xff]  ;;  %v8003_v29 = vld [vmem:[#allocation165_spill] sm:$0xff] }
 0x362   : > { %3222 = vmatpush.bf16.msra.mxu0 %v7984_v0  ;;  %v7994_v0 = vld [vmem:[#allocation157_spill] sm:$0xff]  ;;  %v2948_v11 = vunpack.c.l.b16 %v8000_v27  ;;  %v8004_v33 = vld [vmem:[#allocation166_spill] sm:$0xff] }
 0x363   : > { %3235 = vmatpush.bf16.msra.mxu1 %v7985_v32  ;;  %v7995_v32 = vld [vmem:[#allocation158_spill] sm:$0xff] }
 0x365   : > { %3197 = vmatpush.bf16.msrb.mxu2 %v7986_v15  ;;  %3210 = vmatpush.bf16.msrb.mxu3 %v7987_v44  ;;  %v7079_v15 = vadd.f32 %v2919_v55, %v2907_v22  ;;  %v7996_v44 = vld [vmem:[#allocation159_spill] sm:$0xff]  ;;  %v8008_v22 = vld [vmem:[#allocation170_spill] sm:$0xff] }
 0x366   : > { %3223 = vmatpush.bf16.msra.mxu0 %v7988_v6  ;;  %v2882_v6 = vpop.f32.mrf.mxu2  ;;  %v8001_v55 = vld [vmem:[#allocation163_spill] sm:$0xff] }
 0x367   : > { %3236 = vmatpush.bf16.msra.mxu1 %v7989_v63  ;;  %v2895_v63 = vpop.f32.mrf.mxu3  ;;  %v8013_v6 = vld [vmem:[#allocation175_spill] sm:$0xff] }
 0x368   : > { %v8014_v63 = vld [vmem:[#allocation176_spill] sm:$0xff] }
 0x369   : > { %3198 = vmatpush.bf16.msrb.mxu2 %v7990_v17  ;;  %3211 = vmatpush.bf16.msrb.mxu3 %v7991_v1  ;;  %v2949_v17 = vunpack.c.h.b16 %v8000_v27  ;;  %v8002_v1 = vld [vmem:[#allocation164_spill] sm:$0xff]  ;;  %v8015_v27 = vld [vmem:[#allocation177_spill] sm:$0xff] }
 0x36a   : > { %3224 = vmatpush.bf16.msra.mxu0 %v7992_v49  ;;  %v8006_v49 = vld [vmem:[#allocation168_spill] sm:$0xff] }
 0x36b   : > { %3237 = vmatpush.bf16.msra.mxu1 %v7993_v30  ;;  %v7095_v30 = vpack.c.b16 %v2948_v11, %v2948_v11  ;;  %v8016_v11 = vld [vmem:[#allocation178_spill] sm:$0xff] }
 0x36d   : > { %3199 = vmatpush.bf16.msrb.mxu2 %v7994_v0  ;;  %3212 = vmatpush.bf16.msrb.mxu3 %v7995_v32  ;;  %v8009_v0 = vld [vmem:[#allocation171_spill] sm:$0xff]  ;;  %v8010_v32 = vld [vmem:[#allocation172_spill] sm:$0xff] }
 0x36e   : > { %3225 = vmatpush.bf16.msra.mxu0 %v7996_v44  ;;  %v8011_v44 = vld [vmem:[#allocation173_spill] sm:$0xff] }
 0x36f   : > { %3238 = vmatpush.bf16.msra.mxu1 %v7997_v21  ;;  %v8012_v21 = vld [vmem:[#allocation174_spill] sm:$0xff] }
 0x371   : > { %3200 = vmatpush.bf16.msrb.mxu2 %v7998_v24  ;;  %3213 = vmatpush.bf16.msrb.mxu3 %v7999_v35 }
 0x372   : > { %3226 = vmatpush.bf16.msra.mxu0 %v6428_v54  ;;  %v7097_v54 = vpack.c.b16 %v2949_v17, %v2949_v17  ;;  %v8019_v17 = vld [vmem:[#allocation181_spill] sm:$0xff] }
 0x373   : > { %3239 = vmatpush.bf16.msra.mxu1 %v6430_v58  ;;  %v8007_v58 = vld [vmem:[#allocation169_spill] sm:$0xff] }
 0x375   : > { %3201 = vmatpush.bf16.msrb.mxu2 %v8001_v55  ;;  %3214 = vmatpush.bf16.msrb.mxu3 %v8002_v1  ;;  %v8020_v55 = vld [vmem:[#allocation182_spill] sm:$0xff] }
 0x376   : > { %3227 = vmatpush.bf16.msra.mxu0 %v8003_v29 }
 0x377   : > { %3240 = vmatpush.bf16.msra.mxu1 %v8004_v33  ;;  %v3034_v35 = vpop.f32.mrf.mxu1 }
 0x378   : > { %3202 = vmatmul.bf16.vlgmr.msrb.gmra.mxu2 %v7095_v30  ;;  %3215 = vmatmul.bf16.vlgmr.msrb.gmra.mxu3 %v7097_v54  ;;  %v3021_v24 = vpop.f32.mrf.mxu0 }
 0x379   : > { %3246 = vmatpush.bf16.msra.mxu2 %v8005_v50  ;;  %3259 = vmatpush.bf16.msra.mxu3 %v8006_v49  ;;  %v8021_v50 = vld [vmem:[#allocation183_spill] sm:$0xff]  ;;  %v8022_v49 = vld [vmem:[#allocation184_spill] sm:$0xff] }
 0x37a   : > { %3272 = vmatpush.bf16.msrb.mxu0 %v8007_v58  ;;  %3241 = vmatmul.bf16.vlgmr.msra.gmra.mxu1 %v6905_v57  ;;  %v8018_v57 = vld [vmem:[#allocation180_spill] sm:$0xff] }
 0x37b   : > { %3285 = vmatpush.bf16.msrb.mxu1 %v8008_v22  ;;  %3228 = vmatmul.bf16.vlgmr.msra.gmra.mxu0 %v6903_v52  ;;  %v8017_v52 = vld [vmem:[#allocation179_spill] sm:$0xff]  ;;  %v2995_v1 = vpop.f32.mrf.mxu2  ;;  %v3008_v29 = vpop.f32.mrf.mxu3 }
 0x37c   : > { %v2996_v33 = vadd.f32 %v2995_v1, %v6881_v13  ;;  %v8028_v13 = vld [vmem:[#allocation190_spill] sm:$0xff]  ;;  %v8031_v1 = vld [vmem:[#allocation193_spill] sm:$0xff] }
 0x37d   : > { %3247 = vmatpush.bf16.msra.mxu2 %v8009_v0  ;;  %3260 = vmatpush.bf16.msra.mxu3 %v8010_v32  ;;  %v8023_v32 = vld [vmem:[#allocation185_spill] sm:$0xff] }
 0x37e   : > { %3273 = vmatpush.bf16.msrb.mxu0 %v8011_v44  ;;  %v3009_v58 = vadd.f32 %v3008_v29, %v2996_v33  ;;  %v8024_v44 = vld [vmem:[#allocation186_spill] sm:$0xff]  ;;  %v8034_v33 = vld [vmem:[#allocation196_spill] sm:$0xff] }
 0x37f   : > { %3286 = vmatpush.bf16.msrb.mxu1 %v8012_v21  ;;  %v3036_v0 = vpop.f32.mrf.mxu1  ;;  %v8032_v29 = vld [vmem:[#allocation194_spill] sm:$0xff] }
 0x380   : > { %v3023_v22 = vpop.f32.mrf.mxu0  ;;  %v3022_v21 = vadd.f32 %v3021_v24, %v3009_v58  ;;  %v8033_v24 = vld [vmem:[#allocation195_spill] sm:$0xff]  ;;  %v8038_v58 = vld [vmem:[#allocation200_spill] sm:$0xff]  ;;  %v8040_v0 = vld [vmem:[#allocation202_spill] sm:$0xff] }
 0x381   : > { %3248 = vmatpush.bf16.msra.mxu2 %v8013_v6  ;;  %3261 = vmatpush.bf16.msra.mxu3 %v8014_v63  ;;  %v8025_v6 = vld [vmem:[#allocation187_spill] sm:$0xff]  ;;  %v8026_v63 = vld [vmem:[#allocation188_spill] sm:$0xff]  ;;  %v8039_v22 = vld [vmem:[#allocation201_spill] sm:$0xff] }
 0x382   : > { %3274 = vmatpush.bf16.msrb.mxu0 %v8015_v27  ;;  %v3035_v27 = vadd.f32 %v3034_v35, %v3022_v21  ;;  %v8036_v35 = vld [vmem:[#allocation198_spill] sm:$0xff]  ;;  %v8043_v21 = vld [vmem:[#allocation205_spill] sm:$0xff] }
 0x383   : > { %3287 = vmatpush.bf16.msrb.mxu1 %v8016_v11  ;;  %v8027_v11 = vld [vmem:[#allocation189_spill] sm:$0xff] }
 0x385   : > { %3249 = vmatpush.bf16.msra.mxu2 %v8017_v52  ;;  %3262 = vmatpush.bf16.msra.mxu3 %v8018_v57  ;;  %v2997_v52 = vpop.f32.mrf.mxu2  ;;  %v3010_v57 = vpop.f32.mrf.mxu3 }
 0x386   : > { %3275 = vmatpush.bf16.msrb.mxu0 %v8019_v17  ;;  %v8029_v17 = vld [vmem:[#allocation191_spill] sm:$0xff]  ;;  %v8047_v52 = vld [vmem:[#allocation209_spill] sm:$0xff] }
 0x387   : > { %3288 = vmatpush.bf16.msrb.mxu1 %v8020_v55  ;;  %v8030_v55 = vld [vmem:[#allocation192_spill] sm:$0xff]  ;;  %v8051_v57 = vld [vmem:[#allocation213_spill] sm:$0xff] }
 0x389   : > { %3250 = vmatpush.bf16.msra.mxu2 %v8021_v50  ;;  %3263 = vmatpush.bf16.msra.mxu3 %v8022_v49  ;;  %v8035_v50 = vld [vmem:[#allocation197_spill] sm:$0xff]  ;;  %v8037_v49 = vld [vmem:[#allocation199_spill] sm:$0xff] }
 0x38a   : > { %3276 = vmatpush.bf16.msrb.mxu0 %v8023_v32  ;;  %v8041_v32 = vld [vmem:[#allocation203_spill] sm:$0xff] }
 0x38b   : > { %3289 = vmatpush.bf16.msrb.mxu1 %v8024_v44  ;;  %v8042_v44 = vld [vmem:[#allocation204_spill] sm:$0xff] }
 0x38d   : > { %3251 = vmatpush.bf16.msra.mxu2 %v8025_v6  ;;  %3264 = vmatpush.bf16.msra.mxu3 %v8026_v63  ;;  %v8044_v6 = vld [vmem:[#allocation206_spill] sm:$0xff]  ;;  %v8045_v63 = vld [vmem:[#allocation207_spill] sm:$0xff] }
 0x38e   : > { %3277 = vmatpush.bf16.msrb.mxu0 %v8027_v11  ;;  %v8046_v11 = vld [vmem:[#allocation208_spill] sm:$0xff] }
 0x38f   : > { %3290 = vmatpush.bf16.msrb.mxu1 %v8028_v13 }
 0x391   : > { %3252 = vmatpush.bf16.msra.mxu2 %v8029_v17  ;;  %3265 = vmatpush.bf16.msra.mxu3 %v8030_v55  ;;  %v8052_v17 = vld [vmem:[#allocation214_spill] sm:$0xff] }
 0x392   : > { %3278 = vmatpush.bf16.msrb.mxu0 %v8031_v1 }
 0x393   : > { %3291 = vmatpush.bf16.msrb.mxu1 %v8032_v29 }
 0x395   : > { %3253 = vmatpush.bf16.msra.mxu2 %v8033_v24  ;;  %3266 = vmatpush.bf16.msra.mxu3 %v8034_v33  ;;  %v8053_v24 = vld [vmem:[#allocation215_spill] sm:$0xff]  ;;  %v8054_v33 = vld [vmem:[#allocation216_spill] sm:$0xff] }
 0x396   : > { %3279 = vmatpush.bf16.msrb.mxu0 %v8035_v50 }
 0x397   : > { %3292 = vmatpush.bf16.msrb.mxu1 %v8036_v35 }
 0x398   : > { %3254 = vmatmul.bf16.vlgmr.msra.gmra.mxu2 %v6909_v2  ;;  %3267 = vmatmul.bf16.vlgmr.msra.gmra.mxu3 %v6911_v7  ;;  %v3073_v13 = vpop.f32.mrf.mxu0  ;;  %v3086_v2 = vpop.f32.mrf.mxu1  ;;  %v8048_v7 = vld [vmem:[#allocation210_spill] sm:$0xff] }
 0x399   : > { %3298 = vmatpush.bf16.msrb.mxu2 %v8037_v49  ;;  %3311 = vmatpush.bf16.msrb.mxu3 %v8038_v58  ;;  %v8055_v58 = vld [vmem:[#allocation217_spill] sm:$0xff] }
 0x39a   : > { %3324 = vmatpush.bf16.msra.mxu0 %v8039_v22  ;;  %3293 = vmatmul.bf16.vlgmr.msrb.gmra.mxu1 %v6953_v48  ;;  %v8050_v48 = vld [vmem:[#allocation212_spill] sm:$0xff]  ;;  %v8056_v22 = vld [vmem:[#allocation218_spill] sm:$0xff] }
 0x39b   : > { %3337 = vmatpush.bf16.msra.mxu1 %v8040_v0  ;;  %3280 = vmatmul.bf16.vlgmr.msrb.gmra.mxu0 %v6951_v31  ;;  %v8049_v31 = vld [vmem:[#allocation211_spill] sm:$0xff]  ;;  %v3047_v55 = vpop.f32.mrf.mxu2  ;;  %v3060_v1 = vpop.f32.mrf.mxu3 }
 0x39c   : > { %v3048_v29 = vadd.f32 %v3047_v55, %v3035_v27  ;;  %v8060_v27 = vld [vmem:[#allocation222_spill] sm:$0xff] }
 0x39d   : > { %3299 = vmatpush.bf16.msrb.mxu2 %v8041_v32  ;;  %3312 = vmatpush.bf16.msrb.mxu3 %v8042_v44  ;;  %v8057_v32 = vld [vmem:[#allocation219_spill] sm:$0xff]  ;;  %v8058_v44 = vld [vmem:[#allocation220_spill] sm:$0xff] }
 0x39e   : > { %3325 = vmatpush.bf16.msra.mxu0 %v8043_v21  ;;  %v3061_v50 = vadd.f32 %v3060_v1, %v3048_v29 }
 0x39f   : > { %3338 = vmatpush.bf16.msra.mxu1 %v8044_v6  ;;  %v8059_v6 = vld [vmem:[#allocation221_spill] sm:$0xff] }
 0x3a0   : > { %v3075_v35 = vpop.f32.mrf.mxu0  ;;  %v3088_v49 = vpop.f32.mrf.mxu1  ;;  %v3074_v0 = vadd.f32 %v3073_v13, %v3061_v50  ;;  %v8065_v13 = vld [vmem:[#allocation227_spill] sm:$0xff] }
 0x3a1   : > { %3300 = vmatpush.bf16.msrb.mxu2 %v8045_v63  ;;  %3313 = vmatpush.bf16.msrb.mxu3 %v8046_v11 }
 0x3a2   : > { %3326 = vmatpush.bf16.msra.mxu0 %v8047_v52  ;;  %v3087_v21 = vadd.f32 %v3086_v2, %v3074_v0  ;;  %v8061_v52 = vld [vmem:[#allocation223_spill] sm:$0xff]  ;;  %v8072_v2 = vld [vmem:[#allocation234_spill] sm:$0xff] }
 0x3a3   : > { %3339 = vmatpush.bf16.msra.mxu1 %v8048_v7  ;;  %v3049_v63 = vpop.f32.mrf.mxu2  ;;  %v3062_v11 = vpop.f32.mrf.mxu3  ;;  %v8062_v7 = vld [vmem:[#allocation224_spill] sm:$0xff] }
 0x3a5   : > { %3301 = vmatpush.bf16.msrb.mxu2 %v8049_v31  ;;  %3314 = vmatpush.bf16.msrb.mxu3 %v8050_v48  ;;  %v8063_v31 = vld [vmem:[#allocation225_spill] sm:$0xff]  ;;  %v8064_v48 = vld [vmem:[#allocation226_spill] sm:$0xff] }
 0x3a6   : > { %3327 = vmatpush.bf16.msra.mxu0 %v8051_v57  ;;  %v8076_v57 = vld [vmem:[#allocation238_spill] sm:$0xff] }
 0x3a7   : > { %3340 = vmatpush.bf16.msra.mxu1 %v8052_v17  ;;  %v8077_v17 = vld [vmem:[#allocation239_spill] sm:$0xff] }
 0x3a9   : > { %3302 = vmatpush.bf16.msrb.mxu2 %v8053_v24  ;;  %3315 = vmatpush.bf16.msrb.mxu3 %v8054_v33  ;;  %v8078_v24 = vld [vmem:[#allocation240_spill] sm:$0xff]  ;;  %v8079_v33 = vld [vmem:[#allocation241_spill] sm:$0xff] }
 0x3aa   : > { %3328 = vmatpush.bf16.msra.mxu0 %v8055_v58  ;;  %v8080_v58 = vld [vmem:[#allocation242_spill] sm:$0xff] }
 0x3ab   : > { %3341 = vmatpush.bf16.msra.mxu1 %v8056_v22  ;;  %v8081_v22 = vld [vmem:[#allocation243_spill] sm:$0xff] }
 0x3ad   : > { %3303 = vmatpush.bf16.msrb.mxu2 %v8057_v32  ;;  %3316 = vmatpush.bf16.msrb.mxu3 %v8058_v44  ;;  %v8082_v32 = vld [vmem:[#allocation244_spill] sm:$0xff]  ;;  %v8083_v44 = vld [vmem:[#allocation245_spill] sm:$0xff] }
 0x3ae   : > { %3329 = vmatpush.bf16.msra.mxu0 %v8059_v6 }
 0x3af   : > { %3342 = vmatpush.bf16.msra.mxu1 %v8060_v27  ;;  %v8084_v27 = vld [vmem:[#allocation246_spill] sm:$0xff] }
 0x3b1   : > { %3304 = vmatpush.bf16.msrb.mxu2 %v8061_v52  ;;  %3317 = vmatpush.bf16.msrb.mxu3 %v8062_v7  ;;  %v8086_v52 = vld [vmem:[#allocation248_spill] sm:$0xff]  ;;  %v8087_v7 = vld [vmem:[#allocation249_spill] sm:$0xff] }
 0x3b2   : > { %3330 = vmatpush.bf16.msra.mxu0 %v8063_v31  ;;  %v8088_v31 = vld [vmem:[#allocation250_spill] sm:$0xff] }
 0x3b3   : > { %3343 = vmatpush.bf16.msra.mxu1 %v8064_v48  ;;  %v8089_v48 = vld [vmem:[#allocation251_spill] sm:$0xff] }
 0x3b5   : > { %3305 = vmatpush.bf16.msrb.mxu2 %v6642_v16  ;;  %3318 = vmatpush.bf16.msrb.mxu3 %v6644_v59  ;;  %v8066_v16 = vld [vmem:[#allocation228_spill] sm:$0xff] }
 0x3b6   : > { %3331 = vmatpush.bf16.msra.mxu0 %v6648_v26  ;;  %v8067_v26 = vld [vmem:[#allocation229_spill] sm:$0xff] }
 0x3b7   : > { %3344 = vmatpush.bf16.msra.mxu1 %v6650_v46  ;;  %v8068_v46 = vld [vmem:[#allocation230_spill] sm:$0xff] }
 0x3b8   : > { %3306 = vmatmul.bf16.vlgmr.msrb.gmra.mxu2 %v6957_v62  ;;  %3319 = vmatmul.bf16.vlgmr.msrb.gmra.mxu3 %v6959_v25  ;;  %v3125_v59 = vpop.f32.mrf.mxu0  ;;  %v3138_v62 = vpop.f32.mrf.mxu1  ;;  %v8073_v25 = vld [vmem:[#allocation235_spill] sm:$0xff] }
 0x3b9   : > { %3350 = vmatpush.bf16.msra.mxu2 %v6652_v42  ;;  %3363 = vmatpush.bf16.msra.mxu3 %v6654_v41  ;;  %v8069_v42 = vld [vmem:[#allocation231_spill] sm:$0xff]  ;;  %v8070_v41 = vld [vmem:[#allocation232_spill] sm:$0xff] }
 0x3ba   : > { %3376 = vmatpush.bf16.msrb.mxu0 %v6656_v8  ;;  %3345 = vmatmul.bf16.vlgmr.msra.gmra.mxu1 %v7001_v20  ;;  %v8071_v8 = vld [vmem:[#allocation233_spill] sm:$0xff] }
 0x3bb   : > { %3389 = vmatpush.bf16.msrb.mxu1 %v8065_v13  ;;  %3332 = vmatmul.bf16.vlgmr.msra.gmra.mxu0 %v6999_v34  ;;  %v8074_v34 = vld [vmem:[#allocation236_spill] sm:$0xff]  ;;  %v8075_v20 = vld [vmem:[#allocation237_spill] sm:$0xff]  ;;  %v3099_v55 = vpop.f32.mrf.mxu2  ;;  %v3112_v1 = vpop.f32.mrf.mxu3 }
 0x3bc   : > { %v3100_v29 = vadd.f32 %v3099_v55, %v3087_v21  ;;  %v8085_v21 = vld [vmem:[#allocation247_spill] sm:$0xff]  ;;  %v8090_v13 = vld [vmem:[#allocation252_spill] sm:$0xff] }
 0x3bd   : > { %3351 = vmatpush.bf16.msra.mxu2 %v8066_v16  ;;  %3364 = vmatpush.bf16.msra.mxu3 %v8067_v26  ;;  %v8091_v16 = vld [vmem:[#allocation253_spill] sm:$0xff]  ;;  %v8106_v55 = vld [vmem:[#allocation268_spill] sm:$0xff] }
 0x3be   : > { %3377 = vmatpush.bf16.msrb.mxu0 %v8068_v46  ;;  %v3113_v50 = vadd.f32 %v3112_v1, %v3100_v29  ;;  %v8098_v46 = vld [vmem:[#allocation260_spill] sm:$0xff]  ;;  %v8107_v1 = vld [vmem:[#allocation269_spill] sm:$0xff] }
 0x3bf   : > { %3390 = vmatpush.bf16.msrb.mxu1 %v8069_v42  ;;  %v8102_v42 = vld [vmem:[#allocation264_spill] sm:$0xff] }
 0x3c0   : > { %v3127_v35 = vpop.f32.mrf.mxu0  ;;  %v3140_v49 = vpop.f32.mrf.mxu1  ;;  %v3126_v0 = vadd.f32 %v3125_v59, %v3113_v50 }
 0x3c1   : > { %3352 = vmatpush.bf16.msra.mxu2 %v8070_v41  ;;  %3365 = vmatpush.bf16.msra.mxu3 %v8071_v8  ;;  %v8103_v41 = vld [vmem:[#allocation265_spill] sm:$0xff] }
 0x3c2   : > { %3378 = vmatpush.bf16.msrb.mxu0 %v8072_v2  ;;  %v3139_v6 = vadd.f32 %v3138_v62, %v3126_v0  ;;  %v8104_v2 = vld [vmem:[#allocation266_spill] sm:$0xff] }
 0x3c3   : > { %3391 = vmatpush.bf16.msrb.mxu1 %v8073_v25  ;;  %v3101_v63 = vpop.f32.mrf.mxu2  ;;  %v3114_v11 = vpop.f32.mrf.mxu3  ;;  %v8105_v25 = vld [vmem:[#allocation267_spill] sm:$0xff] }
 0x3c5   : > { %3353 = vmatpush.bf16.msra.mxu2 %v8074_v34  ;;  %3366 = vmatpush.bf16.msra.mxu3 %v8075_v20 }
 0x3c6   : > { %3379 = vmatpush.bf16.msrb.mxu0 %v8076_v57 }
 0x3c7   : > { %3392 = vmatpush.bf16.msrb.mxu1 %v8077_v17 }
 0x3c9   : > { %3354 = vmatpush.bf16.msra.mxu2 %v8078_v24  ;;  %3367 = vmatpush.bf16.msra.mxu3 %v8079_v33 }
 0x3ca   : > { %3380 = vmatpush.bf16.msrb.mxu0 %v8080_v58 }
 0x3cb   : > { %3393 = vmatpush.bf16.msrb.mxu1 %v8081_v22 }
 0x3cd   : > { %3355 = vmatpush.bf16.msra.mxu2 %v8082_v32  ;;  %3368 = vmatpush.bf16.msra.mxu3 %v8083_v44 }
 0x3ce   : > { %3381 = vmatpush.bf16.msrb.mxu0 %v8084_v27 }
 0x3cf   : > { %3394 = vmatpush.bf16.msrb.mxu1 %v8085_v21 }
 0x3d1   : > { %3356 = vmatpush.bf16.msra.mxu2 %v8086_v52  ;;  %3369 = vmatpush.bf16.msra.mxu3 %v8087_v7 }
 0x3d2   : > { %3382 = vmatpush.bf16.msrb.mxu0 %v6738_v40  ;;  %v8092_v40 = vld [vmem:[#allocation254_spill] sm:$0xff] }
 0x3d3   : > { %3395 = vmatpush.bf16.msrb.mxu1 %v6740_v10  ;;  %v8093_v10 = vld [vmem:[#allocation255_spill] sm:$0xff] }
 0x3d5   : > { %3357 = vmatpush.bf16.msra.mxu2 %v6744_v37  ;;  %3370 = vmatpush.bf16.msra.mxu3 %v6746_v60  ;;  %v8094_v37 = vld [vmem:[#allocation256_spill] sm:$0xff]  ;;  %v8095_v60 = vld [vmem:[#allocation257_spill] sm:$0xff] }
 0x3d6   : > { %3383 = vmatpush.bf16.msrb.mxu0 %v6750_v45  ;;  %v8096_v45 = vld [vmem:[#allocation258_spill] sm:$0xff] }
 0x3d7   : > { %3396 = vmatpush.bf16.msrb.mxu1 %v6752_v12  ;;  %v8097_v12 = vld [vmem:[#allocation259_spill] sm:$0xff] }
 0x3d8   : > { %3358 = vmatmul.bf16.vlgmr.msra.gmra.mxu2 %v7005_v3  ;;  %3371 = vmatmul.bf16.vlgmr.msra.gmra.mxu3 %v7007_v43  ;;  %v3177_v26 = vpop.f32.mrf.mxu0  ;;  %v3190_v3 = vpop.f32.mrf.mxu1  ;;  %v8099_v43 = vld [vmem:[#allocation261_spill] sm:$0xff] }
 0x3d9   : > { %3402 = vmatpush.bf16.msrb.mxu2 %v8088_v31  ;;  %3415 = vmatpush.bf16.msrb.mxu3 %v8089_v48 }
 0x3da   : > { %3428 = vmatpush.bf16.msra.mxu0 %v8090_v13  ;;  %3397 = vmatmul.bf16.vlgmr.msrb.gmra.mxu1 %v7049_v61  ;;  %v8101_v61 = vld [vmem:[#allocation263_spill] sm:$0xff] }
 0x3db   : > { %3441 = vmatpush.bf16.msra.mxu1 %v8091_v16  ;;  %3384 = vmatmul.bf16.vlgmr.msrb.gmra.mxu0 %v7047_v47  ;;  %v8100_v47 = vld [vmem:[#allocation262_spill] sm:$0xff]  ;;  %v3151_v8 = vpop.f32.mrf.mxu2  ;;  %v3164_v59 = vpop.f32.mrf.mxu3 }
 0x3dc   : > { %v3152_v62 = vadd.f32 %v3151_v8, %v3139_v6 }
 0x3dd   : > { %3403 = vmatpush.bf16.msrb.mxu2 %v8092_v40  ;;  %3416 = vmatpush.bf16.msrb.mxu3 %v8093_v10 }
 0x3de   : > { %3429 = vmatpush.bf16.msra.mxu0 %v8094_v37  ;;  %v3165_v34 = vadd.f32 %v3164_v59, %v3152_v62 }
 0x3df   : > { %3442 = vmatpush.bf16.msra.mxu1 %v8095_v60 }
 0x3e0   : > { %v3179_v20 = vpop.f32.mrf.mxu0  ;;  %v3192_v57 = vpop.f32.mrf.mxu1  ;;  %v3178_v17 = vadd.f32 %v3177_v26, %v3165_v34 }
 0x3e1   : > { %3404 = vmatpush.bf16.msrb.mxu2 %v8096_v45  ;;  %3417 = vmatpush.bf16.msrb.mxu3 %v8097_v12 }
 0x3e2   : > { %3430 = vmatpush.bf16.msra.mxu0 %v8098_v46  ;;  %v3191_v29 = vadd.f32 %v3190_v3, %v3178_v17 }
 0x3e3   : > { %3443 = vmatpush.bf16.msra.mxu1 %v8099_v43  ;;  %v3153_v24 = vpop.f32.mrf.mxu2  ;;  %v3166_v33 = vpop.f32.mrf.mxu3 }
 0x3e5   : > { %3405 = vmatpush.bf16.msrb.mxu2 %v8100_v47  ;;  %3418 = vmatpush.bf16.msrb.mxu3 %v8101_v61 }
 0x3e6   : > { %3431 = vmatpush.bf16.msra.mxu0 %v8102_v42 }
 0x3e7   : > { %3444 = vmatpush.bf16.msra.mxu1 %v8103_v41  ;;  %v3456_v41 = vld [vmem:[#allocation10] sm:$0x3] }
 0x3e9   : > { %3406 = vmatpush.bf16.msrb.mxu2 %v8104_v2  ;;  %3419 = vmatpush.bf16.msrb.mxu3 %v8105_v25  ;;  %v3458_v25 = vperm.slane %v3456_v41, 0 }
 0x3ea   : > { %3432 = vmatpush.bf16.msra.mxu0 %v6814_v14 }
 0x3eb   : > { %3445 = vmatpush.bf16.msra.mxu1 %v6816_v18 }
 0x3ed   : > { %3407 = vmatpush.bf16.msrb.mxu2 %v8106_v55  ;;  %3420 = vmatpush.bf16.msrb.mxu3 %v8107_v1  ;;  %v3459_v55 = vperm.slane %v3456_v41, 1 }
 0x3ee   : > { %3433 = vmatpush.bf16.msra.mxu0 %v6827_v5 }
 0x3ef   : > { %3446 = vmatpush.bf16.msra.mxu1 %v6829_v19 }
 0x3f1   : > { %3408 = vmatpush.bf16.msrb.mxu2 %v6833_v28  ;;  %3421 = vmatpush.bf16.msrb.mxu3 %v6835_v53 }
 0x3f2   : > { %3434 = vmatpush.bf16.msra.mxu0 %v6839_v39 }
 0x3f3   : > { %3447 = vmatpush.bf16.msra.mxu1 %v6841_v9 }
 0x3f5   : > { %3409 = vmatpush.bf16.msrb.mxu2 %v6845_v23  ;;  %3422 = vmatpush.bf16.msrb.mxu3 %v6847_v38 }
 0x3f6   : > { %3435 = vmatpush.bf16.msra.mxu0 %v6851_v36 }
 0x3f7   : > { %3448 = vmatpush.bf16.msra.mxu1 %v6853_v51  ;;  %v3242_v18 = vpop.f32.mrf.mxu1 }
 0x3f8   : > { %3410 = vmatmul.bf16.vlgmr.msrb.gmra.mxu2 %v7053_v56  ;;  %3423 = vmatmul.bf16.vlgmr.msrb.gmra.mxu3 %v7055_v4  ;;  %v3229_v14 = vpop.f32.mrf.mxu0 }
 0x3f9   : > { %3436 = vmatmul.bf16.vlgmr.msra.gmra.mxu0 %v7095_v30  ;;  %v3230_v5 = vadd.f32 %v3229_v14, %v7079_v15 }
 0x3fa   : > { %3449 = vmatmul.bf16.vlgmr.msra.gmra.mxu1 %v7097_v54 }
 0x3fb   : > { %v3243_v19 = vadd.f32 %v3242_v18, %v3230_v5  ;;  %v3203_v28 = vpop.f32.mrf.mxu2  ;;  %v3216_v53 = vpop.f32.mrf.mxu3 }
 0x3fc   : > { %v3204_v39 = vadd.f32 %v3203_v28, %v3191_v29 }
 0x3fe   : > { %v7247_v9 = vadd.f32 %v3216_v53, %v3204_v39 }
 0x3ff   : > { %v3244_v38 = vpop.f32.mrf.mxu1 }
 0x400   : > { %v3231_v23 = vpop.f32.mrf.mxu0  ;;  %v3462_v1 = vmul.f32 %v3458_v25, %v7247_v9 }
 0x402   : > { %v3469_v18 = vmul.f32 %v3462_v1, %v7247_v9  ;;  %v3464_v5 = vsel %vm542_vm2, %v3462_v1, 0.0 }
 0x403   : > { %v3205_v36 = vpop.f32.mrf.mxu2  ;;  %v3218_v51 = vpop.f32.mrf.mxu3 }
 0x404   : > { %v3471_v39 = vsel %vm542_vm2, %v3469_v18, 0.0 }
 0x417   : > { %v3294_v4 = vpop.f32.mrf.mxu1 }
 0x418   : > { %v3281_v56 = vpop.f32.mrf.mxu0 }
 0x41b   : > { %v3255_v50 = vpop.f32.mrf.mxu2  ;;  %v3268_v30 = vpop.f32.mrf.mxu3 }
 0x41c   : > { %v3256_v35 = vadd.f32 %v3255_v50, %v3243_v19 }
 0x41e   : > { %v3269_v54 = vadd.f32 %v3268_v30, %v3256_v35 }
 0x41f   : > { %v3296_v58 = vpop.f32.mrf.mxu1 }
 0x420   : > { %v3283_v49 = vpop.f32.mrf.mxu0  ;;  %v3282_v22 = vadd.f32 %v3281_v56, %v3269_v54 }
 0x422   : > { %v3295_v15 = vadd.f32 %v3294_v4, %v3282_v22 }
 0x423   : > { %v3257_v0 = vpop.f32.mrf.mxu2  ;;  %v3270_v32 = vpop.f32.mrf.mxu3 }
 0x424   : > { %v3454_v32 = vld [vmem:[%s7317_s5] sm:$0xf] }
 0x437   : > { %v3346_v6 = vpop.f32.mrf.mxu1 }
 0x438   : > { %v3333_v44 = vpop.f32.mrf.mxu0 }
 0x43b   : > { %v3307_v27 = vpop.f32.mrf.mxu2  ;;  %v3320_v21 = vpop.f32.mrf.mxu3 }
 0x43c   : > { %v3308_v40 = vadd.f32 %v3307_v27, %v3295_v15 }
 0x43e   : > { %v3321_v60 = vadd.f32 %v3320_v21, %v3308_v40 }
 0x43f   : > { %v3348_v11 = vpop.f32.mrf.mxu1 }
 0x440   : > { %v3335_v63 = vpop.f32.mrf.mxu0  ;;  %v3334_v26 = vadd.f32 %v3333_v44, %v3321_v60 }
 0x441   : > { %v3455_v63 = vld [vmem:[%s7318_s6] sm:$0xf] }
 0x442   : > { %v3347_v3 = vadd.f32 %v3346_v6, %v3334_v26 }
 0x443   : > { %v3309_v52 = vpop.f32.mrf.mxu2  ;;  %v3322_v7 = vpop.f32.mrf.mxu3 }
 0x457   : > { %v3398_v48 = vpop.f32.mrf.mxu1 }
 0x458   : > { %v3385_v31 = vpop.f32.mrf.mxu0 }
 0x45b   : > { %v3359_v13 = vpop.f32.mrf.mxu2  ;;  %v3372_v16 = vpop.f32.mrf.mxu3 }
 0x45c   : > { %v3360_v46 = vadd.f32 %v3359_v13, %v3347_v3 }
 0x45e   : > { %v3373_v43 = vadd.f32 %v3372_v16, %v3360_v46  ;;  %v3513_v46 = vld [vmem:[#allocation7] sm:$0x3] }
 0x45f   : > { %v3400_v37 = vpop.f32.mrf.mxu1 }
 0x460   : > { %v3387_v10 = vpop.f32.mrf.mxu0  ;;  %v3386_v47 = vadd.f32 %v3385_v31, %v3373_v43 }
 0x462   : > { %v3399_v8 = vadd.f32 %v3398_v48, %v3386_v47 }
 0x463   : > { %v3361_v45 = vpop.f32.mrf.mxu2  ;;  %v3374_v12 = vpop.f32.mrf.mxu3 }
 0x476   : > { %v3437_v61 = vpop.f32.mrf.mxu0 }
 0x477   : > { %v3450_v42 = vpop.f32.mrf.mxu1 }
 0x47b   : > { %v3411_v59 = vpop.f32.mrf.mxu2  ;;  %v3424_v62 = vpop.f32.mrf.mxu3 }
 0x47c   : > { %v3412_v2 = vadd.f32 %v3411_v59, %v3399_v8 }
 0x47e   : > { %v3425_v34 = vadd.f32 %v3424_v62, %v3412_v2  ;;  %v3439_v20 = vpop.f32.mrf.mxu0 }
 0x47f   : > { %v3452_v57 = vpop.f32.mrf.mxu1 }
 0x480   : > { %v3438_v17 = vadd.f32 %v3437_v61, %v3425_v34 }
 0x482   : > { %v3451_v29 = vadd.f32 %v3450_v42, %v3438_v17 }
 0x483   : > { %v3413_v24 = vpop.f32.mrf.mxu2  ;;  %v3426_v33 = vpop.f32.mrf.mxu3 }
 0x484   : > { %v3463_v14 = vmul.f32 %v3459_v55, %v3451_v29 }
 0x486   : > { %v3465_v19 = vsel %vm542_vm2, %v3463_v14, 0.0  ;;  %v3470_v28 = vmul.f32 %v3463_v14, %v3451_v29 }
 0x487   : > { %v3466_v53 = vadd.f32 %v3465_v19, %v3464_v5 }
 0x488   : > { %v3472_v23 = vsel %vm542_vm2, %v3470_v28, 0.0 }
 0x489   : > { %3467 = vadd.xlane.f32.xlu1 %v3466_v53  ;;  %v3473_v38 = vadd.f32 %v3472_v23, %v3471_v39  ;;  %v3551_v53 = vld [vmem:[%s7320_s8] sm:$0xf] }
 0x48b   : > { %3474 = vadd.xlane.f32.xlu2 %v3473_v38 }
 0x4fc   : > { %v3468_v36 = vpop.xlane.xlu1 %3467 }
 0x4fd   : > { %v3476_v51 = vmul.f32 0.0051020407, %v3468_v36  ;;  %v3552_v36 = vld [vmem:[%s7321_s9] sm:$0xf] }
 0x4fe   : > { %v3475_v56 = vpop.xlane.xlu2 %3474 }
 0x4ff   : > { %v3478_v4 = vmul.f32 %v3476_v51, %v3476_v51  ;;  %v3477_v50 = vmul.f32 0.0051020407, %v3475_v56 }
 0x501   : > { %v3479_v30 = vsub.f32 %v3477_v50, %v3478_v4 }
 0x503   : > { %v3480_v35 = vmax.f32 %v3479_v30, 0.0 }
 0x505   : > { %v3481_v54 = vadd.f32 1e-05, %v3480_v35 }
 0x507   : > { %5299 = vrsqrt.f32 %v3481_v54  ;;  %vm3488_vm7 = vweird.f32 %v3481_v54 }
 0x50d   : > { %v5300_v49 = vpop.eup %5299 }
 0x50e   : > { %v3483_v58 = vmul.f32 %v5300_v49, %v3481_v54  ;;  %vm3489_vm6 = vweird.f32 %v5300_v49  ;;  %v3600_v54 = vld.sshfl [vmem:[#allocation1 + $0x8] sm:$0xff pattern:$0x75316420] }
 0x50f   : > { %vm3490_vm8 = vmor %vm3488_vm7, %vm3489_vm6 }
 0x510   : > { %v3484_v22 = vmul.f32 %v5300_v49, %v3483_v58 }
 0x512   : > { %v3485_v15 = vmul.f32 0.5, %v3484_v22  ;;  %v3599_v22 = vld.sshfl [vmem:[#allocation1] sm:$0xff pattern:$0x75316420] }
 0x514   : > { %v3486_v0 = vsub.f32 1.5, %v3485_v15 }
 0x516   : > { %v3487_v44 = vmul.f32 %v5300_v49, %v3486_v0 }
 0x518   : > { %v3491_v6 = vsel %vm3490_vm8, %v5300_v49, %v3487_v44 }
 0x519   : > { %v3492_v27 = vmul.f32 %v3491_v6, %v3454_v32 }
 0x51b   : > { %3495 = vperm.xlu0 %5296, %v3492_v27   ;;  %v3500_v21 = vmul.f32 %v3492_v27, %v3476_v51 }
 0x51d   : > { %v3501_v11 = vsub.f32 %v3455_v63, %v3500_v21 }
 0x523   : > { %3504 = vperm.xlu0 %5296, %v3501_v11  }
 0x58d   : > { %v3496_v52 = vpop.permute.xlu0 %3495 }
 0x58e   : > { %v3498_v7 = vmul.f32 %v3496_v52, %v7247_v9  ;;  %v3499_v31 = vmul.f32 %v3496_v52, %v3451_v29 }
 0x595   : > { %v3505_v48 = vpop.permute.xlu0 %3504 }
 0x596   : > { %v3507_v13 = vadd.f32 %v3505_v48, %v3498_v7  ;;  %v3508_v16 = vadd.f32 %v3505_v48, %v3499_v31 }
 0x598   : > { %v3509_v40 = vmax.f32 %v3507_v13, 0.0  ;;  %v3510_v10 = vmax.f32 %v3508_v16, 0.0 }
 0x59a   : > { %v3511_v37 = vmin.f32 %v3509_v40, 6.0  ;;  %v3512_v60 = vmin.f32 %v3510_v10, 6.0 }
 0x59c   : > { %v3514_v45 = vpack.c.bf16 %v3511_v37, %v3511_v37  ;;  %v3515_v12 = vpack.c.bf16 %v3512_v60, %v3512_v60 }
 0x59e   : > { %v3520_v26 = vsel %vm507_vm0, %v3514_v45, 0  ;;  %v3523_v3 = vsel %vm507_vm0, %v3515_v12, 0 }
 0x59f   : > { %3532 = vmatpush.bf16.msra.mxu2 %v3520_v26  ;;  %3545 = vmatpush.bf16.msra.mxu3 %v3523_v3 }
 0x5a2   : > { %4907 = vmatmul.msk.bf16.vlgmr.msra.gmra.mxu2 %vm503_vm1, %v3513_v46  ;;  %4908 = vmatmul.msk.bf16.vlgmr.msra.gmra.mxu3 %vm503_vm1, %v3513_v46 }
 0x625   : > { %v3534_v9 = vpop.f32.mrf.mxu2  ;;  %v3547_v43 = vpop.f32.mrf.mxu3 }
 0x626   : > { %v3558_v47 = vmul.f32 %v3534_v9, %v3534_v9  ;;  %v3559_v61 = vmul.f32 %v3547_v43, %v3547_v43  ;;  %v3553_v42 = vsel %vm542_vm2, %v3534_v9, 0.0  ;;  %v3554_v41 = vsel %vm542_vm2, %v3547_v43, 0.0 }
 0x627   : > { %v3555_v8 = vadd.f32 %v3554_v41, %v3553_v42 }
 0x628   : > { %v3560_v59 = vsel %vm542_vm2, %v3558_v47, 0.0  ;;  %v3561_v62 = vsel %vm542_vm2, %v3559_v61, 0.0 }
 0x629   : > { %3556 = vadd.xlane.f32.xlu0 %v3555_v8  ;;  %v3562_v2 = vadd.f32 %v3561_v62, %v3560_v59 }
 0x62b   : > { %3563 = vadd.xlane.f32.xlu2 %v3562_v2 }
 0x62d   : > { %v3536_v25 = vpop.f32.mrf.mxu2  ;;  %v3549_v34 = vpop.f32.mrf.mxu3 }
 0x69c   : > { %v3557_v20 = vpop.xlane.xlu0 %3556 }
 0x69d   : > { %v3565_v57 = vmul.f32 0.00390625, %v3557_v20 }
 0x69e   : > { %v3564_v17 = vpop.xlane.xlu2 %3563 }
 0x69f   : > { %v3567_v55 = vmul.f32 %v3565_v57, %v3565_v57  ;;  %v3566_v1 = vmul.f32 0.00390625, %v3564_v17 }
 0x6a1   : > { %v3568_v29 = vsub.f32 %v3566_v1, %v3567_v55 }
 0x6a3   : > { %v3569_v24 = vmax.f32 %v3568_v29, 0.0 }
 0x6a5   : > { %v3570_v33 = vadd.f32 1e-05, %v3569_v24 }
 0x6a7   : > { %5301 = vrsqrt.f32 %v3570_v33  ;;  %vm3577_vm10 = vweird.f32 %v3570_v33 }
 0x6ad   : > { %v5302_v14 = vpop.eup %5301 }
 0x6ae   : > { %v3572_v18 = vmul.f32 %v5302_v14, %v3570_v33  ;;  %vm3578_vm9 = vweird.f32 %v5302_v14 }
 0x6af   : > { %vm3579_vm11 = vmor %vm3577_vm10, %vm3578_vm9 }
 0x6b0   : > { %v3573_v5 = vmul.f32 %v5302_v14, %v3572_v18 }
 0x6b2   : > { %v3574_v19 = vmul.f32 0.5, %v3573_v5 }
 0x6b4   : > { %v3575_v28 = vsub.f32 1.5, %v3574_v19 }
 0x6b6   : > { %v3576_v39 = vmul.f32 %v5302_v14, %v3575_v28 }
 0x6b8   : > { %v3580_v23 = vsel %vm3579_vm11, %v5302_v14, %v3576_v39 }
 0x6b9   : > { %v3581_v38 = vmul.f32 %v3580_v23, %v3551_v53 }
 0x6bb   : > { %3584 = vperm.xlu1 %5294, %v3581_v38   ;;  %v3589_v51 = vmul.f32 %v3581_v38, %v3565_v57 }
 0x6bd   : > { %v3590_v56 = vsub.f32 %v3552_v36, %v3589_v51 }
 0x6bf   : > { %3593 = vperm.xlu2 %5295, %v3590_v56  }
 0x719   : > { %v3594_v35 = vpop.permute.xlu2 %3593 }
 0x72d   : > { %v3585_v4 = vpop.permute.xlu1 %3584 }
 0x72e   : > { %v3587_v50 = vmul.f32 %v3585_v4, %v3534_v9  ;;  %v3588_v30 = vmul.f32 %v3585_v4, %v3547_v43 }
 0x730   : > { %v3596_v49 = vadd.f32 %v3594_v35, %v3587_v50  ;;  %v3597_v58 = vadd.f32 %v3594_v35, %v3588_v30 }
 0x732   : > { %v3604_v15 = vadd.f32 %v3600_v54, %v3597_v58  ;;  %v3603_v0 = vadd.f32 %v3599_v22, %v3596_v49 }
 0x734   : > { %v3607_v32 = vrot.slane %v3604_v15, 4 }
 0x736   : > { %v3608_v44 = vsel %vm542_vm2, %v3603_v0, %v3607_v32 }
 0x737   : > { %3610 = vst [vmem:[%s491_s20] sm:$0xff] %v3608_v44 }
 0x738   : > { %5480 = shalt.err (!%p5477_p9)
}
 0x739   : > { %5222 = dma.vmem_to_hbm [thread:$0]  (%p5688_p5), %s3626_s13, 128, %s3628_s7, %s3612_s28  }
 0x73a PF: > { %s3639_s17 = sand.u32 1, %s5515_s21   ;;  %p8108_p10 = scmp.ge.s32.totalorder %s5527_s24, 2 }
 0x73b   : > { %s3640_s11 = scalar_lea.sflag [#allocation4], %s3639_s17 }
 0x73c   : > { %p5242_p13 = pnand %p8108_p10, %p5692_p6 }
 0x73e   : > { %p5243_p11 = pneg %p5242_p13 }
 0x740   : > { %5510 = dma.done.wait (%p5243_p11), %s3640_s11, 128  }
 0x741   : > { %5512 = vsyncadd (%p5243_p11), %s3640_s11, 4294967168  ;;  %s8109_s24 = sld [smem:[#allocation17_spill]]  ;;  %s8112_s21 = smov %s5519_s22 }
 0x742   : > { %s8110_s29 = sld [smem:[#allocation16_spill]] }
 0x743   : > { %s8111_s23 = sld [smem:[#allocation18_spill]] }
 0x747   : > { %p27_p0 = scmp.ge.s32.totalorder %s8109_s24, 4  }
 0x748   : > { %s8113_s22 = smov %s8110_s29 }
 0x749   :  { %29 = sbr.rel (!%p27_p0) target bundleno = 12 (0xc), region = 129 }
 0x74e   :  { %3646 = vsyncpa [#allocation3], 1 }
 0x74f   :  { %3648 = vsyncpa [#allocation3 + $0x1], 1 }
 0x750   :  { %3649 = vsyncpa [#allocation6], 1 }
 0x751   :  { %3650 = vsyncpa [#allocation9], 1 }
 0x752   :  { %3651 = vsyncpa [#allocation4], 1 }
 0x753   :  { %3653 = vsyncpa [#allocation4 + $0x1], 1 }

</bundles_post_ra>
